<compile_context>
chip_gen: v6e
topology: v6e:2x2x1
jax: 0.10.0
libtpu: 0.0.40
codegen_flags: <defaults>
</compile_context>

<pallas_src>
import math
import numpy as np
import jax
import jax.numpy as jnp
from jax import lax
from jax.experimental import pallas as pl
from jax.experimental.pallas import tpu as pltpu

# ----------------------------- config (small synthetic shapes) ----------------
N_CLS  = 4          # number of classes
N_CTX  = 4          # learned context tokens
SEQ    = 16         # text context length (power of two -> bitwise block test)
D      = 64         # transformer width
HEADS  = 4
DH     = D // HEADS
MLP    = 4 * D
LAYERS = 2
PROJ   = 32         # text projection / image feature dim
BATCH  = 2
NAME_LENS = [1, 2, 1, 3]
EPS = 1e-5
NEG_INF = -1e30

N_TILES    = 2                    # class-tile grid axis ("parallel" -> 2 TCs on v7x)
N_CLS_TILE = N_CLS // N_TILES     # classes per grid step
T_TILE     = N_CLS_TILE * SEQ     # tokens per grid step (32)
T          = N_CLS * SEQ          # all tokens (64)


def _layer_norm(x, g, b):
    mu = jnp.mean(x, axis=-1, keepdims=True)
    var = jnp.mean(jnp.square(x - mu), axis=-1, keepdims=True)
    return (x - mu) * lax.rsqrt(var + EPS) * g + b


# ----------------------------- the fused Pallas kernel -------------------------
def coop_fused_kernel(
    x_ref, onehot_ref,
    ln1_g, ln1_b, wqkv, bqkv, wo, bo,
    ln2_g, ln2_b, w1, b1, w2, b2,
    lnf_g, lnf_b, proj_ref, img_ref, scale_ref,
    out_ref,
):
    x = x_ref[...]                                    # (T_TILE, D) f32: this tile's classes
    scale = 1.0 / math.sqrt(DH)

    # Block-diagonal causal mask, built in-kernel (VPU iota/compare; no HBM constant).
    # SEQ is a power of two, so "same class" == equal high bits.
    row = lax.broadcasted_iota(jnp.int32, (T_TILE, T_TILE), 0)
    col = lax.broadcasted_iota(jnp.int32, (T_TILE, T_TILE), 1)
    same_class = (row & jnp.int32(-SEQ)) == (col & jnp.int32(-SEQ))
    allowed = jnp.logical_and(same_class, col <= row)
    mask_add = jnp.where(allowed, jnp.float32(0.0), jnp.float32(NEG_INF))

    for l in range(LAYERS):       # static unroll; fine at 2 layers (see header note 8)
        # ---- multi-head causal self-attention ----
        h = _layer_norm(x, ln1_g[l], ln1_b[l])                         # f32 stats
        # fused QKV: one lane-dense (T_TILE, D)@(D, 3D) bf16 matmul, one bias add
        qkv = jnp.dot(h.astype(jnp.bfloat16), wqkv[l],
                      preferred_element_type=jnp.float32) + bqkv[l]    # (T_TILE, 3D) f32

        o_heads = []
        for hd in range(HEADS):                   # cheap static lane slices of qkv
            q = qkv[:, hd * DH:(hd + 1) * DH]
            k = qkv[:, D + hd * DH:D + (hd + 1) * DH]
            v = qkv[:, 2 * D + hd * DH:2 * D + (hd + 1) * DH]
            # scores: contraction on last axes (no materialized .T)
            s = lax.dot_general(q.astype(jnp.bfloat16), k.astype(jnp.bfloat16),
                                (((1,), (1,)), ((), ())),
                                preferred_element_type=jnp.float32) * scale
            s = s + mask_add                                           # mask on f32 scores
            s = s - jnp.max(s, axis=-1, keepdims=True)
            p = jnp.exp(s)
            p = p * pl.reciprocal(jnp.sum(p, axis=-1, keepdims=True), approx=True)
            o_heads.append(jnp.dot(p.astype(jnp.bfloat16), v.astype(jnp.bfloat16),
                                   preferred_element_type=jnp.float32))  # (T_TILE, DH)

        # concat(heads) @ Wo as ONE matmul — no (H,T,D) intermediate, no head-sum
        o_cat = jnp.concatenate(o_heads, axis=-1)                      # (T_TILE, D) f32
        attn = jnp.dot(o_cat.astype(jnp.bfloat16), wo[l],
                       preferred_element_type=jnp.float32)             # (T_TILE, D)
        x = x + attn + bo[l]

        # ---- MLP (QuickGELU, as in CLIP) ----
        h2 = _layer_norm(x, ln2_g[l], ln2_b[l])
        m = jnp.dot(h2.astype(jnp.bfloat16), w1[l],
                    preferred_element_type=jnp.float32) + b1[l]
        # sigmoid via EUP exp + approx reciprocal (keeps the divide off the VALU)
        m = m * pl.reciprocal(1.0 + jnp.exp(-1.702 * m), approx=True)
        m = jnp.dot(m.astype(jnp.bfloat16), w2[l],
                    preferred_element_type=jnp.float32) + b2[l]
        x = x + m

    # ---- EOT gather as a one-hot selection matmul, ln_final, text projection ----
    eot_x = jnp.dot(onehot_ref[0], x, preferred_element_type=jnp.float32)  # (N_CLS_TILE, D)
    tf = _layer_norm(eot_x, lnf_g[...], lnf_b[...])
    tf = jnp.dot(tf, proj_ref[...], preferred_element_type=jnp.float32)    # (N_CLS_TILE, PROJ)
    tf = tf * lax.rsqrt(jnp.sum(tf * tf, axis=-1, keepdims=True))          # L2 normalize

    # ---- logits: exp(logit_scale) * img @ txt.T (contraction on last axes) ----
    img = img_ref[...]                                                     # (BATCH, PROJ)
    logits = lax.dot_general(img, tf, (((1,), (1,)), ((), ())),
                             preferred_element_type=jnp.float32)           # (BATCH, N_CLS_TILE)
    out_ref[0] = scale_ref[0, 0] * logits


# ----------------------------- wrapper / glue -----------------------------------
def _const_spec(a):
    """Full-array VMEM block with a constant block index: the block index never
    changes across grid steps, so the tile is DMA'd once (no per-step re-fetch)."""
    zeros = (0,) * a.ndim
    return pl.BlockSpec(a.shape, lambda i, _z=zeros: _z)


def build_prompts(ctx, token_prefix, token_suffix, name_lens, n_ctx):
    # class_token_position == 'middle'
    half = n_ctx // 2
    prompts = []
    for i, L in enumerate(name_lens):
        prefix_i = token_prefix[i:i + 1]                  # (1, 1, D)
        class_i = token_suffix[i:i + 1, :L, :]            # (1, L, D)
        suffix_i = token_suffix[i:i + 1, L:, :]           # (1, rest, D)
        prompt = jnp.concatenate(
            [prefix_i, ctx[None, :half], class_i, ctx[None, half:], suffix_i],
            axis=1)
        prompts.append(prompt)
    return jnp.concatenate(prompts, axis=0)               # (N_CLS, SEQ, D)


def pack_kernel_params(params):
    """Repack reference-layout params into the kernel layout (stacked per layer,
    fused QKV kept whole, bf16 MXU weights). Done once outside the forward pass."""
    def stack(idx):
        return jnp.stack([lp[idx] for lp in params['layers']])

    return {
        'ln1_g': stack(0), 'ln1_b': stack(1),
        'wqkv': stack(2).astype(jnp.bfloat16),     # (LAYERS, D, 3D) — fused QKV
        'bqkv': stack(3),                          # (LAYERS, 1, 3D)
        'wo':   stack(4).astype(jnp.bfloat16),     # (LAYERS, D, D) concat-heads layout
        'bo':   stack(5),
        'ln2_g': stack(6), 'ln2_b': stack(7),
        'w1': stack(8).astype(jnp.bfloat16), 'b1': stack(9),
        'w2': stack(10).astype(jnp.bfloat16), 'b2': stack(11),
    }


def coop_forward(image_features, params, pack):
    # PromptLearner ('middle') + positional embedding: pure data movement, fused by
    # XLA into the single (T, D) HBM buffer the kernel reads once.
    prompts = build_prompts(params['ctx'], params['token_prefix'],
                            params['token_suffix'], NAME_LENS, N_CTX)
    x0 = (prompts + params['pos_emb'][None]).reshape(T, D)

    # EOT positions (argmax over token ids) -> per-tile one-hot selection matrices.
    eot = jnp.argmax(params['tokenized_prompts'], axis=-1).astype(jnp.int32)   # (N_CLS,)
    local_pos = (jnp.arange(N_CLS, dtype=jnp.int32) % N_CLS_TILE) * SEQ + eot  # pos in tile
    onehot = (local_pos[:, None] ==
              jnp.arange(T_TILE, dtype=jnp.int32)[None, :]).astype(jnp.float32)
    onehot3 = onehot.reshape(N_TILES, N_CLS_TILE, T_TILE)

    # image-feature normalization + fp16 round trip (module glue, (2,32) only)
    img = image_features
    img = img / jnp.sqrt(jnp.sum(img * img, axis=-1, keepdims=True))
    img = img.astype(jnp.float16).astype(jnp.float32)

    # hoisted exp(logit_scale): one scalar, passed via SMEM
    scale = jnp.exp(params['logit_scale']).reshape(1, 1)

    weight_ops = [pack['ln1_g'], pack['ln1_b'], pack['wqkv'], pack['bqkv'],
                  pack['wo'], pack['bo'], pack['ln2_g'], pack['ln2_b'],
                  pack['w1'], pack['b1'], pack['w2'], pack['b2'],
                  params['lnf_g'], params['lnf_b'], params['text_projection'], img]

    in_specs = [
        pl.BlockSpec((T_TILE, D), lambda i: (i, 0)),                  # this tile's tokens
        pl.BlockSpec((1, N_CLS_TILE, T_TILE), lambda i: (i, 0, 0)),   # this tile's EOT one-hot
    ] + [_const_spec(a) for a in weight_ops] + [
        pl.BlockSpec(memory_space=pltpu.MemorySpace.SMEM),            # exp(logit_scale)
    ]

    out3 = pl.pallas_call(
        coop_fused_kernel,
        out_shape=jax.ShapeDtypeStruct((N_TILES, BATCH, N_CLS_TILE), jnp.float32),
        grid=(N_TILES,),
        in_specs=in_specs,
        out_specs=pl.BlockSpec((1, BATCH, N_CLS_TILE), lambda i: (i, 0, 0)),
        compiler_params=pltpu.CompilerParams(
            dimension_semantics=("parallel",),       # class tiles -> both TCs on v7x
        ),
    )(x0, onehot3, *weight_ops, scale)

    # (N_TILES, BATCH, N_CLS_TILE) -> (BATCH, N_CLS); tiles hold consecutive classes.
    return out3.transpose(1, 0, 2).reshape(BATCH, N_CLS)


# ----------------------------- pure-JAX reference (module semantics, f32) ------
def _ref_block(x, p):
    (ln1_g, ln1_b, wqkv, bqkv, wo, bo, ln2_g, ln2_b, w1, b1, w2, b2) = p
    hp = lax.Precision.HIGHEST
    h = _layer_norm(x, ln1_g, ln1_b)
    qkv = jnp.dot(h, wqkv, precision=hp) + bqkv
    row = lax.broadcasted_iota(jnp.int32, (SEQ, SEQ), 0)
    col = lax.broadcasted_iota(jnp.int32, (SEQ, SEQ), 1)
    scale = 1.0 / math.sqrt(DH)
    attn = jnp.zeros((SEQ, D), jnp.float32)
    for hd in range(HEADS):
        q = qkv[:, hd * DH:(hd + 1) * DH]
        k = qkv[:, D + hd * DH:D + (hd + 1) * DH]
        v = qkv[:, 2 * D + hd * DH:2 * D + (hd + 1) * DH]
        s = jnp.dot(q, k.T, precision=hp) * scale
        s = jnp.where(col <= row, s, jnp.float32(NEG_INF))
        s = s - jnp.max(s, axis=-1, keepdims=True)
        pr = jnp.exp(s)
        pr = pr / jnp.sum(pr, axis=-1, keepdims=True)
        o = jnp.dot(pr, v, precision=hp)
        attn = attn + jnp.dot(o, wo[hd * DH:(hd + 1) * DH, :], precision=hp)
    x = x + attn + bo
    h2 = _layer_norm(x, ln2_g, ln2_b)
    m = jnp.dot(h2, w1, precision=hp) + b1
    m = m * (1.0 / (1.0 + jnp.exp(-1.702 * m)))
    m = jnp.dot(m, w2, precision=hp) + b2
    return x + m


def ref_forward(image_features, params):
    hp = lax.Precision.HIGHEST
    prompts = build_prompts(params['ctx'], params['token_prefix'],
                            params['token_suffix'], NAME_LENS, N_CTX)
    x = prompts + params['pos_emb'][None]
    for p in params['layers']:
        x = jax.vmap(lambda s, _p=p: _ref_block(s, _p))(x)
    eot = jnp.argmax(params['tokenized_prompts'], axis=-1)
    ex = x[jnp.arange(N_CLS), eot]
    tf = jnp.dot(_layer_norm(ex, params['lnf_g'], params['lnf_b']),
                 params['text_projection'], precision=hp)
    tf = tf / jnp.sqrt(jnp.sum(tf * tf, axis=-1, keepdims=True))
    img = image_features
    img = img / jnp.sqrt(jnp.sum(img * img, axis=-1, keepdims=True))
    img = img.astype(jnp.float16).astype(jnp.float32)
    return jnp.dot(jnp.exp(params['logit_scale']) * img, tf.T, precision=hp)


# ----------------------------- deterministic init -------------------------------
def init_params(key):
    keys = iter(jax.random.split(key, 32))

    def nrm(shape, std=0.02):
        return (std * jax.random.normal(next(keys), shape)).astype(jnp.float32)

    params = {
        'ctx':          nrm((N_CTX, D)),
        'token_prefix': nrm((N_CLS, 1, D)),
        'token_suffix': nrm((N_CLS, SEQ - 1 - N_CTX, D)),
        'pos_emb':      nrm((SEQ, D), 0.01),
        'lnf_g':        jnp.ones((1, D), jnp.float32),
        'lnf_b':        jnp.zeros((1, D), jnp.float32),
        'text_projection': nrm((D, PROJ), 1.0 / math.sqrt(D)),
        'logit_scale':  jnp.full((1, 1), math.log(1.0 / 0.07), jnp.float32),
    }
    layers = []
    for _ in range(LAYERS):
        layers.append((
            jnp.ones((1, D), jnp.float32), jnp.zeros((1, D), jnp.float32),   # ln1
            nrm((D, 3 * D)), jnp.zeros((1, 3 * D), jnp.float32),             # qkv
            nrm((D, D)),     jnp.zeros((1, D), jnp.float32),                 # out proj
            jnp.ones((1, D), jnp.float32), jnp.zeros((1, D), jnp.float32),   # ln2
            nrm((D, MLP)),   jnp.zeros((1, MLP), jnp.float32),               # mlp fc
            nrm((MLP, D)),   jnp.zeros((1, D), jnp.float32),                 # mlp proj
        ))
    params['layers'] = layers

    # synthetic tokenized prompts: [SOT, ctx..., name..., '.', EOT, pad...]
    tok = np.zeros((N_CLS, SEQ), np.int32)
    for i, L in enumerate(NAME_LENS):
        tok[i, 0] = 49406                                  # SOT
        n_body = N_CTX + L + 1                             # ctx + name + '.'
        tok[i, 1:1 + n_body] = np.arange(1, n_body + 1) + 100 * i
        tok[i, 1 + n_body] = 49407                         # EOT (argmax target)
    params['tokenized_prompts'] = jnp.asarray(tok)
    return params


if __name__ == "__main__":
    key = jax.random.PRNGKey(0)
    k_param, k_img = jax.random.split(key)
    params = init_params(k_param)
    pack = pack_kernel_params(params)
    image_features = jax.random.normal(k_img, (BATCH, PROJ), jnp.float32)

    fwd = jax.jit(coop_forward)
    logits = jax.block_until_ready(fwd(image_features, params, pack))

    ref = jax.block_until_ready(ref_forward(image_features, params))
    # Tolerance covers bf16 MXU inputs + approx EUP reciprocals vs. the f32 HIGHEST
    # reference, amplified by logit_scale=exp(log(1/0.07))~14.3.
    np.testing.assert_allclose(np.asarray(logits), np.asarray(ref),
                               rtol=1e-1, atol=1e-1)
    print("KERNEL_OK")
</pallas_src>

<mosaic_0001>
module attributes {stable_mosaic.version = 11 : i64} {
  func.func @coop_fused_kernel(%arg0: i32, %arg1: memref<32x64xf32, #tpu.memory_space<vmem>>, %arg2: memref<1x2x32xf32, #tpu.memory_space<vmem>>, %arg3: memref<2x1x64xf32, #tpu.memory_space<vmem>>, %arg4: memref<2x1x64xf32, #tpu.memory_space<vmem>>, %arg5: memref<2x64x192xbf16, #tpu.memory_space<vmem>>, %arg6: memref<2x1x192xf32, #tpu.memory_space<vmem>>, %arg7: memref<2x64x64xbf16, #tpu.memory_space<vmem>>, %arg8: memref<2x1x64xf32, #tpu.memory_space<vmem>>, %arg9: memref<2x1x64xf32, #tpu.memory_space<vmem>>, %arg10: memref<2x1x64xf32, #tpu.memory_space<vmem>>, %arg11: memref<2x64x256xbf16, #tpu.memory_space<vmem>>, %arg12: memref<2x1x256xf32, #tpu.memory_space<vmem>>, %arg13: memref<2x256x64xbf16, #tpu.memory_space<vmem>>, %arg14: memref<2x1x64xf32, #tpu.memory_space<vmem>>, %arg15: memref<1x64xf32, #tpu.memory_space<vmem>>, %arg16: memref<1x64xf32, #tpu.memory_space<vmem>>, %arg17: memref<64x32xf32, #tpu.memory_space<vmem>>, %arg18: memref<2x32xf32, #tpu.memory_space<vmem>>, %arg19: memref<1x1xf32, #tpu.memory_space<smem>>, %arg20: memref<1x2x2xf32, #tpu.memory_space<vmem>>) attributes {dimension_semantics = [#tpu.dimension_semantics<parallel>], iteration_bounds = array<i64: 2>, scalar_prefetch = 0 : i64, scratch_operands = 0 : i64, tpu.core_type = #tpu.core_type<tc>, window_params = [{transform_indices = @transform_0, window_bounds = array<i64: 32, 64>}, {transform_indices = @transform_1, window_bounds = array<i64: 1, 2, 32>}, {pipeline_mode = #tpu.pipeline_mode<synchronous>, transform_indices = @transform_2, window_bounds = array<i64: 2, 1, 64>}, {pipeline_mode = #tpu.pipeline_mode<synchronous>, transform_indices = @transform_3, window_bounds = array<i64: 2, 1, 64>}, {pipeline_mode = #tpu.pipeline_mode<synchronous>, transform_indices = @transform_4, window_bounds = array<i64: 2, 64, 192>}, {pipeline_mode = #tpu.pipeline_mode<synchronous>, transform_indices = @transform_5, window_bounds = array<i64: 2, 1, 192>}, {pipeline_mode = #tpu.pipeline_mode<synchronous>, transform_indices = @transform_6, window_bounds = array<i64: 2, 64, 64>}, {pipeline_mode = #tpu.pipeline_mode<synchronous>, transform_indices = @transform_7, window_bounds = array<i64: 2, 1, 64>}, {pipeline_mode = #tpu.pipeline_mode<synchronous>, transform_indices = @transform_8, window_bounds = array<i64: 2, 1, 64>}, {pipeline_mode = #tpu.pipeline_mode<synchronous>, transform_indices = @transform_9, window_bounds = array<i64: 2, 1, 64>}, {pipeline_mode = #tpu.pipeline_mode<synchronous>, transform_indices = @transform_10, window_bounds = array<i64: 2, 64, 256>}, {pipeline_mode = #tpu.pipeline_mode<synchronous>, transform_indices = @transform_11, window_bounds = array<i64: 2, 1, 256>}, {pipeline_mode = #tpu.pipeline_mode<synchronous>, transform_indices = @transform_12, window_bounds = array<i64: 2, 256, 64>}, {pipeline_mode = #tpu.pipeline_mode<synchronous>, transform_indices = @transform_13, window_bounds = array<i64: 2, 1, 64>}, {pipeline_mode = #tpu.pipeline_mode<synchronous>, transform_indices = @transform_14, window_bounds = array<i64: 1, 64>}, {pipeline_mode = #tpu.pipeline_mode<synchronous>, transform_indices = @transform_15, window_bounds = array<i64: 1, 64>}, {pipeline_mode = #tpu.pipeline_mode<synchronous>, transform_indices = @transform_16, window_bounds = array<i64: 64, 32>}, {pipeline_mode = #tpu.pipeline_mode<synchronous>, transform_indices = @transform_17, window_bounds = array<i64: 2, 32>}, {transform_indices = @transform_18, window_bounds = array<i64: 1, 1>}, {transform_indices = @transform_19, window_bounds = array<i64: 1, 2, 2>}]} {
    %c0 = arith.constant 0 : index
    %c0_0 = arith.constant 0 : index
    %0 = vector.load %arg1[%c0, %c0_0] : memref<32x64xf32, #tpu.memory_space<vmem>>, vector<32x64xf32>
    %1 = tpu.iota {dimensions = array<i32: 0>} : vector<32x32xi32>
    %2 = tpu.iota {dimensions = array<i32: 1>} : vector<32x32xi32>
    %c-16_i32 = arith.constant -16 : i32
    %3 = vector.broadcast %c-16_i32 : i32 to vector<32x32xi32>
    %4 = arith.andi %1, %3 : vector<32x32xi32>
    %c-16_i32_1 = arith.constant -16 : i32
    %5 = vector.broadcast %c-16_i32_1 : i32 to vector<32x32xi32>
    %6 = arith.andi %2, %5 : vector<32x32xi32>
    %7 = arith.cmpi eq, %4, %6 : vector<32x32xi32>
    %8 = arith.cmpi sle, %2, %1 : vector<32x32xi32>
    %9 = arith.andi %7, %8 : vector<32x32xi1>
    %cst = arith.constant 0.000000e+00 : f32
    %cst_2 = arith.constant -1.000000e+30 : f32
    %10 = vector.broadcast %cst : f32 to vector<32x32xf32>
    %11 = vector.broadcast %cst_2 : f32 to vector<32x32xf32>
    %12 = arith.select %9, %10, %11 : vector<32x32xi1>, vector<32x32xf32>
    %c0_3 = arith.constant 0 : index
    %c0_4 = arith.constant 0 : index
    %c0_5 = arith.constant 0 : index
    %13 = vector.load %arg3[%c0_3, %c0_4, %c0_5] : memref<2x1x64xf32, #tpu.memory_space<vmem>>, vector<1x1x64xf32>
    %14 = vector.shape_cast %13 : vector<1x1x64xf32> to vector<1x64xf32>
    %c0_6 = arith.constant 0 : index
    %c0_7 = arith.constant 0 : index
    %c0_8 = arith.constant 0 : index
    %15 = vector.load %arg4[%c0_6, %c0_7, %c0_8] : memref<2x1x64xf32, #tpu.memory_space<vmem>>, vector<1x1x64xf32>
    %16 = vector.shape_cast %15 : vector<1x1x64xf32> to vector<1x64xf32>
    %cst_9 = arith.constant dense<0.000000e+00> : vector<32xf32>
    %17 = vector.multi_reduction <add>, %0, %cst_9 [1] : vector<32x64xf32> to vector<32xf32>
    %18 = vector.shape_cast %17 : vector<32xf32> to vector<32x1xf32>
    %cst_10 = arith.constant 6.400000e+01 : f32
    %19 = vector.broadcast %cst_10 : f32 to vector<32x1xf32>
    %20 = arith.divf %18, %19 : vector<32x1xf32>
    %21 = vector.broadcast %20 : vector<32x1xf32> to vector<32x64xf32>
    %22 = arith.subf %0, %21 : vector<32x64xf32>
    %23 = arith.mulf %22, %22 : vector<32x64xf32>
    %cst_11 = arith.constant dense<0.000000e+00> : vector<32xf32>
    %24 = vector.multi_reduction <add>, %23, %cst_11 [1] : vector<32x64xf32> to vector<32xf32>
    %25 = vector.shape_cast %24 : vector<32xf32> to vector<32x1xf32>
    %cst_12 = arith.constant 6.400000e+01 : f32
    %26 = vector.broadcast %cst_12 : f32 to vector<32x1xf32>
    %27 = arith.divf %25, %26 : vector<32x1xf32>
    %28 = vector.broadcast %20 : vector<32x1xf32> to vector<32x64xf32>
    %29 = arith.subf %0, %28 : vector<32x64xf32>
    %cst_13 = arith.constant 9.99999974E-6 : f32
    %30 = vector.broadcast %cst_13 : f32 to vector<32x1xf32>
    %31 = arith.addf %27, %30 : vector<32x1xf32>
    %32 = math.rsqrt %31 : vector<32x1xf32>
    %33 = vector.broadcast %32 : vector<32x1xf32> to vector<32x64xf32>
    %34 = arith.mulf %29, %33 : vector<32x64xf32>
    %35 = vector.broadcast %14 : vector<1x64xf32> to vector<32x64xf32>
    %36 = arith.mulf %34, %35 : vector<32x64xf32>
    %37 = vector.broadcast %16 : vector<1x64xf32> to vector<32x64xf32>
    %38 = arith.addf %36, %37 : vector<32x64xf32>
    %39 = arith.truncf %38 : vector<32x64xf32> to vector<32x64xbf16>
    %c0_14 = arith.constant 0 : index
    %c0_15 = arith.constant 0 : index
    %c0_16 = arith.constant 0 : index
    %40 = vector.load %arg5[%c0_14, %c0_15, %c0_16] : memref<2x64x192xbf16, #tpu.memory_space<vmem>>, vector<1x64x192xbf16>
    %41 = vector.shape_cast %40 : vector<1x64x192xbf16> to vector<64x192xbf16>
    %cst_17 = arith.constant dense<0.000000e+00> : vector<32x192xf32>
    %42 = tpu.matmul %39, %41, %cst_17 {dimension_numbers = #tpu.dot_dimension_numbers<[1], [0], [0], [1], [0, 0, 1, 1], [], []>} : vector<32x64xbf16>, vector<64x192xbf16>, vector<32x192xf32> -> vector<32x192xf32>
    %c0_18 = arith.constant 0 : index
    %c0_19 = arith.constant 0 : index
    %c0_20 = arith.constant 0 : index
    %43 = vector.load %arg6[%c0_18, %c0_19, %c0_20] : memref<2x1x192xf32, #tpu.memory_space<vmem>>, vector<1x1x192xf32>
    %44 = vector.shape_cast %43 : vector<1x1x192xf32> to vector<1x192xf32>
    %45 = vector.broadcast %44 : vector<1x192xf32> to vector<32x192xf32>
    %46 = arith.addf %42, %45 : vector<32x192xf32>
    %47 = vector.extract_strided_slice %46 {offsets = [0, 0], sizes = [32, 16], strides = [1, 1]} : vector<32x192xf32> to vector<32x16xf32>
    %48 = vector.extract_strided_slice %46 {offsets = [0, 64], sizes = [32, 16], strides = [1, 1]} : vector<32x192xf32> to vector<32x16xf32>
    %49 = vector.extract_strided_slice %46 {offsets = [0, 128], sizes = [32, 16], strides = [1, 1]} : vector<32x192xf32> to vector<32x16xf32>
    %50 = arith.truncf %47 : vector<32x16xf32> to vector<32x16xbf16>
    %51 = arith.truncf %48 : vector<32x16xf32> to vector<32x16xbf16>
    %cst_21 = arith.constant dense<0.000000e+00> : vector<32x32xf32>
    %52 = tpu.matmul %50, %51, %cst_21 {dimension_numbers = #tpu.dot_dimension_numbers<[1], [1], [0], [0], [0, 0, 1, 0], [], []>} : vector<32x16xbf16>, vector<32x16xbf16>, vector<32x32xf32> -> vector<32x32xf32>
    %cst_22 = arith.constant 2.500000e-01 : f32
    %53 = vector.broadcast %cst_22 : f32 to vector<32x32xf32>
    %54 = arith.mulf %52, %53 : vector<32x32xf32>
    %55 = arith.addf %54, %12 : vector<32x32xf32>
    %cst_23 = arith.constant dense<0xFF800000> : vector<32xf32>
    %56 = vector.multi_reduction <maximumf>, %55, %cst_23 [1] : vector<32x32xf32> to vector<32xf32>
    %57 = vector.shape_cast %56 : vector<32xf32> to vector<32x1xf32>
    %58 = vector.broadcast %57 : vector<32x1xf32> to vector<32x32xf32>
    %59 = arith.subf %55, %58 : vector<32x32xf32>
    %60 = math.exp %59 : vector<32x32xf32>
    %cst_24 = arith.constant dense<0.000000e+00> : vector<32xf32>
    %61 = vector.multi_reduction <add>, %60, %cst_24 [1] : vector<32x32xf32> to vector<32xf32>
    %62 = vector.shape_cast %61 : vector<32xf32> to vector<32x1xf32>
    %63 = tpu.reciprocal %62 {approx = true} : vector<32x1xf32> -> vector<32x1xf32>
    %64 = vector.broadcast %63 : vector<32x1xf32> to vector<32x32xf32>
    %65 = arith.mulf %60, %64 : vector<32x32xf32>
    %66 = arith.truncf %65 : vector<32x32xf32> to vector<32x32xbf16>
    %67 = arith.truncf %49 : vector<32x16xf32> to vector<32x16xbf16>
    %cst_25 = arith.constant dense<0.000000e+00> : vector<32x16xf32>
    %68 = tpu.matmul %66, %67, %cst_25 {dimension_numbers = #tpu.dot_dimension_numbers<[1], [0], [0], [1], [0, 0, 1, 1], [], []>} : vector<32x32xbf16>, vector<32x16xbf16>, vector<32x16xf32> -> vector<32x16xf32>
    %69 = vector.extract_strided_slice %46 {offsets = [0, 16], sizes = [32, 16], strides = [1, 1]} : vector<32x192xf32> to vector<32x16xf32>
    %70 = vector.extract_strided_slice %46 {offsets = [0, 80], sizes = [32, 16], strides = [1, 1]} : vector<32x192xf32> to vector<32x16xf32>
    %71 = vector.extract_strided_slice %46 {offsets = [0, 144], sizes = [32, 16], strides = [1, 1]} : vector<32x192xf32> to vector<32x16xf32>
    %72 = arith.truncf %69 : vector<32x16xf32> to vector<32x16xbf16>
    %73 = arith.truncf %70 : vector<32x16xf32> to vector<32x16xbf16>
    %cst_26 = arith.constant dense<0.000000e+00> : vector<32x32xf32>
    %74 = tpu.matmul %72, %73, %cst_26 {dimension_numbers = #tpu.dot_dimension_numbers<[1], [1], [0], [0], [0, 0, 1, 0], [], []>} : vector<32x16xbf16>, vector<32x16xbf16>, vector<32x32xf32> -> vector<32x32xf32>
    %cst_27 = arith.constant 2.500000e-01 : f32
    %75 = vector.broadcast %cst_27 : f32 to vector<32x32xf32>
    %76 = arith.mulf %74, %75 : vector<32x32xf32>
    %77 = arith.addf %76, %12 : vector<32x32xf32>
    %cst_28 = arith.constant dense<0xFF800000> : vector<32xf32>
    %78 = vector.multi_reduction <maximumf>, %77, %cst_28 [1] : vector<32x32xf32> to vector<32xf32>
    %79 = vector.shape_cast %78 : vector<32xf32> to vector<32x1xf32>
    %80 = vector.broadcast %79 : vector<32x1xf32> to vector<32x32xf32>
    %81 = arith.subf %77, %80 : vector<32x32xf32>
    %82 = math.exp %81 : vector<32x32xf32>
    %cst_29 = arith.constant dense<0.000000e+00> : vector<32xf32>
    %83 = vector.multi_reduction <add>, %82, %cst_29 [1] : vector<32x32xf32> to vector<32xf32>
    %84 = vector.shape_cast %83 : vector<32xf32> to vector<32x1xf32>
    %85 = tpu.reciprocal %84 {approx = true} : vector<32x1xf32> -> vector<32x1xf32>
    %86 = vector.broadcast %85 : vector<32x1xf32> to vector<32x32xf32>
    %87 = arith.mulf %82, %86 : vector<32x32xf32>
    %88 = arith.truncf %87 : vector<32x32xf32> to vector<32x32xbf16>
    %89 = arith.truncf %71 : vector<32x16xf32> to vector<32x16xbf16>
    %cst_30 = arith.constant dense<0.000000e+00> : vector<32x16xf32>
    %90 = tpu.matmul %88, %89, %cst_30 {dimension_numbers = #tpu.dot_dimension_numbers<[1], [0], [0], [1], [0, 0, 1, 1], [], []>} : vector<32x32xbf16>, vector<32x16xbf16>, vector<32x16xf32> -> vector<32x16xf32>
    %91 = vector.extract_strided_slice %46 {offsets = [0, 32], sizes = [32, 16], strides = [1, 1]} : vector<32x192xf32> to vector<32x16xf32>
    %92 = vector.extract_strided_slice %46 {offsets = [0, 96], sizes = [32, 16], strides = [1, 1]} : vector<32x192xf32> to vector<32x16xf32>
    %93 = vector.extract_strided_slice %46 {offsets = [0, 160], sizes = [32, 16], strides = [1, 1]} : vector<32x192xf32> to vector<32x16xf32>
    %94 = arith.truncf %91 : vector<32x16xf32> to vector<32x16xbf16>
    %95 = arith.truncf %92 : vector<32x16xf32> to vector<32x16xbf16>
    %cst_31 = arith.constant dense<0.000000e+00> : vector<32x32xf32>
    %96 = tpu.matmul %94, %95, %cst_31 {dimension_numbers = #tpu.dot_dimension_numbers<[1], [1], [0], [0], [0, 0, 1, 0], [], []>} : vector<32x16xbf16>, vector<32x16xbf16>, vector<32x32xf32> -> vector<32x32xf32>
    %cst_32 = arith.constant 2.500000e-01 : f32
    %97 = vector.broadcast %cst_32 : f32 to vector<32x32xf32>
    %98 = arith.mulf %96, %97 : vector<32x32xf32>
    %99 = arith.addf %98, %12 : vector<32x32xf32>
    %cst_33 = arith.constant dense<0xFF800000> : vector<32xf32>
    %100 = vector.multi_reduction <maximumf>, %99, %cst_33 [1] : vector<32x32xf32> to vector<32xf32>
    %101 = vector.shape_cast %100 : vector<32xf32> to vector<32x1xf32>
    %102 = vector.broadcast %101 : vector<32x1xf32> to vector<32x32xf32>
    %103 = arith.subf %99, %102 : vector<32x32xf32>
    %104 = math.exp %103 : vector<32x32xf32>
    %cst_34 = arith.constant dense<0.000000e+00> : vector<32xf32>
    %105 = vector.multi_reduction <add>, %104, %cst_34 [1] : vector<32x32xf32> to vector<32xf32>
    %106 = vector.shape_cast %105 : vector<32xf32> to vector<32x1xf32>
    %107 = tpu.reciprocal %106 {approx = true} : vector<32x1xf32> -> vector<32x1xf32>
    %108 = vector.broadcast %107 : vector<32x1xf32> to vector<32x32xf32>
    %109 = arith.mulf %104, %108 : vector<32x32xf32>
    %110 = arith.truncf %109 : vector<32x32xf32> to vector<32x32xbf16>
    %111 = arith.truncf %93 : vector<32x16xf32> to vector<32x16xbf16>
    %cst_35 = arith.constant dense<0.000000e+00> : vector<32x16xf32>
    %112 = tpu.matmul %110, %111, %cst_35 {dimension_numbers = #tpu.dot_dimension_numbers<[1], [0], [0], [1], [0, 0, 1, 1], [], []>} : vector<32x32xbf16>, vector<32x16xbf16>, vector<32x16xf32> -> vector<32x16xf32>
    %113 = vector.extract_strided_slice %46 {offsets = [0, 48], sizes = [32, 16], strides = [1, 1]} : vector<32x192xf32> to vector<32x16xf32>
    %114 = vector.extract_strided_slice %46 {offsets = [0, 112], sizes = [32, 16], strides = [1, 1]} : vector<32x192xf32> to vector<32x16xf32>
    %115 = vector.extract_strided_slice %46 {offsets = [0, 176], sizes = [32, 16], strides = [1, 1]} : vector<32x192xf32> to vector<32x16xf32>
    %116 = arith.truncf %113 : vector<32x16xf32> to vector<32x16xbf16>
    %117 = arith.truncf %114 : vector<32x16xf32> to vector<32x16xbf16>
    %cst_36 = arith.constant dense<0.000000e+00> : vector<32x32xf32>
    %118 = tpu.matmul %116, %117, %cst_36 {dimension_numbers = #tpu.dot_dimension_numbers<[1], [1], [0], [0], [0, 0, 1, 0], [], []>} : vector<32x16xbf16>, vector<32x16xbf16>, vector<32x32xf32> -> vector<32x32xf32>
    %cst_37 = arith.constant 2.500000e-01 : f32
    %119 = vector.broadcast %cst_37 : f32 to vector<32x32xf32>
    %120 = arith.mulf %118, %119 : vector<32x32xf32>
    %121 = arith.addf %120, %12 : vector<32x32xf32>
    %cst_38 = arith.constant dense<0xFF800000> : vector<32xf32>
    %122 = vector.multi_reduction <maximumf>, %121, %cst_38 [1] : vector<32x32xf32> to vector<32xf32>
    %123 = vector.shape_cast %122 : vector<32xf32> to vector<32x1xf32>
    %124 = vector.broadcast %123 : vector<32x1xf32> to vector<32x32xf32>
    %125 = arith.subf %121, %124 : vector<32x32xf32>
    %126 = math.exp %125 : vector<32x32xf32>
    %cst_39 = arith.constant dense<0.000000e+00> : vector<32xf32>
    %127 = vector.multi_reduction <add>, %126, %cst_39 [1] : vector<32x32xf32> to vector<32xf32>
    %128 = vector.shape_cast %127 : vector<32xf32> to vector<32x1xf32>
    %129 = tpu.reciprocal %128 {approx = true} : vector<32x1xf32> -> vector<32x1xf32>
    %130 = vector.broadcast %129 : vector<32x1xf32> to vector<32x32xf32>
    %131 = arith.mulf %126, %130 : vector<32x32xf32>
    %132 = arith.truncf %131 : vector<32x32xf32> to vector<32x32xbf16>
    %133 = arith.truncf %115 : vector<32x16xf32> to vector<32x16xbf16>
    %cst_40 = arith.constant dense<0.000000e+00> : vector<32x16xf32>
    %134 = tpu.matmul %132, %133, %cst_40 {dimension_numbers = #tpu.dot_dimension_numbers<[1], [0], [0], [1], [0, 0, 1, 1], [], []>} : vector<32x32xbf16>, vector<32x16xbf16>, vector<32x16xf32> -> vector<32x16xf32>
    %135 = tpu.concatenate %68, %90, %112, %134 in 1 : vector<32x16xf32>, vector<32x16xf32>, vector<32x16xf32>, vector<32x16xf32> -> vector<32x64xf32>
    %136 = arith.truncf %135 : vector<32x64xf32> to vector<32x64xbf16>
    %c0_41 = arith.constant 0 : index
    %c0_42 = arith.constant 0 : index
    %c0_43 = arith.constant 0 : index
    %137 = vector.load %arg7[%c0_41, %c0_42, %c0_43] : memref<2x64x64xbf16, #tpu.memory_space<vmem>>, vector<1x64x64xbf16>
    %138 = vector.shape_cast %137 : vector<1x64x64xbf16> to vector<64x64xbf16>
    %cst_44 = arith.constant dense<0.000000e+00> : vector<32x64xf32>
    %139 = tpu.matmul %136, %138, %cst_44 {dimension_numbers = #tpu.dot_dimension_numbers<[1], [0], [0], [1], [0, 0, 1, 1], [], []>} : vector<32x64xbf16>, vector<64x64xbf16>, vector<32x64xf32> -> vector<32x64xf32>
    %140 = arith.addf %0, %139 : vector<32x64xf32>
    %c0_45 = arith.constant 0 : index
    %c0_46 = arith.constant 0 : index
    %c0_47 = arith.constant 0 : index
    %141 = vector.load %arg8[%c0_45, %c0_46, %c0_47] : memref<2x1x64xf32, #tpu.memory_space<vmem>>, vector<1x1x64xf32>
    %142 = vector.shape_cast %141 : vector<1x1x64xf32> to vector<1x64xf32>
    %143 = vector.broadcast %142 : vector<1x64xf32> to vector<32x64xf32>
    %144 = arith.addf %140, %143 : vector<32x64xf32>
    %c0_48 = arith.constant 0 : index
    %c0_49 = arith.constant 0 : index
    %c0_50 = arith.constant 0 : index
    %145 = vector.load %arg9[%c0_48, %c0_49, %c0_50] : memref<2x1x64xf32, #tpu.memory_space<vmem>>, vector<1x1x64xf32>
    %146 = vector.shape_cast %145 : vector<1x1x64xf32> to vector<1x64xf32>
    %c0_51 = arith.constant 0 : index
    %c0_52 = arith.constant 0 : index
    %c0_53 = arith.constant 0 : index
    %147 = vector.load %arg10[%c0_51, %c0_52, %c0_53] : memref<2x1x64xf32, #tpu.memory_space<vmem>>, vector<1x1x64xf32>
    %148 = vector.shape_cast %147 : vector<1x1x64xf32> to vector<1x64xf32>
    %cst_54 = arith.constant dense<0.000000e+00> : vector<32xf32>
    %149 = vector.multi_reduction <add>, %144, %cst_54 [1] : vector<32x64xf32> to vector<32xf32>
    %150 = vector.shape_cast %149 : vector<32xf32> to vector<32x1xf32>
    %cst_55 = arith.constant 6.400000e+01 : f32
    %151 = vector.broadcast %cst_55 : f32 to vector<32x1xf32>
    %152 = arith.divf %150, %151 : vector<32x1xf32>
    %153 = vector.broadcast %152 : vector<32x1xf32> to vector<32x64xf32>
    %154 = arith.subf %144, %153 : vector<32x64xf32>
    %155 = arith.mulf %154, %154 : vector<32x64xf32>
    %cst_56 = arith.constant dense<0.000000e+00> : vector<32xf32>
    %156 = vector.multi_reduction <add>, %155, %cst_56 [1] : vector<32x64xf32> to vector<32xf32>
    %157 = vector.shape_cast %156 : vector<32xf32> to vector<32x1xf32>
    %cst_57 = arith.constant 6.400000e+01 : f32
    %158 = vector.broadcast %cst_57 : f32 to vector<32x1xf32>
    %159 = arith.divf %157, %158 : vector<32x1xf32>
    %160 = vector.broadcast %152 : vector<32x1xf32> to vector<32x64xf32>
    %161 = arith.subf %144, %160 : vector<32x64xf32>
    %cst_58 = arith.constant 9.99999974E-6 : f32
    %162 = vector.broadcast %cst_58 : f32 to vector<32x1xf32>
    %163 = arith.addf %159, %162 : vector<32x1xf32>
    %164 = math.rsqrt %163 : vector<32x1xf32>
    %165 = vector.broadcast %164 : vector<32x1xf32> to vector<32x64xf32>
    %166 = arith.mulf %161, %165 : vector<32x64xf32>
    %167 = vector.broadcast %146 : vector<1x64xf32> to vector<32x64xf32>
    %168 = arith.mulf %166, %167 : vector<32x64xf32>
    %169 = vector.broadcast %148 : vector<1x64xf32> to vector<32x64xf32>
    %170 = arith.addf %168, %169 : vector<32x64xf32>
    %171 = arith.truncf %170 : vector<32x64xf32> to vector<32x64xbf16>
    %c0_59 = arith.constant 0 : index
    %c0_60 = arith.constant 0 : index
    %c0_61 = arith.constant 0 : index
    %172 = vector.load %arg11[%c0_59, %c0_60, %c0_61] : memref<2x64x256xbf16, #tpu.memory_space<vmem>>, vector<1x64x256xbf16>
    %173 = vector.shape_cast %172 : vector<1x64x256xbf16> to vector<64x256xbf16>
    %cst_62 = arith.constant dense<0.000000e+00> : vector<32x256xf32>
    %174 = tpu.matmul %171, %173, %cst_62 {dimension_numbers = #tpu.dot_dimension_numbers<[1], [0], [0], [1], [0, 0, 1, 1], [], []>} : vector<32x64xbf16>, vector<64x256xbf16>, vector<32x256xf32> -> vector<32x256xf32>
    %c0_63 = arith.constant 0 : index
    %c0_64 = arith.constant 0 : index
    %c0_65 = arith.constant 0 : index
    %175 = vector.load %arg12[%c0_63, %c0_64, %c0_65] : memref<2x1x256xf32, #tpu.memory_space<vmem>>, vector<1x1x256xf32>
    %176 = vector.shape_cast %175 : vector<1x1x256xf32> to vector<1x256xf32>
    %177 = vector.broadcast %176 : vector<1x256xf32> to vector<32x256xf32>
    %178 = arith.addf %174, %177 : vector<32x256xf32>
    %cst_66 = arith.constant -1.702000e+00 : f32
    %179 = vector.broadcast %cst_66 : f32 to vector<32x256xf32>
    %180 = arith.mulf %179, %178 : vector<32x256xf32>
    %181 = math.exp %180 : vector<32x256xf32>
    %cst_67 = arith.constant 1.000000e+00 : f32
    %182 = vector.broadcast %cst_67 : f32 to vector<32x256xf32>
    %183 = arith.addf %182, %181 : vector<32x256xf32>
    %184 = tpu.reciprocal %183 {approx = true} : vector<32x256xf32> -> vector<32x256xf32>
    %185 = arith.mulf %178, %184 : vector<32x256xf32>
    %186 = arith.truncf %185 : vector<32x256xf32> to vector<32x256xbf16>
    %c0_68 = arith.constant 0 : index
    %c0_69 = arith.constant 0 : index
    %c0_70 = arith.constant 0 : index
    %187 = vector.load %arg13[%c0_68, %c0_69, %c0_70] : memref<2x256x64xbf16, #tpu.memory_space<vmem>>, vector<1x256x64xbf16>
    %188 = vector.shape_cast %187 : vector<1x256x64xbf16> to vector<256x64xbf16>
    %cst_71 = arith.constant dense<0.000000e+00> : vector<32x64xf32>
    %189 = tpu.matmul %186, %188, %cst_71 {dimension_numbers = #tpu.dot_dimension_numbers<[1], [0], [0], [1], [0, 0, 1, 1], [], []>} : vector<32x256xbf16>, vector<256x64xbf16>, vector<32x64xf32> -> vector<32x64xf32>
    %c0_72 = arith.constant 0 : index
    %c0_73 = arith.constant 0 : index
    %c0_74 = arith.constant 0 : index
    %190 = vector.load %arg14[%c0_72, %c0_73, %c0_74] : memref<2x1x64xf32, #tpu.memory_space<vmem>>, vector<1x1x64xf32>
    %191 = vector.shape_cast %190 : vector<1x1x64xf32> to vector<1x64xf32>
    %192 = vector.broadcast %191 : vector<1x64xf32> to vector<32x64xf32>
    %193 = arith.addf %189, %192 : vector<32x64xf32>
    %194 = arith.addf %144, %193 : vector<32x64xf32>
    %c1 = arith.constant 1 : index
    %c0_75 = arith.constant 0 : index
    %c0_76 = arith.constant 0 : index
    %195 = vector.load %arg3[%c1, %c0_75, %c0_76] : memref<2x1x64xf32, #tpu.memory_space<vmem>>, vector<1x1x64xf32>
    %196 = vector.shape_cast %195 : vector<1x1x64xf32> to vector<1x64xf32>
    %c1_77 = arith.constant 1 : index
    %c0_78 = arith.constant 0 : index
    %c0_79 = arith.constant 0 : index
    %197 = vector.load %arg4[%c1_77, %c0_78, %c0_79] : memref<2x1x64xf32, #tpu.memory_space<vmem>>, vector<1x1x64xf32>
    %198 = vector.shape_cast %197 : vector<1x1x64xf32> to vector<1x64xf32>
    %cst_80 = arith.constant dense<0.000000e+00> : vector<32xf32>
    %199 = vector.multi_reduction <add>, %194, %cst_80 [1] : vector<32x64xf32> to vector<32xf32>
    %200 = vector.shape_cast %199 : vector<32xf32> to vector<32x1xf32>
    %cst_81 = arith.constant 6.400000e+01 : f32
    %201 = vector.broadcast %cst_81 : f32 to vector<32x1xf32>
    %202 = arith.divf %200, %201 : vector<32x1xf32>
    %203 = vector.broadcast %202 : vector<32x1xf32> to vector<32x64xf32>
    %204 = arith.subf %194, %203 : vector<32x64xf32>
    %205 = arith.mulf %204, %204 : vector<32x64xf32>
    %cst_82 = arith.constant dense<0.000000e+00> : vector<32xf32>
    %206 = vector.multi_reduction <add>, %205, %cst_82 [1] : vector<32x64xf32> to vector<32xf32>
    %207 = vector.shape_cast %206 : vector<32xf32> to vector<32x1xf32>
    %cst_83 = arith.constant 6.400000e+01 : f32
    %208 = vector.broadcast %cst_83 : f32 to vector<32x1xf32>
    %209 = arith.divf %207, %208 : vector<32x1xf32>
    %210 = vector.broadcast %202 : vector<32x1xf32> to vector<32x64xf32>
    %211 = arith.subf %194, %210 : vector<32x64xf32>
    %cst_84 = arith.constant 9.99999974E-6 : f32
    %212 = vector.broadcast %cst_84 : f32 to vector<32x1xf32>
    %213 = arith.addf %209, %212 : vector<32x1xf32>
    %214 = math.rsqrt %213 : vector<32x1xf32>
    %215 = vector.broadcast %214 : vector<32x1xf32> to vector<32x64xf32>
    %216 = arith.mulf %211, %215 : vector<32x64xf32>
    %217 = vector.broadcast %196 : vector<1x64xf32> to vector<32x64xf32>
    %218 = arith.mulf %216, %217 : vector<32x64xf32>
    %219 = vector.broadcast %198 : vector<1x64xf32> to vector<32x64xf32>
    %220 = arith.addf %218, %219 : vector<32x64xf32>
    %221 = arith.truncf %220 : vector<32x64xf32> to vector<32x64xbf16>
    %c1_85 = arith.constant 1 : index
    %c0_86 = arith.constant 0 : index
    %c0_87 = arith.constant 0 : index
    %222 = vector.load %arg5[%c1_85, %c0_86, %c0_87] : memref<2x64x192xbf16, #tpu.memory_space<vmem>>, vector<1x64x192xbf16>
    %223 = vector.shape_cast %222 : vector<1x64x192xbf16> to vector<64x192xbf16>
    %cst_88 = arith.constant dense<0.000000e+00> : vector<32x192xf32>
    %224 = tpu.matmul %221, %223, %cst_88 {dimension_numbers = #tpu.dot_dimension_numbers<[1], [0], [0], [1], [0, 0, 1, 1], [], []>} : vector<32x64xbf16>, vector<64x192xbf16>, vector<32x192xf32> -> vector<32x192xf32>
    %c1_89 = arith.constant 1 : index
    %c0_90 = arith.constant 0 : index
    %c0_91 = arith.constant 0 : index
    %225 = vector.load %arg6[%c1_89, %c0_90, %c0_91] : memref<2x1x192xf32, #tpu.memory_space<vmem>>, vector<1x1x192xf32>
    %226 = vector.shape_cast %225 : vector<1x1x192xf32> to vector<1x192xf32>
    %227 = vector.broadcast %226 : vector<1x192xf32> to vector<32x192xf32>
    %228 = arith.addf %224, %227 : vector<32x192xf32>
    %229 = vector.extract_strided_slice %228 {offsets = [0, 0], sizes = [32, 16], strides = [1, 1]} : vector<32x192xf32> to vector<32x16xf32>
    %230 = vector.extract_strided_slice %228 {offsets = [0, 64], sizes = [32, 16], strides = [1, 1]} : vector<32x192xf32> to vector<32x16xf32>
    %231 = vector.extract_strided_slice %228 {offsets = [0, 128], sizes = [32, 16], strides = [1, 1]} : vector<32x192xf32> to vector<32x16xf32>
    %232 = arith.truncf %229 : vector<32x16xf32> to vector<32x16xbf16>
    %233 = arith.truncf %230 : vector<32x16xf32> to vector<32x16xbf16>
    %cst_92 = arith.constant dense<0.000000e+00> : vector<32x32xf32>
    %234 = tpu.matmul %232, %233, %cst_92 {dimension_numbers = #tpu.dot_dimension_numbers<[1], [1], [0], [0], [0, 0, 1, 0], [], []>} : vector<32x16xbf16>, vector<32x16xbf16>, vector<32x32xf32> -> vector<32x32xf32>
    %cst_93 = arith.constant 2.500000e-01 : f32
    %235 = vector.broadcast %cst_93 : f32 to vector<32x32xf32>
    %236 = arith.mulf %234, %235 : vector<32x32xf32>
    %237 = arith.addf %236, %12 : vector<32x32xf32>
    %cst_94 = arith.constant dense<0xFF800000> : vector<32xf32>
    %238 = vector.multi_reduction <maximumf>, %237, %cst_94 [1] : vector<32x32xf32> to vector<32xf32>
    %239 = vector.shape_cast %238 : vector<32xf32> to vector<32x1xf32>
    %240 = vector.broadcast %239 : vector<32x1xf32> to vector<32x32xf32>
    %241 = arith.subf %237, %240 : vector<32x32xf32>
    %242 = math.exp %241 : vector<32x32xf32>
    %cst_95 = arith.constant dense<0.000000e+00> : vector<32xf32>
    %243 = vector.multi_reduction <add>, %242, %cst_95 [1] : vector<32x32xf32> to vector<32xf32>
    %244 = vector.shape_cast %243 : vector<32xf32> to vector<32x1xf32>
    %245 = tpu.reciprocal %244 {approx = true} : vector<32x1xf32> -> vector<32x1xf32>
    %246 = vector.broadcast %245 : vector<32x1xf32> to vector<32x32xf32>
    %247 = arith.mulf %242, %246 : vector<32x32xf32>
    %248 = arith.truncf %247 : vector<32x32xf32> to vector<32x32xbf16>
    %249 = arith.truncf %231 : vector<32x16xf32> to vector<32x16xbf16>
    %cst_96 = arith.constant dense<0.000000e+00> : vector<32x16xf32>
    %250 = tpu.matmul %248, %249, %cst_96 {dimension_numbers = #tpu.dot_dimension_numbers<[1], [0], [0], [1], [0, 0, 1, 1], [], []>} : vector<32x32xbf16>, vector<32x16xbf16>, vector<32x16xf32> -> vector<32x16xf32>
    %251 = vector.extract_strided_slice %228 {offsets = [0, 16], sizes = [32, 16], strides = [1, 1]} : vector<32x192xf32> to vector<32x16xf32>
    %252 = vector.extract_strided_slice %228 {offsets = [0, 80], sizes = [32, 16], strides = [1, 1]} : vector<32x192xf32> to vector<32x16xf32>
    %253 = vector.extract_strided_slice %228 {offsets = [0, 144], sizes = [32, 16], strides = [1, 1]} : vector<32x192xf32> to vector<32x16xf32>
    %254 = arith.truncf %251 : vector<32x16xf32> to vector<32x16xbf16>
    %255 = arith.truncf %252 : vector<32x16xf32> to vector<32x16xbf16>
    %cst_97 = arith.constant dense<0.000000e+00> : vector<32x32xf32>
    %256 = tpu.matmul %254, %255, %cst_97 {dimension_numbers = #tpu.dot_dimension_numbers<[1], [1], [0], [0], [0, 0, 1, 0], [], []>} : vector<32x16xbf16>, vector<32x16xbf16>, vector<32x32xf32> -> vector<32x32xf32>
    %cst_98 = arith.constant 2.500000e-01 : f32
    %257 = vector.broadcast %cst_98 : f32 to vector<32x32xf32>
    %258 = arith.mulf %256, %257 : vector<32x32xf32>
    %259 = arith.addf %258, %12 : vector<32x32xf32>
    %cst_99 = arith.constant dense<0xFF800000> : vector<32xf32>
    %260 = vector.multi_reduction <maximumf>, %259, %cst_99 [1] : vector<32x32xf32> to vector<32xf32>
    %261 = vector.shape_cast %260 : vector<32xf32> to vector<32x1xf32>
    %262 = vector.broadcast %261 : vector<32x1xf32> to vector<32x32xf32>
    %263 = arith.subf %259, %262 : vector<32x32xf32>
    %264 = math.exp %263 : vector<32x32xf32>
    %cst_100 = arith.constant dense<0.000000e+00> : vector<32xf32>
    %265 = vector.multi_reduction <add>, %264, %cst_100 [1] : vector<32x32xf32> to vector<32xf32>
    %266 = vector.shape_cast %265 : vector<32xf32> to vector<32x1xf32>
    %267 = tpu.reciprocal %266 {approx = true} : vector<32x1xf32> -> vector<32x1xf32>
    %268 = vector.broadcast %267 : vector<32x1xf32> to vector<32x32xf32>
    %269 = arith.mulf %264, %268 : vector<32x32xf32>
    %270 = arith.truncf %269 : vector<32x32xf32> to vector<32x32xbf16>
    %271 = arith.truncf %253 : vector<32x16xf32> to vector<32x16xbf16>
    %cst_101 = arith.constant dense<0.000000e+00> : vector<32x16xf32>
    %272 = tpu.matmul %270, %271, %cst_101 {dimension_numbers = #tpu.dot_dimension_numbers<[1], [0], [0], [1], [0, 0, 1, 1], [], []>} : vector<32x32xbf16>, vector<32x16xbf16>, vector<32x16xf32> -> vector<32x16xf32>
    %273 = vector.extract_strided_slice %228 {offsets = [0, 32], sizes = [32, 16], strides = [1, 1]} : vector<32x192xf32> to vector<32x16xf32>
    %274 = vector.extract_strided_slice %228 {offsets = [0, 96], sizes = [32, 16], strides = [1, 1]} : vector<32x192xf32> to vector<32x16xf32>
    %275 = vector.extract_strided_slice %228 {offsets = [0, 160], sizes = [32, 16], strides = [1, 1]} : vector<32x192xf32> to vector<32x16xf32>
    %276 = arith.truncf %273 : vector<32x16xf32> to vector<32x16xbf16>
    %277 = arith.truncf %274 : vector<32x16xf32> to vector<32x16xbf16>
    %cst_102 = arith.constant dense<0.000000e+00> : vector<32x32xf32>
    %278 = tpu.matmul %276, %277, %cst_102 {dimension_numbers = #tpu.dot_dimension_numbers<[1], [1], [0], [0], [0, 0, 1, 0], [], []>} : vector<32x16xbf16>, vector<32x16xbf16>, vector<32x32xf32> -> vector<32x32xf32>
    %cst_103 = arith.constant 2.500000e-01 : f32
    %279 = vector.broadcast %cst_103 : f32 to vector<32x32xf32>
    %280 = arith.mulf %278, %279 : vector<32x32xf32>
    %281 = arith.addf %280, %12 : vector<32x32xf32>
    %cst_104 = arith.constant dense<0xFF800000> : vector<32xf32>
    %282 = vector.multi_reduction <maximumf>, %281, %cst_104 [1] : vector<32x32xf32> to vector<32xf32>
    %283 = vector.shape_cast %282 : vector<32xf32> to vector<32x1xf32>
    %284 = vector.broadcast %283 : vector<32x1xf32> to vector<32x32xf32>
    %285 = arith.subf %281, %284 : vector<32x32xf32>
    %286 = math.exp %285 : vector<32x32xf32>
    %cst_105 = arith.constant dense<0.000000e+00> : vector<32xf32>
    %287 = vector.multi_reduction <add>, %286, %cst_105 [1] : vector<32x32xf32> to vector<32xf32>
    %288 = vector.shape_cast %287 : vector<32xf32> to vector<32x1xf32>
    %289 = tpu.reciprocal %288 {approx = true} : vector<32x1xf32> -> vector<32x1xf32>
    %290 = vector.broadcast %289 : vector<32x1xf32> to vector<32x32xf32>
    %291 = arith.mulf %286, %290 : vector<32x32xf32>
    %292 = arith.truncf %291 : vector<32x32xf32> to vector<32x32xbf16>
    %293 = arith.truncf %275 : vector<32x16xf32> to vector<32x16xbf16>
    %cst_106 = arith.constant dense<0.000000e+00> : vector<32x16xf32>
    %294 = tpu.matmul %292, %293, %cst_106 {dimension_numbers = #tpu.dot_dimension_numbers<[1], [0], [0], [1], [0, 0, 1, 1], [], []>} : vector<32x32xbf16>, vector<32x16xbf16>, vector<32x16xf32> -> vector<32x16xf32>
    %295 = vector.extract_strided_slice %228 {offsets = [0, 48], sizes = [32, 16], strides = [1, 1]} : vector<32x192xf32> to vector<32x16xf32>
    %296 = vector.extract_strided_slice %228 {offsets = [0, 112], sizes = [32, 16], strides = [1, 1]} : vector<32x192xf32> to vector<32x16xf32>
    %297 = vector.extract_strided_slice %228 {offsets = [0, 176], sizes = [32, 16], strides = [1, 1]} : vector<32x192xf32> to vector<32x16xf32>
    %298 = arith.truncf %295 : vector<32x16xf32> to vector<32x16xbf16>
    %299 = arith.truncf %296 : vector<32x16xf32> to vector<32x16xbf16>
    %cst_107 = arith.constant dense<0.000000e+00> : vector<32x32xf32>
    %300 = tpu.matmul %298, %299, %cst_107 {dimension_numbers = #tpu.dot_dimension_numbers<[1], [1], [0], [0], [0, 0, 1, 0], [], []>} : vector<32x16xbf16>, vector<32x16xbf16>, vector<32x32xf32> -> vector<32x32xf32>
    %cst_108 = arith.constant 2.500000e-01 : f32
    %301 = vector.broadcast %cst_108 : f32 to vector<32x32xf32>
    %302 = arith.mulf %300, %301 : vector<32x32xf32>
    %303 = arith.addf %302, %12 : vector<32x32xf32>
    %cst_109 = arith.constant dense<0xFF800000> : vector<32xf32>
    %304 = vector.multi_reduction <maximumf>, %303, %cst_109 [1] : vector<32x32xf32> to vector<32xf32>
    %305 = vector.shape_cast %304 : vector<32xf32> to vector<32x1xf32>
    %306 = vector.broadcast %305 : vector<32x1xf32> to vector<32x32xf32>
    %307 = arith.subf %303, %306 : vector<32x32xf32>
    %308 = math.exp %307 : vector<32x32xf32>
    %cst_110 = arith.constant dense<0.000000e+00> : vector<32xf32>
    %309 = vector.multi_reduction <add>, %308, %cst_110 [1] : vector<32x32xf32> to vector<32xf32>
    %310 = vector.shape_cast %309 : vector<32xf32> to vector<32x1xf32>
    %311 = tpu.reciprocal %310 {approx = true} : vector<32x1xf32> -> vector<32x1xf32>
    %312 = vector.broadcast %311 : vector<32x1xf32> to vector<32x32xf32>
    %313 = arith.mulf %308, %312 : vector<32x32xf32>
    %314 = arith.truncf %313 : vector<32x32xf32> to vector<32x32xbf16>
    %315 = arith.truncf %297 : vector<32x16xf32> to vector<32x16xbf16>
    %cst_111 = arith.constant dense<0.000000e+00> : vector<32x16xf32>
    %316 = tpu.matmul %314, %315, %cst_111 {dimension_numbers = #tpu.dot_dimension_numbers<[1], [0], [0], [1], [0, 0, 1, 1], [], []>} : vector<32x32xbf16>, vector<32x16xbf16>, vector<32x16xf32> -> vector<32x16xf32>
    %317 = tpu.concatenate %250, %272, %294, %316 in 1 : vector<32x16xf32>, vector<32x16xf32>, vector<32x16xf32>, vector<32x16xf32> -> vector<32x64xf32>
    %318 = arith.truncf %317 : vector<32x64xf32> to vector<32x64xbf16>
    %c1_112 = arith.constant 1 : index
    %c0_113 = arith.constant 0 : index
    %c0_114 = arith.constant 0 : index
    %319 = vector.load %arg7[%c1_112, %c0_113, %c0_114] : memref<2x64x64xbf16, #tpu.memory_space<vmem>>, vector<1x64x64xbf16>
    %320 = vector.shape_cast %319 : vector<1x64x64xbf16> to vector<64x64xbf16>
    %cst_115 = arith.constant dense<0.000000e+00> : vector<32x64xf32>
    %321 = tpu.matmul %318, %320, %cst_115 {dimension_numbers = #tpu.dot_dimension_numbers<[1], [0], [0], [1], [0, 0, 1, 1], [], []>} : vector<32x64xbf16>, vector<64x64xbf16>, vector<32x64xf32> -> vector<32x64xf32>
    %322 = arith.addf %194, %321 : vector<32x64xf32>
    %c1_116 = arith.constant 1 : index
    %c0_117 = arith.constant 0 : index
    %c0_118 = arith.constant 0 : index
    %323 = vector.load %arg8[%c1_116, %c0_117, %c0_118] : memref<2x1x64xf32, #tpu.memory_space<vmem>>, vector<1x1x64xf32>
    %324 = vector.shape_cast %323 : vector<1x1x64xf32> to vector<1x64xf32>
    %325 = vector.broadcast %324 : vector<1x64xf32> to vector<32x64xf32>
    %326 = arith.addf %322, %325 : vector<32x64xf32>
    %c1_119 = arith.constant 1 : index
    %c0_120 = arith.constant 0 : index
    %c0_121 = arith.constant 0 : index
    %327 = vector.load %arg9[%c1_119, %c0_120, %c0_121] : memref<2x1x64xf32, #tpu.memory_space<vmem>>, vector<1x1x64xf32>
    %328 = vector.shape_cast %327 : vector<1x1x64xf32> to vector<1x64xf32>
    %c1_122 = arith.constant 1 : index
    %c0_123 = arith.constant 0 : index
    %c0_124 = arith.constant 0 : index
    %329 = vector.load %arg10[%c1_122, %c0_123, %c0_124] : memref<2x1x64xf32, #tpu.memory_space<vmem>>, vector<1x1x64xf32>
    %330 = vector.shape_cast %329 : vector<1x1x64xf32> to vector<1x64xf32>
    %cst_125 = arith.constant dense<0.000000e+00> : vector<32xf32>
    %331 = vector.multi_reduction <add>, %326, %cst_125 [1] : vector<32x64xf32> to vector<32xf32>
    %332 = vector.shape_cast %331 : vector<32xf32> to vector<32x1xf32>
    %cst_126 = arith.constant 6.400000e+01 : f32
    %333 = vector.broadcast %cst_126 : f32 to vector<32x1xf32>
    %334 = arith.divf %332, %333 : vector<32x1xf32>
    %335 = vector.broadcast %334 : vector<32x1xf32> to vector<32x64xf32>
    %336 = arith.subf %326, %335 : vector<32x64xf32>
    %337 = arith.mulf %336, %336 : vector<32x64xf32>
    %cst_127 = arith.constant dense<0.000000e+00> : vector<32xf32>
    %338 = vector.multi_reduction <add>, %337, %cst_127 [1] : vector<32x64xf32> to vector<32xf32>
    %339 = vector.shape_cast %338 : vector<32xf32> to vector<32x1xf32>
    %cst_128 = arith.constant 6.400000e+01 : f32
    %340 = vector.broadcast %cst_128 : f32 to vector<32x1xf32>
    %341 = arith.divf %339, %340 : vector<32x1xf32>
    %342 = vector.broadcast %334 : vector<32x1xf32> to vector<32x64xf32>
    %343 = arith.subf %326, %342 : vector<32x64xf32>
    %cst_129 = arith.constant 9.99999974E-6 : f32
    %344 = vector.broadcast %cst_129 : f32 to vector<32x1xf32>
    %345 = arith.addf %341, %344 : vector<32x1xf32>
    %346 = math.rsqrt %345 : vector<32x1xf32>
    %347 = vector.broadcast %346 : vector<32x1xf32> to vector<32x64xf32>
    %348 = arith.mulf %343, %347 : vector<32x64xf32>
    %349 = vector.broadcast %328 : vector<1x64xf32> to vector<32x64xf32>
    %350 = arith.mulf %348, %349 : vector<32x64xf32>
    %351 = vector.broadcast %330 : vector<1x64xf32> to vector<32x64xf32>
    %352 = arith.addf %350, %351 : vector<32x64xf32>
    %353 = arith.truncf %352 : vector<32x64xf32> to vector<32x64xbf16>
    %c1_130 = arith.constant 1 : index
    %c0_131 = arith.constant 0 : index
    %c0_132 = arith.constant 0 : index
    %354 = vector.load %arg11[%c1_130, %c0_131, %c0_132] : memref<2x64x256xbf16, #tpu.memory_space<vmem>>, vector<1x64x256xbf16>
    %355 = vector.shape_cast %354 : vector<1x64x256xbf16> to vector<64x256xbf16>
    %cst_133 = arith.constant dense<0.000000e+00> : vector<32x256xf32>
    %356 = tpu.matmul %353, %355, %cst_133 {dimension_numbers = #tpu.dot_dimension_numbers<[1], [0], [0], [1], [0, 0, 1, 1], [], []>} : vector<32x64xbf16>, vector<64x256xbf16>, vector<32x256xf32> -> vector<32x256xf32>
    %c1_134 = arith.constant 1 : index
    %c0_135 = arith.constant 0 : index
    %c0_136 = arith.constant 0 : index
    %357 = vector.load %arg12[%c1_134, %c0_135, %c0_136] : memref<2x1x256xf32, #tpu.memory_space<vmem>>, vector<1x1x256xf32>
    %358 = vector.shape_cast %357 : vector<1x1x256xf32> to vector<1x256xf32>
    %359 = vector.broadcast %358 : vector<1x256xf32> to vector<32x256xf32>
    %360 = arith.addf %356, %359 : vector<32x256xf32>
    %cst_137 = arith.constant -1.702000e+00 : f32
    %361 = vector.broadcast %cst_137 : f32 to vector<32x256xf32>
    %362 = arith.mulf %361, %360 : vector<32x256xf32>
    %363 = math.exp %362 : vector<32x256xf32>
    %cst_138 = arith.constant 1.000000e+00 : f32
    %364 = vector.broadcast %cst_138 : f32 to vector<32x256xf32>
    %365 = arith.addf %364, %363 : vector<32x256xf32>
    %366 = tpu.reciprocal %365 {approx = true} : vector<32x256xf32> -> vector<32x256xf32>
    %367 = arith.mulf %360, %366 : vector<32x256xf32>
    %368 = arith.truncf %367 : vector<32x256xf32> to vector<32x256xbf16>
    %c1_139 = arith.constant 1 : index
    %c0_140 = arith.constant 0 : index
    %c0_141 = arith.constant 0 : index
    %369 = vector.load %arg13[%c1_139, %c0_140, %c0_141] : memref<2x256x64xbf16, #tpu.memory_space<vmem>>, vector<1x256x64xbf16>
    %370 = vector.shape_cast %369 : vector<1x256x64xbf16> to vector<256x64xbf16>
    %cst_142 = arith.constant dense<0.000000e+00> : vector<32x64xf32>
    %371 = tpu.matmul %368, %370, %cst_142 {dimension_numbers = #tpu.dot_dimension_numbers<[1], [0], [0], [1], [0, 0, 1, 1], [], []>} : vector<32x256xbf16>, vector<256x64xbf16>, vector<32x64xf32> -> vector<32x64xf32>
    %c1_143 = arith.constant 1 : index
    %c0_144 = arith.constant 0 : index
    %c0_145 = arith.constant 0 : index
    %372 = vector.load %arg14[%c1_143, %c0_144, %c0_145] : memref<2x1x64xf32, #tpu.memory_space<vmem>>, vector<1x1x64xf32>
    %373 = vector.shape_cast %372 : vector<1x1x64xf32> to vector<1x64xf32>
    %374 = vector.broadcast %373 : vector<1x64xf32> to vector<32x64xf32>
    %375 = arith.addf %371, %374 : vector<32x64xf32>
    %376 = arith.addf %326, %375 : vector<32x64xf32>
    %c0_146 = arith.constant 0 : index
    %c0_147 = arith.constant 0 : index
    %c0_148 = arith.constant 0 : index
    %377 = vector.load %arg2[%c0_146, %c0_147, %c0_148] : memref<1x2x32xf32, #tpu.memory_space<vmem>>, vector<1x2x32xf32>
    %378 = vector.shape_cast %377 : vector<1x2x32xf32> to vector<2x32xf32>
    %cst_149 = arith.constant dense<0.000000e+00> : vector<2x64xf32>
    %379 = tpu.matmul %378, %376, %cst_149 {dimension_numbers = #tpu.dot_dimension_numbers<[1], [0], [0], [1], [0, 0, 1, 1], [], []>} : vector<2x32xf32>, vector<32x64xf32>, vector<2x64xf32> -> vector<2x64xf32>
    %c0_150 = arith.constant 0 : index
    %c0_151 = arith.constant 0 : index
    %380 = vector.load %arg15[%c0_150, %c0_151] : memref<1x64xf32, #tpu.memory_space<vmem>>, vector<1x64xf32>
    %c0_152 = arith.constant 0 : index
    %c0_153 = arith.constant 0 : index
    %381 = vector.load %arg16[%c0_152, %c0_153] : memref<1x64xf32, #tpu.memory_space<vmem>>, vector<1x64xf32>
    %cst_154 = arith.constant dense<0.000000e+00> : vector<2xf32>
    %382 = vector.multi_reduction <add>, %379, %cst_154 [1] : vector<2x64xf32> to vector<2xf32>
    %383 = vector.shape_cast %382 : vector<2xf32> to vector<2x1xf32>
    %cst_155 = arith.constant 6.400000e+01 : f32
    %384 = vector.broadcast %cst_155 : f32 to vector<2x1xf32>
    %385 = arith.divf %383, %384 : vector<2x1xf32>
    %386 = vector.broadcast %385 : vector<2x1xf32> to vector<2x64xf32>
    %387 = arith.subf %379, %386 : vector<2x64xf32>
    %388 = arith.mulf %387, %387 : vector<2x64xf32>
    %cst_156 = arith.constant dense<0.000000e+00> : vector<2xf32>
    %389 = vector.multi_reduction <add>, %388, %cst_156 [1] : vector<2x64xf32> to vector<2xf32>
    %390 = vector.shape_cast %389 : vector<2xf32> to vector<2x1xf32>
    %cst_157 = arith.constant 6.400000e+01 : f32
    %391 = vector.broadcast %cst_157 : f32 to vector<2x1xf32>
    %392 = arith.divf %390, %391 : vector<2x1xf32>
    %393 = vector.broadcast %385 : vector<2x1xf32> to vector<2x64xf32>
    %394 = arith.subf %379, %393 : vector<2x64xf32>
    %cst_158 = arith.constant 9.99999974E-6 : f32
    %395 = vector.broadcast %cst_158 : f32 to vector<2x1xf32>
    %396 = arith.addf %392, %395 : vector<2x1xf32>
    %397 = math.rsqrt %396 : vector<2x1xf32>
    %398 = vector.broadcast %397 : vector<2x1xf32> to vector<2x64xf32>
    %399 = arith.mulf %394, %398 : vector<2x64xf32>
    %400 = vector.broadcast %380 : vector<1x64xf32> to vector<2x64xf32>
    %401 = arith.mulf %399, %400 : vector<2x64xf32>
    %402 = vector.broadcast %381 : vector<1x64xf32> to vector<2x64xf32>
    %403 = arith.addf %401, %402 : vector<2x64xf32>
    %c0_159 = arith.constant 0 : index
    %c0_160 = arith.constant 0 : index
    %404 = vector.load %arg17[%c0_159, %c0_160] : memref<64x32xf32, #tpu.memory_space<vmem>>, vector<64x32xf32>
    %cst_161 = arith.constant dense<0.000000e+00> : vector<2x32xf32>
    %405 = tpu.matmul %403, %404, %cst_161 {dimension_numbers = #tpu.dot_dimension_numbers<[1], [0], [0], [1], [0, 0, 1, 1], [], []>} : vector<2x64xf32>, vector<64x32xf32>, vector<2x32xf32> -> vector<2x32xf32>
    %406 = arith.mulf %405, %405 : vector<2x32xf32>
    %cst_162 = arith.constant dense<0.000000e+00> : vector<2xf32>
    %407 = vector.multi_reduction <add>, %406, %cst_162 [1] : vector<2x32xf32> to vector<2xf32>
    %408 = vector.shape_cast %407 : vector<2xf32> to vector<2x1xf32>
    %409 = math.rsqrt %408 : vector<2x1xf32>
    %410 = vector.broadcast %409 : vector<2x1xf32> to vector<2x32xf32>
    %411 = arith.mulf %405, %410 : vector<2x32xf32>
    %c0_163 = arith.constant 0 : index
    %c0_164 = arith.constant 0 : index
    %412 = vector.load %arg18[%c0_163, %c0_164] : memref<2x32xf32, #tpu.memory_space<vmem>>, vector<2x32xf32>
    %cst_165 = arith.constant dense<0.000000e+00> : vector<2x2xf32>
    %413 = tpu.matmul %412, %411, %cst_165 {dimension_numbers = #tpu.dot_dimension_numbers<[1], [1], [0], [0], [0, 0, 1, 0], [], []>} : vector<2x32xf32>, vector<2x32xf32>, vector<2x2xf32> -> vector<2x2xf32>
    %c0_166 = arith.constant 0 : index
    %c0_167 = arith.constant 0 : index
    %414 = memref.load %arg19[%c0_166, %c0_167] : memref<1x1xf32, #tpu.memory_space<smem>>
    %415 = vector.broadcast %414 : f32 to vector<2x2xf32>
    %416 = arith.mulf %415, %413 : vector<2x2xf32>
    %c0_168 = arith.constant 0 : index
    %c0_169 = arith.constant 0 : index
    %c0_170 = arith.constant 0 : index
    %417 = vector.load %arg20[%c0_168, %c0_169, %c0_170] : memref<1x2x2xf32, #tpu.memory_space<vmem>>, vector<1x2x2xf32>
    %418 = vector.shape_cast %417 : vector<1x2x2xf32> to vector<2x2xf32>
    %419 = vector.shape_cast %416 : vector<2x2xf32> to vector<1x2x2xf32>
    tpu.vector_store %arg20[%c0_168, %c0_169, %c0_170], %419 {strides = array<i32>} : memref<1x2x2xf32, #tpu.memory_space<vmem>>, vector<1x2x2xf32>,
    return
  }
  func.func @transform_0(%arg0: i32) -> (i32, i32) {
    %c0_i32 = arith.constant 0 : i32
    %c0_i32_0 = arith.constant 0 : i32
    return %arg0, %c0_i32 : i32, i32
  }
  func.func @transform_1(%arg0: i32) -> (i32, i32, i32) {
    %c0_i32 = arith.constant 0 : i32
    %c0_i32_0 = arith.constant 0 : i32
    %c0_i32_1 = arith.constant 0 : i32
    return %arg0, %c0_i32, %c0_i32_0 : i32, i32, i32
  }
  func.func @transform_2(%arg0: i32) -> (i32, i32, i32) {
    %c0_i32 = arith.constant 0 : i32
    %c0_i32_0 = arith.constant 0 : i32
    %c0_i32_1 = arith.constant 0 : i32
    %c0_i32_2 = arith.constant 0 : i32
    return %c0_i32, %c0_i32_0, %c0_i32_1 : i32, i32, i32
  }
  func.func @transform_3(%arg0: i32) -> (i32, i32, i32) {
    %c0_i32 = arith.constant 0 : i32
    %c0_i32_0 = arith.constant 0 : i32
    %c0_i32_1 = arith.constant 0 : i32
    %c0_i32_2 = arith.constant 0 : i32
    return %c0_i32, %c0_i32_0, %c0_i32_1 : i32, i32, i32
  }
  func.func @transform_4(%arg0: i32) -> (i32, i32, i32) {
    %c0_i32 = arith.constant 0 : i32
    %c0_i32_0 = arith.constant 0 : i32
    %c0_i32_1 = arith.constant 0 : i32
    %c0_i32_2 = arith.constant 0 : i32
    return %c0_i32, %c0_i32_0, %c0_i32_1 : i32, i32, i32
  }
  func.func @transform_5(%arg0: i32) -> (i32, i32, i32) {
    %c0_i32 = arith.constant 0 : i32
    %c0_i32_0 = arith.constant 0 : i32
    %c0_i32_1 = arith.constant 0 : i32
    %c0_i32_2 = arith.constant 0 : i32
    return %c0_i32, %c0_i32_0, %c0_i32_1 : i32, i32, i32
  }
  func.func @transform_6(%arg0: i32) -> (i32, i32, i32) {
    %c0_i32 = arith.constant 0 : i32
    %c0_i32_0 = arith.constant 0 : i32
    %c0_i32_1 = arith.constant 0 : i32
    %c0_i32_2 = arith.constant 0 : i32
    return %c0_i32, %c0_i32_0, %c0_i32_1 : i32, i32, i32
  }
  func.func @transform_7(%arg0: i32) -> (i32, i32, i32) {
    %c0_i32 = arith.constant 0 : i32
    %c0_i32_0 = arith.constant 0 : i32
    %c0_i32_1 = arith.constant 0 : i32
    %c0_i32_2 = arith.constant 0 : i32
    return %c0_i32, %c0_i32_0, %c0_i32_1 : i32, i32, i32
  }
  func.func @transform_8(%arg0: i32) -> (i32, i32, i32) {
    %c0_i32 = arith.constant 0 : i32
    %c0_i32_0 = arith.constant 0 : i32
    %c0_i32_1 = arith.constant 0 : i32
    %c0_i32_2 = arith.constant 0 : i32
    return %c0_i32, %c0_i32_0, %c0_i32_1 : i32, i32, i32
  }
  func.func @transform_9(%arg0: i32) -> (i32, i32, i32) {
    %c0_i32 = arith.constant 0 : i32
    %c0_i32_0 = arith.constant 0 : i32
    %c0_i32_1 = arith.constant 0 : i32
    %c0_i32_2 = arith.constant 0 : i32
    return %c0_i32, %c0_i32_0, %c0_i32_1 : i32, i32, i32
  }
  func.func @transform_10(%arg0: i32) -> (i32, i32, i32) {
    %c0_i32 = arith.constant 0 : i32
    %c0_i32_0 = arith.constant 0 : i32
    %c0_i32_1 = arith.constant 0 : i32
    %c0_i32_2 = arith.constant 0 : i32
    return %c0_i32, %c0_i32_0, %c0_i32_1 : i32, i32, i32
  }
  func.func @transform_11(%arg0: i32) -> (i32, i32, i32) {
    %c0_i32 = arith.constant 0 : i32
    %c0_i32_0 = arith.constant 0 : i32
    %c0_i32_1 = arith.constant 0 : i32
    %c0_i32_2 = arith.constant 0 : i32
    return %c0_i32, %c0_i32_0, %c0_i32_1 : i32, i32, i32
  }
  func.func @transform_12(%arg0: i32) -> (i32, i32, i32) {
    %c0_i32 = arith.constant 0 : i32
    %c0_i32_0 = arith.constant 0 : i32
    %c0_i32_1 = arith.constant 0 : i32
    %c0_i32_2 = arith.constant 0 : i32
    return %c0_i32, %c0_i32_0, %c0_i32_1 : i32, i32, i32
  }
  func.func @transform_13(%arg0: i32) -> (i32, i32, i32) {
    %c0_i32 = arith.constant 0 : i32
    %c0_i32_0 = arith.constant 0 : i32
    %c0_i32_1 = arith.constant 0 : i32
    %c0_i32_2 = arith.constant 0 : i32
    return %c0_i32, %c0_i32_0, %c0_i32_1 : i32, i32, i32
  }
  func.func @transform_14(%arg0: i32) -> (i32, i32) {
    %c0_i32 = arith.constant 0 : i32
    %c0_i32_0 = arith.constant 0 : i32
    %c0_i32_1 = arith.constant 0 : i32
    return %c0_i32, %c0_i32_0 : i32, i32
  }
  func.func @transform_15(%arg0: i32) -> (i32, i32) {
    %c0_i32 = arith.constant 0 : i32
    %c0_i32_0 = arith.constant 0 : i32
    %c0_i32_1 = arith.constant 0 : i32
    return %c0_i32, %c0_i32_0 : i32, i32
  }
  func.func @transform_16(%arg0: i32) -> (i32, i32) {
    %c0_i32 = arith.constant 0 : i32
    %c0_i32_0 = arith.constant 0 : i32
    %c0_i32_1 = arith.constant 0 : i32
    return %c0_i32, %c0_i32_0 : i32, i32
  }
  func.func @transform_17(%arg0: i32) -> (i32, i32) {
    %c0_i32 = arith.constant 0 : i32
    %c0_i32_0 = arith.constant 0 : i32
    %c0_i32_1 = arith.constant 0 : i32
    return %c0_i32, %c0_i32_0 : i32, i32
  }
  func.func @transform_18(%arg0: i32) -> (i32, i32) {
    %c0_i32 = arith.constant 0 : i32
    %c0_i32_0 = arith.constant 0 : i32
    %c0_i32_1 = arith.constant 0 : i32
    return %c0_i32, %c0_i32_0 : i32, i32
  }
  func.func @transform_19(%arg0: i32) -> (i32, i32, i32) {
    %c0_i32 = arith.constant 0 : i32
    %c0_i32_0 = arith.constant 0 : i32
    %c0_i32_1 = arith.constant 0 : i32
    return %arg0, %c0_i32, %c0_i32_0 : i32, i32, i32
  }
}

</mosaic_0001>

<bundles_post_ra>
// kernel: coop_forward.1
= control target key start
LH: loop header
LB: loop body
LE: loop exit
PB: predicated region body
PF: predicated region fallthrough
CT: control target
= control target key end

     0   :  { %s5147_s20 = smov 0   ;;  %s6135_s0 = inlined_call_operand.vmem [shape: f32[64,64], index: 0, kind: input, shape index: {}]   ;;  %s6136_s1 = inlined_call_operand.vmem [shape: f32[2,2,32], index: 1, kind: input, shape index: {}]   ;;  %s6137_s2 = inlined_call_operand.vmem [shape: f32[2,1,64], index: 2, kind: input, shape index: {}]   ;;  %s6138_s3 = inlined_call_operand.vmem [shape: f32[2,1,64], index: 3, kind: input, shape index: {}]   ;;  %s6139_s4 = inlined_call_operand.vmem [shape: bf16[2,64,192], index: 4, kind: input, shape index: {}]   ;;  %s6140_s5 = inlined_call_operand.vmem [shape: f32[2,1,192], index: 5, kind: input, shape index: {}]   ;;  %s6141_s6 = inlined_call_operand.vmem [shape: bf16[2,64,64], index: 6, kind: input, shape index: {}]   ;;  %s6142_s7 = inlined_call_operand.vmem [shape: f32[2,1,64], index: 7, kind: input, shape index: {}]   ;;  %s6143_s8 = inlined_call_operand.vmem [shape: f32[2,1,64], index: 8, kind: input, shape index: {}]   ;;  %s6144_s9 = inlined_call_operand.vmem [shape: f32[2,1,64], index: 9, kind: input, shape index: {}]   ;;  %s6145_s10 = inlined_call_operand.vmem [shape: bf16[2,64,256], index: 10, kind: input, shape index: {}]   ;;  %s6146_s11 = inlined_call_operand.vmem [shape: f32[2,1,256], index: 11, kind: input, shape index: {}]   ;;  %s6147_s12 = inlined_call_operand.vmem [shape: bf16[2,256,64], index: 12, kind: input, shape index: {}]   ;;  %s6148_s13 = inlined_call_operand.vmem [shape: f32[2,1,64], index: 13, kind: input, shape index: {}]   ;;  %s6149_s14 = inlined_call_operand.vmem [shape: f32[1,64], index: 14, kind: input, shape index: {}]   ;;  %s6150_s15 = inlined_call_operand.vmem [shape: f32[1,64], index: 15, kind: input, shape index: {}]   ;;  %s6151_s16 = inlined_call_operand.vmem [shape: f32[64,32], index: 16, kind: input, shape index: {}]   ;;  %s6152_s17 = inlined_call_operand.vmem [shape: f32[2,32], index: 17, kind: input, shape index: {}]   ;;  %s6153_s18 = inlined_call_operand.<no memory space> [shape: f32[1,1], index: 18, kind: input, shape index: {}]   ;;  %s6154_s19 = inlined_call_operand.vmem [shape: f32[2,2,2], index: 19, kind: output, shape index: {}]  }
   0x1   :  { %6167 = sst [smem:[#allocation3_spill]] %s6135_s0 }
   0x2   :  { %6168 = sst [smem:[#allocation4_spill]] %s6136_s1 }
   0x3   :  { %6169 = sst [smem:[#allocation5_spill]] %s6137_s2 }
   0x4   :  { %6170 = sst [smem:[#allocation6_spill]] %s6138_s3 }
   0x5   :  { %24 = sst [smem:[#allocation2]] %s6153_s18 }
   0x6 LB: > { %s5153_s21 = sadd.s32 4294967295, %s5031_s20   ;;  %p4070_p0 = scmp.ge.s32.totalorder %s5031_s20, 1  ;;  %s5031_s20 = sphi %s5147_s20, %s30_s20  }
   0x7   : > { %p548_p1 = scmp.lt.s32.totalorder %s5031_s20, 3 }
   0x9   : > { %p549_p2 = pnand %p4070_p0, %p548_p1 }
   0xa   : > { %s4071_s1 = sshll.u32 (!%p549_p2), %s5153_s21, 2  ;;  %s6171_s23 = sld [smem:[#allocation3_spill]] (!%p549_p2) }
   0xb   : > { %552 = sbr.rel (%p549_p2) target bundleno = 7223 (0x1c37), region = 96  ;;  %p608_p3 = scmp.lt.s32.totalorder (!%p549_p2), %s4071_s1, 7 }
   0xc   : > { %s6172_s29 = sld [smem:[#allocation5_spill]] (!%p549_p2)  ;;  %s5034_s2 = smov (!%p549_p2), 48  }
   0xd   : > { %s6165_s25 = smov (!%p549_p2), 112   ;;  %s6163_s3 = smov (!%p549_p2), 32  }
   0xe   : > { %s6161_s26 = smov (!%p549_p2), 96   ;;  %s6159_s27 = smov (!%p549_p2), 16  }
   0xf   : > { %s6157_s28 = smov (!%p549_p2), 80   ;;  %p613_p4 = scmp.lt.s32.totalorder (!%p549_p2), %s5153_s21, 1 }
  0x10   : > { %vm656_vm0 = vcmask 523264   ;;  %s6181_s1 = smov (!%p608_p3, %s4071_s1), 7  ;;  %v4705_v28 = vld [vmem:[%s6139_s4 + $0x34] ss:$8 sps:$4 sm:$0xff]   ;;  %v4707_v29 = vld [vmem:[%s6139_s4 + $0x30] ss:$8 sps:$4 sm:$0xff]  }
  0x11   : > { %s4072_s18 = sshll.u32 %s6181_s1, 3  ;;  %v4708_v30 = vld [vmem:[%s6139_s4 + $0x24] ss:$8 sps:$4 sm:$0xff]   ;;  %806 = vmatprep.subr.bf16.mxu0 %v4705_v28  ;;  %v4710_v31 = vld [vmem:[%s6139_s4 + $0x20] ss:$8 sps:$4 sm:$0xff]   ;;  %v5033_v32 = vmov 0  }
  0x12   : > { %s5161_s24 = scalar_lea.vmem %s6171_s23, %s4072_s18  ;;  %807 = vmatpush1.bf16.msra.mxu0 %v4707_v29  ;;  %830 = vmatprep.mubr.bf16.mxu0 %v5033_v32  ;;  %v4711_v33 = vld [vmem:[%s6139_s4 + $0x14] ss:$8 sps:$4 sm:$0xff]   ;;  %v4713_v34 = vld [vmem:[%s6139_s4 + $0x10] ss:$8 sps:$4 sm:$0xff]   ;;  %v4714_v35 = vld [vmem:[%s6139_s4 + $0x4] ss:$8 sps:$4 sm:$0xff]  }
  0x13   : > { %v622_v0 = vld [vmem:[%s5161_s24] sm:$0xff]  ;;  %v624_v1 = vld [vmem:[%s5161_s24 + $0x10] sm:$0xff]  ;;  %v623_v2 = vld [vmem:[%s5161_s24 + $0x8] sm:$0xff]  ;;  %808 = vmatprep.subr.bf16.mxu0 %v4708_v30  ;;  %s6173_s1 = sld [smem:[#allocation6_spill]]  ;;  %vm859_vm1 = vcmask 130048   ;;  %s5035_s23 = smov 64  }
  0x14   : > { %v657_v3 = vsel %vm656_vm0, %v622_v0, 0.0  ;;  %v663_v4 = vsel %vm656_vm0, %v624_v1, 0.0  ;;  %v660_v5 = vsel %vm656_vm0, %v623_v2, 0.0  ;;  %v625_v6 = vld [vmem:[%s5161_s24 + $0x18] sm:$0xff]  ;;  %v4716_v36 = vld [vmem:[%s6139_s4] ss:$8 sps:$4 sm:$0xff]  }
  0x15   : > { %658 = vadd.xlane.f32.xlu0 %v657_v3  ;;  %664 = vadd.xlane.f32.xlu1 %v663_v4  ;;  %v666_v7 = vsel %vm656_vm0, %v625_v6, 0.0  ;;  %v4075_v51 = vld [vmem:[%s6172_s29] ss:$0 sm:$0xff]  ;;  %vm929_vm14 = vcmask 261120   ;;  %vm1643_vm15 = vcmask 392192   ;;  %s6183_s21 = smov (!%p613_p4, %s5153_s21), 1 }
  0x16   : > { %809 = vmatpush1.bf16.msra.mxu0 %v4710_v31 }
  0x17   : > { %810 = vmatprep.subr.bf16.mxu0 %v4711_v33 }
  0x19   : > { %661 = vadd.xlane.f32.xlu0 %v660_v5  ;;  %667 = vadd.xlane.f32.xlu1 %v666_v7  ;;  %v4076_v56 = vld [vmem:[%s6173_s1] ss:$0 sm:$0xff]  ;;  %v626_v5 = vlaneseq }
  0x1a   : > { %811 = vmatpush1.bf16.msra.mxu0 %v4713_v34 }
  0x1b   : > { %812 = vmatprep.subr.bf16.mxu0 %v4714_v35 }
  0x1e   : > { %813 = vmatpush1.bf16.msra.mxu0 %v4716_v36 }
  0x9e   : > { %v659_v8 = vpop.xlane.xlu0 %658  ;;  %v665_v9 = vpop.xlane.xlu1 %664 }
  0x9f   : > { %v670_v10 = vmul.f32 0.015625, %v659_v8  ;;  %v672_v11 = vmul.f32 0.015625, %v665_v9  ;;  %v740_v8 = vld [vmem:[%s6140_s5] sm:$0x3] }
  0xa1   : > { %v674_v12 = vsub.f32 %v622_v0, %v670_v10  ;;  %v5171_v13 = vsub.f32 %v624_v1, %v672_v11 }
  0xa2   : > { %v662_v14 = vpop.xlane.xlu0 %661  ;;  %v668_v15 = vpop.xlane.xlu1 %667 }
  0xa3   : > { %v671_v16 = vmul.f32 0.015625, %v662_v14  ;;  %v673_v17 = vmul.f32 0.015625, %v668_v15  ;;  %v678_v18 = vmul.f32 %v674_v12, %v674_v12  ;;  %v680_v19 = vmul.f32 %v5171_v13, %v5171_v13 }
  0xa5   : > { %v675_v20 = vsub.f32 %v623_v2, %v671_v16  ;;  %v677_v21 = vsub.f32 %v625_v6, %v673_v17  ;;  %v682_v22 = vsel %vm656_vm0, %v678_v18, 0.0  ;;  %v688_v23 = vsel %vm656_vm0, %v680_v19, 0.0 }
  0xa6   : > { %683 = vadd.xlane.f32.xlu0 %v682_v22  ;;  %v5215_v6 = vshrl.u32 %v626_v5, 7 }
  0xa7   : > { %v679_v24 = vmul.f32 %v675_v20, %v675_v20  ;;  %v681_v25 = vmul.f32 %v677_v21, %v677_v21 }
  0xa8   : > { %v5218_v7 = vsub.s32 0, %v5215_v6  ;;  %v5224_v9 = vsub.s32 1, %v5215_v6 }
  0xa9   : > { %v685_v26 = vsel %vm656_vm0, %v679_v24, 0.0  ;;  %v691_v27 = vsel %vm656_vm0, %v681_v25, 0.0 }
  0xaa   : > { %689 = vadd.xlane.f32.xlu0 %v688_v23  ;;  %686 = vadd.xlane.f32.xlu1 %v685_v26  ;;  %v745_v11 = vrot.slane %v740_v8, %v5218_v7 }
  0xae   : > { %692 = vadd.xlane.f32.xlu1 %v691_v27 }
 0x12f   : > { %v684_v37 = vpop.xlane.xlu0 %683 }
 0x130   : > { %v694_v38 = vmul.f32 0.015625, %v684_v37 }
 0x132   : > { %v698_v39 = vadd.f32 1e-05, %v694_v38 }
 0x133   : > { %v687_v40 = vpop.xlane.xlu1 %686  ;;  %v690_v41 = vpop.xlane.xlu0 %689 }
 0x134   : > { %4793 = vrsqrt.f32 %v698_v39  ;;  %v695_v42 = vmul.f32 0.015625, %v687_v40  ;;  %v696_v43 = vmul.f32 0.015625, %v690_v41 }
 0x136   : > { %v699_v44 = vadd.f32 1e-05, %v695_v42  ;;  %v700_v45 = vadd.f32 1e-05, %v696_v43 }
 0x137   : > { %v693_v46 = vpop.xlane.xlu1 %692 }
 0x138   : > { %4795 = vrsqrt.f32 %v699_v44  ;;  %v697_v47 = vmul.f32 0.015625, %v693_v46 }
 0x139   : > { %4797 = vrsqrt.f32 %v700_v45 }
 0x13a   : > { %v701_v48 = vadd.f32 1e-05, %v697_v47 }
 0x13c   : > { %4799 = vrsqrt.f32 %v701_v48 }
 0x141   : > { %v4794_v49 = vpop.eup %4793 }
 0x142   : > { %v706_v50 = vmul.f32 %v4794_v49, %v674_v12  ;;  %v632_v49 = vand.u32 127, %v626_v5 }
 0x144   : > { %v716_v54 = vmul.f32 %v4075_v51, %v706_v50  ;;  %v629_v50 = vadd.s32 16, %v5215_v6  ;;  %vm642_vm3 = vcmp.le.s32.totalorder %v632_v49, %v5215_v6 }
 0x145   : > { %v4796_v52 = vpop.eup %4795 }
 0x146   : > { %v707_v53 = vmul.f32 %v4796_v52, %v675_v20  ;;  %v4798_v55 = vpop.eup %4797  ;;  %v726_v59 = vadd.f32 %v4076_v56, %v716_v54  ;;  %v628_v52 = vadd.s32 8, %v5215_v6  ;;  %v635_v54 = vand.u32 4294967280, %v629_v50 }
 0x147   : > { %v708_v61 = vmul.f32 %v4798_v55, %v5171_v13  ;;  %v749_v13 = vrot.slane %v740_v8, %v5224_v9  ;;  %v630_v55 = vadd.s32 24, %v5215_v6  ;;  %vm644_vm5 = vcmp.le.s32.totalorder %v632_v49, %v629_v50 }
 0x148   : > { %v717_v57 = vmul.f32 %v4075_v51, %v707_v53  ;;  %v637_v53 = vand.u32 4294967280, %v632_v49  ;;  %vm643_vm9 = vcmp.le.s32.totalorder %v632_v49, %v628_v52 }
 0x149   : > { %v4800_v58 = vpop.eup %4799  ;;  %v718_v1 = vmul.f32 %v4075_v51, %v708_v61  ;;  %vm645_vm11 = vcmp.le.s32.totalorder %v632_v49, %v630_v55 }
 0x14a   : > { %v727_v60 = vadd.f32 %v4076_v56, %v717_v57  ;;  %v709_v62 = vmul.f32 %v4800_v58, %v677_v21  ;;  %vm640_vm4 = vcmp.eq.s32.totalorder %v635_v54, %v637_v53  ;;  %v636_v57 = vand.u32 4294967280, %v630_v55 }
 0x14b   : > { %v728_v3 = vadd.f32 %v4076_v56, %v718_v1  ;;  %vm648_vm7 = vmand %vm640_vm4, %vm644_vm5 }
 0x14c   : > { %v730_v63 = vpack.c.bf16 %v727_v60, %v726_v59  ;;  %v719_v0 = vmul.f32 %v4075_v51, %v709_v62  ;;  %v633_v51 = vand.u32 4294967280, %v5215_v6  ;;  %vm641_vm10 = vcmp.eq.s32.totalorder %v636_v57, %v637_v53 }
 0x14d   : > { %vm649_vm13 = vmand %vm641_vm10, %vm645_vm11 }
 0x14e   : > { %4085 = vmatmul.mubr.msk.bf16.vlgmr.msra.gmra.mxu0 %vm656_vm0, %v730_v63  ;;  %v729_v2 = vadd.f32 %v4076_v56, %v719_v0  ;;  %vm638_vm2 = vcmp.eq.s32.totalorder %v633_v51, %v637_v53  ;;  %v634_v56 = vand.u32 4294967280, %v628_v52  ;;  %v5039_v63 = vmov -1e+30  }
 0x14f   : > { %840 = vmatprep.mubr.bf16.mxu0 %v5033_v32  ;;  %vm646_vm6 = vmand %vm638_vm2, %vm642_vm3  ;;  %vm3803_vm2 = vcmask 517120   ;;  %vm3913_vm3 = vcmask 254976  }
 0x150   : > { %v731_v4 = vpack.c.bf16 %v729_v2, %v728_v3  ;;  %vm639_vm8 = vcmp.eq.s32.totalorder %v634_v56, %v637_v53  ;;  %v5286_v0 = vsel %vm646_vm6, 0.0, %v5039_v63  ;;  %v5288_v2 = vsel %vm648_vm7, 0.0, %v5039_v63 }
 0x151   : > { %vm647_vm12 = vmand %vm639_vm8, %vm643_vm9 }
 0x156   : > { %4086 = vmatmul.mubr.msk.bf16.gmra.mxu0 %vm656_vm0, %v731_v4 }
 0x20e   : > { %v832_v10 = vpop.f32.mrf.mxu0 }
 0x20f   : > { %v833_v15 = vadd.f32 %v832_v10, %v745_v11 }
 0x210   : > { %v834_v12 = vpop.f32.mrf.mxu0 }
 0x211   : > { %v835_v18 = vadd.f32 %v834_v12, %v749_v13 }
 0x212   : > { %v836_v14 = vpop.f32.mrf.mxu0 }
 0x213   : > { %v837_v16 = vadd.f32 %v836_v14, %v745_v11 }
 0x214   : > { %v838_v17 = vpop.f32.mrf.mxu0 }
 0x215   : > { %v5228_v19 = vpack.c.bf16 %v837_v16, %v833_v15  ;;  %v839_v20 = vadd.f32 %v838_v17, %v749_v13  ;;  %v5298_v16 = vsel %vm649_vm13, 0.0, %v5039_v63 }
 0x216   : > { %v842_v21 = vpop.f32.mrf.mxu0 }
 0x217   : > { %v5230_v22 = vpack.c.bf16 %v839_v20, %v835_v18  ;;  %4427 = vmatprep.mubr.msk.bf16.mxu1 %vm859_vm1, %v5228_v19  ;;  %v843_v25 = vadd.f32 %v842_v21, %v745_v11 }
 0x218   : > { %v844_v23 = vpop.f32.mrf.mxu0 }
 0x219   : > { %v845_v37 = vadd.f32 %v844_v23, %v749_v13 }
 0x21a   : > { %v846_v24 = vpop.f32.mrf.mxu0 }
 0x21b   : > { %v847_v26 = vadd.f32 %v846_v24, %v745_v11  ;;  %v5294_v11 = vsel %vm647_vm12, 0.0, %v5039_v63 }
 0x21c   : > { %v848_v33 = vpop.f32.mrf.mxu0 }
 0x21d   : > { %v5234_v27 = vpack.c.bf16 %v847_v26, %v843_v25  ;;  %v849_v36 = vadd.f32 %v848_v33, %v749_v13 }
 0x21f   : > { %1039 = vrot.lane.b32.xlu1 %v5234_v27, %s5034_s2  ;;  %857 = vrot.lane.b32.xlu0 %v5234_v27, %s5035_s23  ;;  %v5262_v39 = vpack.c.bf16 %v849_v36, %v845_v37 }
 0x223   : > { %855 = vrot.lane.b32.xlu1 %v5228_v19, %s5035_s23  ;;  %1033 = vrot.lane.b32.xlu0 %v5228_v19, %s6165_s25 }
 0x227   : > { %1037 = vrot.lane.b32.xlu1 %v5228_v19, %s5034_s2  ;;  %1035 = vrot.lane.b32.xlu0 %v5234_v27, %s6165_s25 }
 0x22b   : > { %1225 = vrot.lane.b32.xlu1 %v5234_v27, %s6163_s3  ;;  %1219 = vrot.lane.b32.xlu0 %v5228_v19, %s6161_s26 }
 0x22f   : > { %1223 = vrot.lane.b32.xlu1 %v5228_v19, %s6163_s3 }
 0x233   : > { %1221 = vrot.lane.b32.xlu1 %v5234_v27, %s6161_s26 }
 0x291   : > { %v1040_v28 = vpop.permute.xlu1 %1039  ;;  %v858_v29 = vpop.permute.xlu0 %857 }
 0x292   : > { %4610 = vmatprep.subr.msk.bf16.mxu1 %vm859_vm1, %v858_v29  ;;  %4612 = vmatprep.subr.msk.bf16.mxu0 %vm859_vm1, %v1040_v28  ;;  %v870_v30 = vsel %vm859_vm1, %v858_v29, 0  ;;  %v1051_v31 = vsel %vm859_vm1, %v1040_v28, 0 }
 0x293   : > { %4424 = vmatpush3.bf16.xpose.msra.mxu1 %v870_v30  ;;  %4440 = vmatpush3.bf16.xpose.msra.mxu0 %v1051_v31 }
 0x295   : > { %v856_v34 = vpop.permute.xlu1 %855  ;;  %v1034_v35 = vpop.permute.xlu0 %1033 }
 0x296   : > { %4611 = vmatprep.subr.msk.bf16.mxu1 %vm859_vm1, %v856_v34  ;;  %4443 = vmatprep.mubr.msk.bf16.mxu0 %vm859_vm1, %v1034_v35  ;;  %v867_v40 = vsel %vm859_vm1, %v856_v34, 0 }
 0x299   : > { %v1038_v38 = vpop.permute.xlu1 %1037  ;;  %v1036_v42 = vpop.permute.xlu0 %1035 }
 0x29a   : > { %4613 = vmatprep.subr.msk.bf16.mxu0 %vm859_vm1, %v1038_v38  ;;  %v1048_v41 = vsel %vm859_vm1, %v1038_v38, 0 }
 0x29b   : > { %4426 = vmatpush3.bf16.xpose.msra.mxu1 %v867_v40  ;;  %4442 = vmatpush3.bf16.xpose.msra.mxu0 %v1048_v41 }
 0x29c   : > { %4431 = vmatprep.subr.bf16.mxu1 %v5262_v39 }
 0x29d   : > { %v1226_v43 = vpop.permute.xlu1 %1225  ;;  %v1220_v45 = vpop.permute.xlu0 %1219 }
 0x29e   : > { %4614 = vmatprep.subr.msk.bf16.mxu0 %vm859_vm1, %v1226_v43  ;;  %v1237_v44 = vsel %vm859_vm1, %v1226_v43, 0 }
 0x2a1   : > { %v1224_v46 = vpop.permute.xlu1 %1223 }
 0x2a2   : > { %4428 = vmatmul.mubr.msk.bf16.vlgmr.msra.gmra.mxu1 %vm859_vm1, %v5234_v27  ;;  %4444 = vmatmul.mubr.msk.bf16.vlgmr.msra.gmra.mxu0 %vm859_vm1, %v1036_v42  ;;  %v1234_v47 = vsel %vm859_vm1, %v1224_v46, 0 }
 0x2a3   : > { %4432 = vmatpush3.bf16.msra.mxu1 %v5262_v39  ;;  %4456 = vmatpush3.bf16.xpose.msra.mxu0 %v1237_v44 }
 0x2a4   : > { %4459 = vmatprep.mubr.msk.bf16.mxu0 %vm859_vm1, %v1220_v45  ;;  %4433 = vmatprep.subr.bf16.mxu1 %v5230_v22 }
 0x2a5   : > { %4615 = vmatprep.subr.msk.bf16.mxu0 %vm859_vm1, %v1224_v46  ;;  %v1222_v48 = vpop.permute.xlu1 %1221 }
 0x2a7   : > { %4434 = vmatpush3.bf16.msra.mxu1 %v5230_v22 }
 0x2ab   : > { %4458 = vmatpush3.bf16.xpose.msra.mxu0 %v1234_v47 }
 0x2b2   : > { %4460 = vmatmul.mubr.msk.bf16.vlgmr.msra.gmra.mxu0 %vm859_vm1, %v1222_v48 }
 0x362   : > { %v4429_v58 = vpop.f32.mrf.mxu1  ;;  %v4445_v59 = vpop.f32.mrf.mxu0 }
 0x363   : > { %v923_v60 = vmul.f32 0.25, %v4429_v58  ;;  %v1104_v26 = vmul.f32 0.25, %v4445_v59 }
 0x364   : > { %v906_v61 = vpop.f32.mrf.mxu1  ;;  %v1087_v62 = vpop.f32.mrf.mxu0 }
 0x365   : > { %v921_v1 = vmul.f32 0.25, %v906_v61  ;;  %v927_v10 = vadd.f32 %v923_v60, %v5288_v2  ;;  %v1102_v18 = vmul.f32 0.25, %v1087_v62  ;;  %v1108_v35 = vadd.f32 %v1104_v26, %v5288_v2 }
 0x366   : > { %v4430_v3 = vpop.f32.mrf.mxu1  ;;  %v4446_v4 = vpop.f32.mrf.mxu0 }
 0x367   : > { %v5291_v5 = vadd.f32 %v921_v1, %v5286_v0  ;;  %v924_v12 = vmul.f32 0.25, %v4430_v3  ;;  %v1105_v20 = vmul.f32 0.25, %v4446_v4  ;;  %v936_v21 = vsel %vm929_vm14, %v927_v10, -inf }
 0x368   : > { %v909_v6 = vpop.f32.mrf.mxu1  ;;  %v1090_v8 = vpop.f32.mrf.mxu0  ;;  %v5311_v30 = vadd.f32 %v1102_v18, %v5286_v0  ;;  %v1116_v42 = vsel %vm929_vm14, %v1108_v35, -inf }
 0x369   : > { %v922_v13 = vmul.f32 0.25, %v909_v6  ;;  %v1103_v14 = vmul.f32 0.25, %v1090_v8  ;;  %v930_v15 = vsel %vm929_vm14, %v5291_v5, -inf  ;;  %v928_v24 = vadd.f32 %v924_v12, %v5298_v16 }
 0x36a   : > { %931 = vmax.xlane.f32.xlu0 %v930_v15  ;;  %v1109_v31 = vadd.f32 %v1105_v20, %v5298_v16  ;;  %v1110_v37 = vsel %vm929_vm14, %v5311_v30, -inf }
 0x36b   : > { %v926_v17 = vadd.f32 %v922_v13, %v5294_v11  ;;  %v5305_v25 = vadd.f32 %v1103_v14, %v5294_v11  ;;  %v939_v28 = vsel %vm929_vm14, %v928_v24, -inf }
 0x36c   : > { %v1119_v38 = vsel %vm929_vm14, %v1109_v31, -inf }
 0x36d   : > { %v933_v23 = vsel %vm929_vm14, %v926_v17, -inf  ;;  %v1113_v29 = vsel %vm929_vm14, %v5305_v25, -inf }
 0x36e   : > { %937 = vmax.xlane.f32.xlu0 %v936_v21  ;;  %934 = vmax.xlane.f32.xlu1 %v933_v23 }
 0x372   : > { %940 = vmax.xlane.f32.xlu0 %v939_v28  ;;  %1114 = vmax.xlane.f32.xlu1 %v1113_v29  ;;  %v4461_v33 = vpop.f32.mrf.mxu0 }
 0x373   : > { %v1290_v43 = vmul.f32 0.25, %v4461_v33 }
 0x374   : > { %v1273_v34 = vpop.f32.mrf.mxu0 }
 0x375   : > { %v1288_v36 = vmul.f32 0.25, %v1273_v34  ;;  %v5327_v50 = vadd.f32 %v1290_v43, %v5288_v2 }
 0x376   : > { %1111 = vmax.xlane.f32.xlu0 %v1110_v37  ;;  %1120 = vmax.xlane.f32.xlu1 %v1119_v38  ;;  %v4462_v40 = vpop.f32.mrf.mxu0 }
 0x377   : > { %v1291_v44 = vmul.f32 0.25, %v4462_v40  ;;  %v5320_v46 = vadd.f32 %v1288_v36, %v5286_v0  ;;  %v1302_v52 = vsel %vm929_vm14, %v5327_v50, -inf }
 0x378   : > { %v1276_v41 = vpop.f32.mrf.mxu0 }
 0x379   : > { %v1289_v45 = vmul.f32 0.25, %v1276_v41  ;;  %v1296_v48 = vsel %vm929_vm14, %v5320_v46, -inf  ;;  %v1295_v51 = vadd.f32 %v1291_v44, %v5298_v16 }
 0x37a   : > { %1117 = vmax.xlane.f32.xlu0 %v1116_v42 }
 0x37b   : > { %v1293_v47 = vadd.f32 %v1289_v45, %v5294_v11  ;;  %v1305_v53 = vsel %vm929_vm14, %v1295_v51, -inf }
 0x37d   : > { %v1299_v49 = vsel %vm929_vm14, %v1293_v47, -inf }
 0x37e   : > { %1297 = vmax.xlane.f32.xlu0 %v1296_v48  ;;  %1300 = vmax.xlane.f32.xlu1 %v1299_v49 }
 0x382   : > { %1303 = vmax.xlane.f32.xlu0 %v1302_v52  ;;  %1306 = vmax.xlane.f32.xlu1 %v1305_v53 }
 0x393   : > { %1158 = vrot.lane.b32.xlu1 %v5230_v22, %s6165_s25 }
 0x397   : > { %1344 = vrot.lane.b32.xlu1 %v5262_v39, %s6161_s26 }
 0x3f3   : > { %v932_v54 = vpop.xlane.xlu0 %931 }
 0x3f4   : > { %v942_v6 = vsub.f32 %v5291_v5, %v932_v54 }
 0x3f6   : > { %v946_v15 = vmul.f32 1.442695, %v942_v6 }
 0x3f7   : > { %v935_v55 = vpop.xlane.xlu1 %934  ;;  %v938_v56 = vpop.xlane.xlu0 %937 }
 0x3f8   : > { %v944_v57 = vsub.f32 %v927_v10, %v938_v56  ;;  %v943_v63 = vsub.f32 %v926_v17, %v935_v55 }
 0x3fa   : > { %v950_v58 = vmul.f32 1.442695, %v944_v57  ;;  %v948_v12 = vmul.f32 1.442695, %v943_v63 }
 0x3fb   : > { %v1115_v59 = vpop.xlane.xlu1 %1114  ;;  %v941_v60 = vpop.xlane.xlu0 %940 }
 0x3fc   : > { %v945_v61 = vsub.f32 %v928_v24, %v941_v60  ;;  %4801 = vpow2.f32 %v950_v58  ;;  %v1123_v13 = vsub.f32 %v5305_v25, %v1115_v59 }
 0x3fe   : > { %v952_v62 = vmul.f32 1.442695, %v945_v61  ;;  %v1128_v20 = vmul.f32 1.442695, %v1123_v13 }
 0x3ff   : > { %v1121_v1 = vpop.xlane.xlu1 %1120  ;;  %v1112_v3 = vpop.xlane.xlu0 %1111 }
 0x400   : > { %v1125_v4 = vsub.f32 %v1109_v31, %v1121_v1  ;;  %4803 = vpow2.f32 %v952_v62 }
 0x402   : > { %v1132_v8 = vmul.f32 1.442695, %v1125_v4 }
 0x403   : > { %v1118_v14 = vpop.xlane.xlu0 %1117 }
 0x404   : > { %4805 = vpow2.f32 %v1132_v8  ;;  %v1124_v10 = vsub.f32 %v1108_v35, %v1118_v14 }
 0x405   : > { %4807 = vpow2.f32 %v948_v12 }
 0x406   : > { %v1130_v18 = vmul.f32 1.442695, %v1124_v10 }
 0x407   : > { %v1301_v21 = vpop.xlane.xlu1 %1300  ;;  %v1298_v49 = vpop.xlane.xlu0 %1297 }
 0x408   : > { %4809 = vpow2.f32 %v1130_v18  ;;  %v1309_v23 = vsub.f32 %v1293_v47, %v1301_v21  ;;  %v1308_v55 = vsub.f32 %v5320_v46, %v1298_v49 }
 0x409   : > { %v5339_v17 = vpop.eup %4801  ;;  %4811 = vpow2.f32 %v946_v15 }
 0x40a   : > { %4813 = vpow2.f32 %v1128_v20  ;;  %v960_v5 = vsel %vm929_vm14, %v5339_v17, 0.0  ;;  %v1314_v29 = vmul.f32 1.442695, %v1309_v23  ;;  %v1312_v57 = vmul.f32 1.442695, %v1308_v55 }
 0x40b   : > { %v1307_v24 = vpop.xlane.xlu1 %1306  ;;  %961 = vadd.xlane.f32.xlu0 %v960_v5  ;;  %v1304_v52 = vpop.xlane.xlu0 %1303 }
 0x40c   : > { %v1311_v26 = vsub.f32 %v1295_v51, %v1307_v24  ;;  %v1122_v51 = vsub.f32 %v5311_v30, %v1112_v3  ;;  %v1310_v54 = vsub.f32 %v5327_v50, %v1304_v52 }
 0x40d   : > { %v5343_v25 = vpop.eup %4803 }
 0x40e   : > { %v1318_v28 = vmul.f32 1.442695, %v1311_v26  ;;  %v963_v31 = vsel %vm929_vm14, %v5343_v25, 0.0  ;;  %v1126_v53 = vmul.f32 1.442695, %v1122_v51 }
 0x40f   : > { %964 = vadd.xlane.f32.xlu1 %v963_v31  ;;  %v1316_v56 = vmul.f32 1.442695, %v1310_v54  ;;  %v1159_v46 = vpop.permute.xlu1 %1158 }
 0x410   : > { %4815 = vpow2.f32 %v1318_v28 }
 0x411   : > { %v5347_v33 = vpop.eup %4805  ;;  %4817 = vpow2.f32 %v1314_v29 }
 0x412   : > { %v1143_v34 = vsel %vm929_vm14, %v5347_v33, 0.0  ;;  %v5351_v35 = vpop.eup %4807  ;;  %4819 = vpow2.f32 %v1126_v53 }
 0x413   : > { %1144 = vadd.xlane.f32.xlu1 %v1143_v34  ;;  %v957_v40 = vsel %vm929_vm14, %v5351_v35, 0.0  ;;  %4821 = vpow2.f32 %v1316_v56  ;;  %v1345_v62 = vpop.permute.xlu1 %1344 }
 0x414   : > { %4823 = vpow2.f32 %v1312_v57 }
 0x415   : > { %v5353_v36 = vpop.eup %4809 }
 0x416   : > { %v1140_v37 = vsel %vm929_vm14, %v5353_v36, 0.0  ;;  %v4812_v38 = vpop.eup %4811 }
 0x417   : > { %1141 = vadd.xlane.f32.xlu0 %v1140_v37  ;;  %v5359_v41 = vpop.eup %4813  ;;  %958 = vadd.xlane.f32.xlu1 %v957_v40  ;;  %v954_v42 = vsel %vm929_vm14, %v4812_v38, 0.0 }
 0x418   : > { %v1137_v43 = vsel %vm929_vm14, %v5359_v41, 0.0 }
 0x41b   : > { %955 = vadd.xlane.f32.xlu0 %v954_v42  ;;  %1138 = vadd.xlane.f32.xlu1 %v1137_v43 }
 0x41d   : > { %v5364_v44 = vpop.eup %4815 }
 0x41e   : > { %v1329_v45 = vsel %vm929_vm14, %v5364_v44, 0.0  ;;  %v5368_v47 = vpop.eup %4817 }
 0x41f   : > { %1330 = vadd.xlane.f32.xlu1 %v1329_v45  ;;  %v1323_v48 = vsel %vm929_vm14, %v5368_v47, 0.0  ;;  %v4820_v30 = vpop.eup %4819 }
 0x420   : > { %v1134_v58 = vsel %vm929_vm14, %v4820_v30, 0.0  ;;  %v5384_v59 = vpop.eup %4821 }
 0x421   : > { %v1326_v50 = vsel %vm929_vm14, %v5384_v59, 0.0  ;;  %v5388_v60 = vpop.eup %4823 }
 0x422   : > { %v1320_v61 = vsel %vm929_vm14, %v5388_v60, 0.0 }
 0x423   : > { %1324 = vadd.xlane.f32.xlu1 %v1323_v48 }
 0x431   : > { %1160 = vrot.lane.b32.xlu0 %v5262_v39, %s6165_s25 }
 0x434   : > { %1342 = vrot.lane.b32.xlu1 %v5230_v22, %s6161_s26  ;;  %s6175_s26 = smov 32  }
 0x438   : > { %1407 = vrot.lane.b32.xlu1 %v5228_v19, %s6159_s27 }
 0x43c   : > { %1405 = vrot.lane.b32.xlu1 %v5234_v27, %s6157_s28 }
 0x450   : > { %1135 = vadd.xlane.f32.xlu0 %v1134_v58 }
 0x454   : > { %1327 = vadd.xlane.f32.xlu0 %v1326_v50 }
 0x458   : > { %1321 = vadd.xlane.f32.xlu0 %v1320_v61 }
 0x46e   : > { %1409 = vrot.lane.b32.xlu0 %v5234_v27, %s6159_s27 }
 0x472   : > { %1403 = vrot.lane.b32.xlu0 %v5228_v19, %s6157_s28 }
 0x494   : > { %v962_v1 = vpop.xlane.xlu0 %961 }
 0x498   : > { %v965_v63 = vpop.xlane.xlu1 %964 }
 0x499   : > { %4825 = vrcp.f32 %v965_v63 }
 0x49c   : > { %v1145_v3 = vpop.xlane.xlu1 %1144 }
 0x4a0   : > { %v1142_v4 = vpop.xlane.xlu0 %1141  ;;  %v959_v6 = vpop.xlane.xlu1 %958 }
 0x4a1   : > { %4827 = vrcp.f32 %v959_v6 }
 0x4a2   : > { %4829 = vrcp.f32 %v962_v1 }
 0x4a4   : > { %v956_v8 = vpop.xlane.xlu0 %955  ;;  %v1139_v24 = vpop.xlane.xlu1 %1138 }
 0x4a5   : > { %4831 = vrcp.f32 %v956_v8 }
 0x4a6   : > { %v4826_v13 = vpop.eup %4825  ;;  %4833 = vrcp.f32 %v1142_v4 }
 0x4a7   : > { %v973_v19 = vmul.f32 %v4826_v13, %v5343_v25  ;;  %4835 = vrcp.f32 %v1139_v24 }
 0x4a8   : > { %v1161_v12 = vpop.permute.xlu0 %1160  ;;  %v1331_v5 = vpop.xlane.xlu1 %1330  ;;  %4837 = vrcp.f32 %v1145_v3 }
 0x4a9   : > { %4447 = vmatprep.subr.bf16.mxu1 %v1161_v12 }
 0x4ac   : > { %v1325_v25 = vpop.xlane.xlu1 %1324 }
 0x4ae   : > { %v4828_v14 = vpop.eup %4827 }
 0x4af   : > { %v4830_v27 = vpop.eup %4829  ;;  %v971_v18 = vmul.f32 %v4828_v14, %v5351_v35 }
 0x4b0   : > { %v972_v20 = vmul.f32 %v4830_v27, %v5339_v17  ;;  %v1343_v52 = vpop.permute.xlu1 %1342 }
 0x4b2   : > { %v4832_v10 = vpop.eup %4831  ;;  %v975_v23 = vpack.c.bf16 %v973_v19, %v972_v20 }
 0x4b3   : > { %v970_v15 = vmul.f32 %v4832_v10, %v4812_v38  ;;  %v4834_v29 = vpop.eup %4833 }
 0x4b4   : > { %v4836_v31 = vpop.eup %4835  ;;  %v1152_v37 = vmul.f32 %v4834_v29, %v5353_v36  ;;  %v1408_v50 = vpop.permute.xlu1 %1407 }
 0x4b5   : > { %v974_v21 = vpack.c.bf16 %v971_v18, %v970_v15  ;;  %v4838_v34 = vpop.eup %4837  ;;  %v1151_v40 = vmul.f32 %v4836_v31, %v5359_v41 }
 0x4b6   : > { %v1153_v42 = vmul.f32 %v4838_v34, %v5347_v33 }
 0x4b7   : > { %4435 = vmatprep.mubr.msk.bf16.mxu1 %vm929_vm14, %v974_v21 }
 0x4b8   : > { %4436 = vmatmul.mubr.msk.bf16.vlgmr.msra.gmra.mxu1 %vm929_vm14, %v975_v23  ;;  %v1155_v45 = vpack.c.bf16 %v1153_v42, %v1152_v37 }
 0x4b9   : > { %4448 = vmatpush3.bf16.msra.mxu1 %v1161_v12 }
 0x4ba   : > { %4449 = vmatprep.subr.bf16.mxu1 %v1159_v46 }
 0x4bd   : > { %4450 = vmatpush3.bf16.msra.mxu1 %v1159_v46 }
 0x4be   : > { %4463 = vmatprep.subr.bf16.mxu1 %v1345_v62 }
 0x4d9   : > { %v1136_v26 = vpop.xlane.xlu0 %1135 }
 0x4da   : > { %4839 = vrcp.f32 %v1136_v26 }
 0x4dd   : > { %v1328_v28 = vpop.xlane.xlu0 %1327 }
 0x4de   : > { %4841 = vrcp.f32 %v1328_v28 }
 0x4df   : > { %4843 = vrcp.f32 %v1325_v25 }
 0x4e0   : > { %4845 = vrcp.f32 %v1331_v5 }
 0x4e1   : > { %v1322_v17 = vpop.xlane.xlu0 %1321 }
 0x4e2   : > { %4847 = vrcp.f32 %v1322_v17 }
 0x4e5   : > { %v1410_v54 = vpop.permute.xlu0 %1409 }
 0x4e6   : > { %v1421_v58 = vsel %vm859_vm1, %v1410_v54, 0 }
 0x4e7   : > { %v4840_v35 = vpop.eup %4839 }
 0x4e8   : > { %v1150_v38 = vmul.f32 %v4840_v35, %v4820_v30 }
 0x4e9   : > { %v1404_v30 = vpop.permute.xlu0 %1403 }
 0x4ea   : > { %v1154_v43 = vpack.c.bf16 %v1151_v40, %v1150_v38 }
 0x4eb   : > { %v4842_v48 = vpop.eup %4841 }
 0x4ec   : > { %4451 = vmatprep.mubr.msk.bf16.mxu1 %vm929_vm14, %v1154_v43  ;;  %v4844_v49 = vpop.eup %4843  ;;  %v1338_v36 = vmul.f32 %v4842_v48, %v5384_v59 }
 0x4ed   : > { %4452 = vmatmul.mubr.msk.bf16.vlgmr.msra.gmra.mxu1 %vm929_vm14, %v1155_v45  ;;  %v4846_v51 = vpop.eup %4845  ;;  %v1337_v33 = vmul.f32 %v4844_v49, %v5368_v47  ;;  %v1406_v47 = vpop.permute.xlu1 %1405 }
 0x4ee   : > { %4464 = vmatpush3.bf16.msra.mxu1 %v1345_v62  ;;  %v1339_v55 = vmul.f32 %v4846_v51, %v5364_v44  ;;  %v1418_v44 = vsel %vm859_vm1, %v1408_v50, 0 }
 0x4ef   : > { %v4848_v53 = vpop.eup %4847  ;;  %4465 = vmatprep.subr.bf16.mxu1 %v1343_v52 }
 0x4f0   : > { %v1336_v41 = vmul.f32 %v4848_v53, %v5388_v60  ;;  %v1341_v57 = vpack.c.bf16 %v1339_v55, %v1338_v36 }
 0x4f2   : > { %4466 = vmatpush3.bf16.msra.mxu1 %v1343_v52  ;;  %v1340_v56 = vpack.c.bf16 %v1337_v33, %v1336_v41 }
 0x4f3   : > { %4616 = vmatprep.subr.msk.bf16.mxu1 %vm859_vm1, %v1410_v54 }
 0x4f4   : > { %4467 = vmatprep.mubr.msk.bf16.mxu1 %vm929_vm14, %v1340_v56 }
 0x4f5   : > { %4468 = vmatmul.mubr.msk.bf16.vlgmr.msra.gmra.mxu1 %vm929_vm14, %v1341_v57 }
 0x4f6   : > { %4472 = vmatpush3.bf16.xpose.msra.mxu1 %v1421_v58  ;;  %4475 = vmatprep.mubr.msk.bf16.mxu1 %vm859_vm1, %v1404_v30 }
 0x4f7   : > { %4617 = vmatprep.subr.msk.bf16.mxu1 %vm859_vm1, %v1408_v50 }
 0x4fe   : > { %4474 = vmatpush3.bf16.xpose.msra.mxu1 %v1418_v44 }
 0x505   : > { %4476 = vmatmul.mubr.msk.bf16.vlgmr.msra.gmra.mxu1 %vm859_vm1, %v1406_v47 }
 0x506   : > { %1926 = vmatprep.mubr.bf16.mxu1 %v5033_v32 }
 0x578   : > { %v5419_v59 = vpop.f32.mrf.mxu1 }
 0x57a   : > { %v5421_v60 = vpop.f32.mrf.mxu1 }
 0x57c   : > { %v5423_v61 = vpop.f32.mrf.mxu1 }
 0x57e   : > { %v5425_v46 = vpop.f32.mrf.mxu1 }
 0x5ad   : > { %v5427_v62 = vpop.f32.mrf.mxu1 }
 0x5af   : > { %v1204_v63 = vpop.f32.mrf.mxu1 }
 0x5b1   : > { %v4454_v1 = vpop.f32.mrf.mxu1 }
 0x5b2   : > { %v4650_v3 = vpack.i.bf16 %v4454_v1, %v5427_v62 }
 0x5b3   : > { %v1207_v4 = vpop.f32.mrf.mxu1 }
 0x5b4   : > { %v4645_v6 = vpack.i.bf16 %v1207_v4, %v1204_v63 }
 0x5b5   : > { %v4469_v8 = vpop.f32.mrf.mxu1 }
 0x5b7   : > { %v1388_v12 = vpop.f32.mrf.mxu1 }
 0x5b9   : > { %v4470_v13 = vpop.f32.mrf.mxu1 }
 0x5ba   : > { %v4660_v14 = vpack.i.bf16 %v4470_v13, %v4469_v8 }
 0x5bb   : > { %v1391_v27 = vpop.f32.mrf.mxu1 }
 0x5bc   : > { %v4655_v10 = vpack.i.bf16 %v1391_v27, %v1388_v12 }
 0x5c5   : > { %v4477_v19 = vpop.f32.mrf.mxu1 }
 0x5c6   : > { %v1474_v18 = vmul.f32 0.25, %v4477_v19  ;;  %v4718_v19 = vld [vmem:[%s6141_s6 + $0x10] sm:$0xff]  }
 0x5c7   : > { %v1457_v15 = vpop.f32.mrf.mxu1 }
 0x5c8   : > { %v1472_v20 = vmul.f32 0.25, %v1457_v15  ;;  %v1478_v28 = vadd.f32 %v1474_v18, %v5288_v2  ;;  %v4719_v15 = vld [vmem:[%s6141_s6 + $0x8] sm:$0xff]   ;;  %v4720_v18 = vld [vmem:[%s6141_s6] sm:$0xff]  }
 0x5c9   : > { %v4478_v21 = vpop.f32.mrf.mxu1 }
 0x5ca   : > { %v1476_v23 = vadd.f32 %v1472_v20, %v5286_v0  ;;  %v1475_v5 = vmul.f32 0.25, %v4478_v21  ;;  %v1486_v29 = vsel %vm929_vm14, %v1478_v28, -inf }
 0x5cb   : > { %v1460_v24 = vpop.f32.mrf.mxu1 }
 0x5cc   : > { %v1473_v26 = vmul.f32 0.25, %v1460_v24  ;;  %v1480_v25 = vsel %vm929_vm14, %v1476_v23, -inf  ;;  %v1479_v34 = vadd.f32 %v1475_v5, %v5298_v16 }
 0x5cd   : > { %1481 = vmax.xlane.f32.xlu0 %v1480_v25 }
 0x5ce   : > { %v1477_v17 = vadd.f32 %v1473_v26, %v5294_v11  ;;  %v1489_v35 = vsel %vm929_vm14, %v1479_v34, -inf }
 0x5d0   : > { %v1483_v31 = vsel %vm929_vm14, %v1477_v17, -inf }
 0x5d1   : > { %1487 = vmax.xlane.f32.xlu0 %v1486_v29  ;;  %1484 = vmax.xlane.f32.xlu1 %v1483_v31 }
 0x5d5   : > { %1490 = vmax.xlane.f32.xlu0 %v1489_v35 }
 0x656   : > { %v1482_v37 = vpop.xlane.xlu0 %1481 }
 0x657   : > { %v1492_v38 = vsub.f32 %v1476_v23, %v1482_v37 }
 0x659   : > { %v1496_v45 = vmul.f32 1.442695, %v1492_v38 }
 0x65a   : > { %v1488_v40 = vpop.xlane.xlu0 %1487  ;;  %v1485_v42 = vpop.xlane.xlu1 %1484 }
 0x65b   : > { %v1494_v43 = vsub.f32 %v1478_v28, %v1488_v40  ;;  %v1493_v49 = vsub.f32 %v1477_v17, %v1485_v42 }
 0x65d   : > { %v1500_v48 = vmul.f32 1.442695, %v1494_v43  ;;  %v1498_v53 = vmul.f32 1.442695, %v1493_v49 }
 0x65e   : > { %v1491_v51 = vpop.xlane.xlu0 %1490 }
 0x65f   : > { %4849 = vpow2.f32 %v1500_v48  ;;  %v1495_v52 = vsub.f32 %v1479_v34, %v1491_v51 }
 0x660   : > { %4851 = vpow2.f32 %v1496_v45 }
 0x661   : > { %v1502_v54 = vmul.f32 1.442695, %v1495_v52 }
 0x663   : > { %4853 = vpow2.f32 %v1502_v54 }
 0x664   : > { %4855 = vpow2.f32 %v1498_v53 }
 0x66c   : > { %v4850_v36 = vpop.eup %4849 }
 0x66d   : > { %v1510_v41 = vsel %vm929_vm14, %v4850_v36, 0.0  ;;  %v4852_v33 = vpop.eup %4851 }
 0x66e   : > { %1511 = vadd.xlane.f32.xlu0 %v1510_v41  ;;  %v1504_v56 = vsel %vm929_vm14, %v4852_v33, 0.0 }
 0x670   : > { %v4854_v55 = vpop.eup %4853 }
 0x671   : > { %v1513_v57 = vsel %vm929_vm14, %v4854_v55, 0.0  ;;  %v4856_v30 = vpop.eup %4855 }
 0x672   : > { %1505 = vadd.xlane.f32.xlu0 %v1504_v56  ;;  %1514 = vadd.xlane.f32.xlu1 %v1513_v57  ;;  %v1507_v58 = vsel %vm929_vm14, %v4856_v30, 0.0 }
 0x676   : > { %1508 = vadd.xlane.f32.xlu1 %v1507_v58 }
 0x687   : > { %1526 = vrot.lane.b32.xlu1 %v5230_v22, %s6157_s28 }
 0x688   : > { %1528 = vrot.lane.b32.xlu0 %v5262_v39, %s6157_s28 }
 0x68b   : > { %4646 = vrot.lane.b32.xlu1 %v4645_v6, %s6159_s27 }
 0x68c   : > { %4656 = vrot.lane.b32.xlu0 %v4655_v10, %s6163_s3  ;;  %v4717_v10 = vld [vmem:[%s6141_s6 + $0x18] sm:$0xff]  }
 0x68f   : > { %4651 = vrot.lane.b32.xlu1 %v4650_v3, %s6159_s27  ;;  %s6178_s27 = smov 80  }
 0x693   : > { %4661 = vrot.lane.b32.xlu1 %v4660_v14, %s6163_s3  ;;  %s6174_s3 = smov 112  }
 0x6f7   : > { %v1512_v50 = vpop.xlane.xlu0 %1511 }
 0x6fb   : > { %v1506_v44 = vpop.xlane.xlu0 %1505  ;;  %v1515_v47 = vpop.xlane.xlu1 %1514 }
 0x6fc   : > { %4857 = vrcp.f32 %v1515_v47 }
 0x6fd   : > { %4859 = vrcp.f32 %v1506_v44 }
 0x6fe   : > { %4861 = vrcp.f32 %v1512_v50 }
 0x6ff   : > { %v1529_v62 = vpop.permute.xlu0 %1528  ;;  %v1509_v63 = vpop.xlane.xlu1 %1508 }
 0x700   : > { %4863 = vrcp.f32 %v1509_v63  ;;  %4479 = vmatprep.subr.bf16.mxu0 %v1529_v62 }
 0x701   : > { %4480 = vmatpush3.bf16.msra.mxu0 %v1529_v62  ;;  %v5021_v62 = vld [vmem:[%s5161_s24 + $0x10] sm:$0xff] }
 0x703   : > { %v1527_v22 = vpop.permute.xlu1 %1526  ;;  %v4657_v34 = vpop.permute.xlu0 %4656 }
 0x704   : > { %4481 = vmatprep.subr.bf16.mxu0 %v1527_v22  ;;  %v4659_v51 = vunpack.i.h.bf16 %v4657_v34  ;;  %v4658_v52 = vunpack.i.l.bf16 %v4657_v34 }
 0x705   : > { %4482 = vmatpush3.bf16.msra.mxu0 %v1527_v22  ;;  %v5022_v22 = vld [vmem:[%s5161_s24] sm:$0xff] }
 0x706   : > { %4487 = vmatprep.subr.bf16.mxu0 %v4717_v10 }
 0x707   : > { %v4647_v25 = vpop.permute.xlu1 %4646 }
 0x708   : > { %v4649_v17 = vunpack.i.h.bf16 %v4647_v25  ;;  %v4648_v31 = vunpack.i.l.bf16 %v4647_v25 }
 0x709   : > { %v4858_v39 = vpop.eup %4857 }
 0x70a   : > { %v4860_v1 = vpop.eup %4859  ;;  %v1523_v6 = vmul.f32 %v4858_v39, %v4854_v55  ;;  %v1636_v42 = vsel %vm859_vm1, %v5425_v46, %v4649_v17  ;;  %v1635_v45 = vsel %vm859_vm1, %v5421_v60, %v4648_v31 }
 0x70b   : > { %v4862_v4 = vpop.eup %4861  ;;  %v1520_v8 = vmul.f32 %v4860_v1, %v4852_v33  ;;  %v4652_v28 = vpop.permute.xlu1 %4651  ;;  %v1639_v57 = vsel %vm929_vm14, %v1635_v45, %v4658_v52  ;;  %v4109_v1 = vld [vmem:[%s6142_s7] ss:$0 sm:$0xff]  ;;  %v4723_v52 = vld [vmem:[%s6145_s10 + $0x34] ss:$8 sps:$4 sm:$0xff]  }
 0x70c   : > { %v1522_v13 = vmul.f32 %v4862_v4, %v4850_v36  ;;  %v4654_v35 = vunpack.i.h.bf16 %v4652_v28  ;;  %v4653_v37 = vunpack.i.l.bf16 %v4652_v28  ;;  %1902 = vmatprep.subr.bf16.mxu1 %v4723_v52  ;;  %v4746_v52 = vld [vmem:[%s6147_s12 + $0x8] sm:$0xff]  }
 0x70d   : > { %v4864_v3 = vpop.eup %4863 }
 0x70e   : > { %v1521_v12 = vmul.f32 %v4864_v3, %v4856_v30  ;;  %v1525_v27 = vpack.c.bf16 %v1523_v6, %v1522_v13  ;;  %v1638_v53 = vsel %vm859_vm1, %v5423_v61, %v4654_v35  ;;  %v1637_v54 = vsel %vm859_vm1, %v5419_v59, %v4653_v37 }
 0x70f   : > { %v4662_v29 = vpop.permute.xlu1 %4661  ;;  %v1640_v61 = vsel %vm929_vm14, %v1636_v42, %v4659_v51 }
 0x710   : > { %v1524_v14 = vpack.c.bf16 %v1521_v12, %v1520_v8  ;;  %v4664_v38 = vunpack.i.h.bf16 %v4662_v29  ;;  %v4663_v40 = vunpack.i.l.bf16 %v4662_v29  ;;  %v5023_v12 = vld [vmem:[%s5161_s24 + $0x18] sm:$0xff] }
 0x712   : > { %4483 = vmatprep.mubr.msk.bf16.mxu0 %vm929_vm14, %v1524_v14  ;;  %v1641_v41 = vsel %vm929_vm14, %v1637_v54, %v4663_v40  ;;  %v1642_v46 = vsel %vm929_vm14, %v1638_v53, %v4664_v38  ;;  %v5024_v14 = vld [vmem:[%s5161_s24 + $0x8] sm:$0xff]  ;;  %v4721_v53 = vld [vmem:[%s6145_s10 + $0x30] ss:$8 sps:$4 sm:$0xff]   ;;  %s6176_s24 = smov 96  }
 0x713   : > { %4484 = vmatmul.mubr.msk.bf16.vlgmr.msra.gmra.mxu0 %vm929_vm14, %v1525_v27  ;;  %1903 = vmatpush1.bf16.msra.mxu1 %v4721_v53  ;;  %v4726_v54 = vld [vmem:[%s6145_s10 + $0x24] ss:$8 sps:$4 sm:$0xff]  }
 0x714   : > { %4488 = vmatpush3.bf16.msra.mxu0 %v4717_v10  ;;  %1904 = vmatprep.subr.bf16.mxu1 %v4726_v54  ;;  %v4747_v53 = vld [vmem:[%s6147_s12 + $0x40] sm:$0xff]  }
 0x715   : > { %4489 = vmatprep.subr.bf16.mxu0 %v4718_v19  ;;  %v4748_v54 = vld [vmem:[%s6147_s12] sm:$0xff]  }
 0x718   : > { %4490 = vmatpush3.bf16.msra.mxu0 %v4718_v19 }
 0x719   : > { %4491 = vmatprep.subr.bf16.mxu0 %v4719_v15 }
 0x71c   : > { %4492 = vmatpush3.bf16.msra.mxu0 %v4719_v15 }
 0x71d   : > { %4493 = vmatprep.subr.bf16.mxu0 %v4720_v18 }
 0x720   : > { %4494 = vmatpush3.bf16.msra.mxu0 %v4720_v18 }
 0x7d3   : > { %v4485_v20 = vpop.f32.mrf.mxu0 }
 0x7d5   : > { %v1572_v21 = vpop.f32.mrf.mxu0 }
 0x7d7   : > { %v4486_v23 = vpop.f32.mrf.mxu0 }
 0x7d8   : > { %v4670_v24 = vpack.i.bf16 %v4486_v23, %v4485_v20 }
 0x7d9   : > { %v1575_v5 = vpop.f32.mrf.mxu0 }
 0x7da   : > { %v4665_v26 = vpack.i.bf16 %v1575_v5, %v1572_v21  ;;  %4671 = vrot.lane.b32.xlu1 %v4670_v24, %s5034_s2 }
 0x7dc   : > { %4666 = vrot.lane.b32.xlu0 %v4665_v26, %s5034_s2 }
 0x84c   : > { %v4672_v43 = vpop.permute.xlu1 %4671 }
 0x84d   : > { %v4674_v48 = vunpack.i.h.bf16 %v4672_v43  ;;  %v4673_v49 = vunpack.i.l.bf16 %v4672_v43 }
 0x84e   : > { %v4667_v36 = vpop.permute.xlu0 %4666 }
 0x84f   : > { %v4669_v33 = vunpack.i.h.bf16 %v4667_v36  ;;  %v4668_v60 = vunpack.i.l.bf16 %v4667_v36  ;;  %v1646_v55 = vsel %vm1643_vm15, %v1641_v41, %v4673_v49  ;;  %v1647_v56 = vsel %vm1643_vm15, %v1642_v46, %v4674_v48  ;;  %v4724_v36 = vld [vmem:[%s6145_s10 + $0x20] ss:$8 sps:$4 sm:$0xff]   ;;  %v4729_v41 = vld [vmem:[%s6145_s10 + $0x14] ss:$8 sps:$4 sm:$0xff]   ;;  %v4727_v46 = vld [vmem:[%s6145_s10 + $0x10] ss:$8 sps:$4 sm:$0xff]  }
 0x850   : > { %v1649_v50 = vpack.c.bf16 %v1647_v56, %v1646_v55  ;;  %1905 = vmatpush1.bf16.msra.mxu1 %v4724_v36  ;;  %v1836_v36 = vld [vmem:[%s6146_s11] sm:$0x3] }
 0x851   : > { %v1644_v30 = vsel %vm1643_vm15, %v1639_v57, %v4668_v60  ;;  %v1645_v59 = vsel %vm1643_vm15, %v1640_v61, %v4669_v33  ;;  %1906 = vmatprep.subr.bf16.mxu1 %v4729_v41  ;;  %v4732_v33 = vld [vmem:[%s6145_s10 + $0x4] ss:$8 sps:$4 sm:$0xff]   ;;  %v4730_v60 = vld [vmem:[%s6145_s10] ss:$8 sps:$4 sm:$0xff]   ;;  %v1841_v41 = vrot.slane %v1836_v36, %v5218_v7 }
 0x852   : > { %v1648_v58 = vpack.c.bf16 %v1645_v59, %v1644_v30 }
 0x854   : > { %4495 = vmatprep.mubr.msk.bf16.mxu0 %vm656_vm0, %v1648_v58  ;;  %1907 = vmatpush1.bf16.msra.mxu1 %v4727_v46  ;;  %v1845_v46 = vrot.slane %v1836_v36, %v5224_v9 }
 0x855   : > { %4496 = vmatmul.mubr.msk.bf16.vlgmr.msra.gmra.mxu0 %vm656_vm0, %v1649_v50  ;;  %1908 = vmatprep.subr.bf16.mxu1 %v4732_v33 }
 0x858   : > { %1909 = vmatpush1.bf16.msra.mxu1 %v4730_v60 }
 0x915   : > { %v4497_v44 = vpop.f32.mrf.mxu0 }
 0x916   : > { %v1739_v63 = vadd.f32 %v5021_v62, %v4497_v44 }
 0x917   : > { %v1722_v47 = vpop.f32.mrf.mxu0 }
 0x918   : > { %v1737_v39 = vadd.f32 %v5022_v22, %v1722_v47  ;;  %v5491_v8 = vadd.f32 %v4109_v1, %v1739_v63 }
 0x919   : > { %v4498_v4 = vpop.f32.mrf.mxu0 }
 0x91a   : > { %v5489_v3 = vadd.f32 %v4109_v1, %v1737_v39  ;;  %v1740_v13 = vadd.f32 %v5023_v12, %v4498_v4  ;;  %v1760_v18 = vsel %vm656_vm0, %v5491_v8, 0.0 }
 0x91b   : > { %v1725_v6 = vpop.f32.mrf.mxu0 }
 0x91c   : > { %v1738_v27 = vadd.f32 %v5024_v14, %v1725_v6  ;;  %v1754_v10 = vsel %vm656_vm0, %v5489_v3, 0.0  ;;  %v5499_v15 = vadd.f32 %v4109_v1, %v1740_v13  ;;  %v4111_v14 = vld [vmem:[%s6144_s9] ss:$0 sm:$0xff] }
 0x91d   : > { %1755 = vadd.xlane.f32.xlu0 %v1754_v10 }
 0x91e   : > { %v5497_v19 = vadd.f32 %v4109_v1, %v1738_v27  ;;  %v1763_v21 = vsel %vm656_vm0, %v5499_v15, 0.0  ;;  %v4110_v1 = vld [vmem:[%s6143_s8] ss:$0 sm:$0xff] }
 0x920   : > { %v1757_v20 = vsel %vm656_vm0, %v5497_v19, 0.0 }
 0x921   : > { %1761 = vadd.xlane.f32.xlu0 %v1760_v18  ;;  %1758 = vadd.xlane.f32.xlu1 %v1757_v20 }
 0x925   : > { %1764 = vadd.xlane.f32.xlu0 %v1763_v21 }
 0x9a6   : > { %v1756_v23 = vpop.xlane.xlu0 %1755 }
 0x9a7   : > { %v1766_v24 = vmul.f32 0.015625, %v1756_v23 }
 0x9a9   : > { %v1770_v5 = vsub.f32 %v5489_v3, %v1766_v24 }
 0x9aa   : > { %v1762_v26 = vpop.xlane.xlu0 %1761  ;;  %v1759_v25 = vpop.xlane.xlu1 %1758 }
 0x9ab   : > { %v1768_v28 = vmul.f32 0.015625, %v1762_v26  ;;  %v1767_v17 = vmul.f32 0.015625, %v1759_v25  ;;  %v1774_v29 = vmul.f32 %v1770_v5, %v1770_v5 }
 0x9ad   : > { %v1772_v31 = vsub.f32 %v5491_v8, %v1768_v28  ;;  %v1771_v34 = vsub.f32 %v5497_v19, %v1767_v17  ;;  %v1778_v35 = vsel %vm656_vm0, %v1774_v29, 0.0  ;;  %v4733_v29 = vld [vmem:[%s6147_s12 + $0x78] sm:$0xff]  }
 0x9ae   : > { %1779 = vadd.xlane.f32.xlu0 %v1778_v35  ;;  %v1765_v37 = vpop.xlane.xlu0 %1764  ;;  %4313 = vmatprep.subr.bf16.mxu0 %v4733_v29  ;;  %v4736_v35 = vld [vmem:[%s6147_s12 + $0x30] sm:$0xff]  }
 0x9af   : > { %v1769_v38 = vmul.f32 0.015625, %v1765_v37  ;;  %v1776_v40 = vmul.f32 %v1772_v31, %v1772_v31  ;;  %v1775_v42 = vmul.f32 %v1771_v34, %v1771_v34  ;;  %v4737_v37 = vld [vmem:[%s6147_s12 + $0x68] sm:$0xff]  }
 0x9b1   : > { %v1773_v43 = vsub.f32 %v5499_v15, %v1769_v38  ;;  %v1784_v45 = vsel %vm656_vm0, %v1776_v40, 0.0  ;;  %v1781_v48 = vsel %vm656_vm0, %v1775_v42, 0.0  ;;  %v4738_v38 = vld [vmem:[%s6147_s12 + $0x28] sm:$0xff]   ;;  %v4739_v40 = vld [vmem:[%s6147_s12 + $0x60] sm:$0xff]  }
 0x9b2   : > { %1785 = vadd.xlane.f32.xlu0 %v1784_v45  ;;  %1782 = vadd.xlane.f32.xlu1 %v1781_v48  ;;  %v4740_v42 = vld [vmem:[%s6147_s12 + $0x20] sm:$0xff]   ;;  %v4742_v45 = vld [vmem:[%s6147_s12 + $0x18] sm:$0xff]   ;;  %v4743_v48 = vld [vmem:[%s6147_s12 + $0x50] sm:$0xff]  }
 0x9b3   : > { %v1777_v49 = vmul.f32 %v1773_v43, %v1773_v43 }
 0x9b5   : > { %v1787_v51 = vsel %vm656_vm0, %v1777_v49, 0.0  ;;  %v4744_v49 = vld [vmem:[%s6147_s12 + $0x10] sm:$0xff]  }
 0x9b6   : > { %1788 = vadd.xlane.f32.xlu1 %v1787_v51  ;;  %v4745_v51 = vld [vmem:[%s6147_s12 + $0x48] sm:$0xff]  }
 0xa37   : > { %v1780_v55 = vpop.xlane.xlu0 %1779 }
 0xa38   : > { %v1790_v56 = vmul.f32 0.015625, %v1780_v55 }
 0xa3a   : > { %v1794_v57 = vadd.f32 1e-05, %v1790_v56 }
 0xa3b   : > { %v1786_v61 = vpop.xlane.xlu0 %1785  ;;  %v1783_v30 = vpop.xlane.xlu1 %1782 }
 0xa3c   : > { %4865 = vrsqrt.f32 %v1794_v57  ;;  %v1792_v59 = vmul.f32 0.015625, %v1786_v61  ;;  %v1791_v58 = vmul.f32 0.015625, %v1783_v30 }
 0xa3e   : > { %v1795_v50 = vadd.f32 1e-05, %v1791_v58  ;;  %v1796_v44 = vadd.f32 1e-05, %v1792_v59 }
 0xa3f   : > { %v1789_v47 = vpop.xlane.xlu1 %1788 }
 0xa40   : > { %v1793_v62 = vmul.f32 0.015625, %v1789_v47  ;;  %4867 = vrsqrt.f32 %v1795_v50 }
 0xa41   : > { %4869 = vrsqrt.f32 %v1796_v44 }
 0xa42   : > { %v1797_v63 = vadd.f32 1e-05, %v1793_v62 }
 0xa44   : > { %4871 = vrsqrt.f32 %v1797_v63 }
 0xa49   : > { %v4866_v22 = vpop.eup %4865 }
 0xa4a   : > { %v1802_v39 = vmul.f32 %v4866_v22, %v1770_v5 }
 0xa4c   : > { %v1812_v12 = vmul.f32 %v4110_v1, %v1802_v39 }
 0xa4d   : > { %v4868_v4 = vpop.eup %4867 }
 0xa4e   : > { %v1803_v6 = vmul.f32 %v4868_v4, %v1771_v34  ;;  %v4870_v13 = vpop.eup %4869  ;;  %v1822_v20 = vadd.f32 %v4111_v14, %v1812_v12  ;;  %v4735_v34 = vld [vmem:[%s6147_s12 + $0x70] sm:$0xff]  }
 0xa4f   : > { %v1804_v23 = vmul.f32 %v4870_v13, %v1772_v31  ;;  %v4734_v31 = vld [vmem:[%s6147_s12 + $0x38] sm:$0xff]  }
 0xa50   : > { %v1813_v10 = vmul.f32 %v4110_v1, %v1803_v6  ;;  %4314 = vmatpush3.bf16.msra.mxu0 %v4734_v31 }
 0xa51   : > { %v4872_v27 = vpop.eup %4871  ;;  %v1814_v26 = vmul.f32 %v4110_v1, %v1804_v23  ;;  %4315 = vmatprep.subr.bf16.mxu0 %v4735_v34 }
 0xa52   : > { %v1805_v18 = vmul.f32 %v4872_v27, %v1773_v43  ;;  %v1823_v21 = vadd.f32 %v4111_v14, %v1813_v10  ;;  %v4741_v43 = vld [vmem:[%s6147_s12 + $0x58] sm:$0xff]  }
 0xa53   : > { %v1824_v28 = vadd.f32 %v4111_v14, %v1814_v26 }
 0xa54   : > { %v1826_v24 = vpack.c.bf16 %v1823_v21, %v1822_v20  ;;  %v1815_v5 = vmul.f32 %v4110_v1, %v1805_v18  ;;  %4316 = vmatpush3.bf16.msra.mxu0 %v4736_v35 }
 0xa55   : > { %4317 = vmatprep.subr.bf16.mxu0 %v4737_v37 }
 0xa56   : > { %4120 = vmatmul.mubr.msk.bf16.vlgmr.msra.gmra.mxu1 %vm656_vm0, %v1826_v24  ;;  %v1825_v25 = vadd.f32 %v4111_v14, %v1815_v5 }
 0xa57   : > { %1936 = vmatprep.mubr.bf16.mxu1 %v5033_v32 }
 0xa58   : > { %v1827_v17 = vpack.c.bf16 %v1825_v25, %v1824_v28  ;;  %4318 = vmatpush3.bf16.msra.mxu0 %v4738_v38 }
 0xa59   : > { %4319 = vmatprep.subr.bf16.mxu0 %v4739_v40 }
 0xa5c   : > { %4320 = vmatpush3.bf16.msra.mxu0 %v4740_v42 }
 0xa5d   : > { %4321 = vmatprep.subr.bf16.mxu0 %v4741_v43 }
 0xa5e   : > { %4121 = vmatmul.mubr.msk.bf16.gmra.mxu1 %vm656_vm0, %v1827_v17 }
 0xa5f   : > { %2365 = vmatprep.mubr.bf16.mxu1 %v5033_v32 }
 0xa60   : > { %4322 = vmatpush3.bf16.msra.mxu0 %v4742_v45 }
 0xa61   : > { %4323 = vmatprep.subr.bf16.mxu0 %v4743_v48 }
 0xa64   : > { %4324 = vmatpush3.bf16.msra.mxu0 %v4744_v49 }
 0xa65   : > { %4325 = vmatprep.subr.bf16.mxu0 %v4745_v51 }
 0xa68   : > { %4326 = vmatpush3.bf16.msra.mxu0 %v4746_v52 }
 0xa69   : > { %4327 = vmatprep.subr.bf16.mxu0 %v4747_v53 }
 0xa6c   : > { %4328 = vmatpush3.bf16.msra.mxu0 %v4748_v54 }
 0xb16   : > { %v1928_v33 = vpop.f32.mrf.mxu1 }
 0xb17   : > { %v5602_v60 = vadd.f32 %v1928_v33, %v1841_v41 }
 0xb18   : > { %v1930_v55 = vpop.f32.mrf.mxu1 }
 0xb19   : > { %v1947_v56 = vmul.f32 -1.702, %v5602_v60  ;;  %v5605_v57 = vadd.f32 %v1930_v55, %v1845_v46 }
 0xb1a   : > { %v1932_v61 = vpop.f32.mrf.mxu1 }
 0xb1b   : > { %v1955_v30 = vmul.f32 1.442695, %v1947_v56  ;;  %v1948_v59 = vmul.f32 -1.702, %v5605_v57  ;;  %v1933_v58 = vadd.f32 %v1932_v61, %v1841_v41 }
 0xb1c   : > { %v1934_v50 = vpop.f32.mrf.mxu1 }
 0xb1d   : > { %v1957_v44 = vmul.f32 1.442695, %v1948_v59  ;;  %v1949_v47 = vmul.f32 -1.702, %v1933_v58  ;;  %v1935_v62 = vadd.f32 %v1934_v50, %v1845_v46  ;;  %4873 = vpow2.f32 %v1955_v30 }
 0xb1e   : > { %v1938_v63 = vpop.f32.mrf.mxu1 }
 0xb1f   : > { %4875 = vpow2.f32 %v1957_v44  ;;  %v1959_v22 = vmul.f32 1.442695, %v1949_v47  ;;  %v1950_v39 = vmul.f32 -1.702, %v1935_v62  ;;  %v5608_v1 = vadd.f32 %v1938_v63, %v1841_v41 }
 0xb20   : > { %v1940_v4 = vpop.f32.mrf.mxu1 }
 0xb21   : > { %4877 = vpow2.f32 %v1959_v22  ;;  %v1961_v6 = vmul.f32 1.442695, %v1950_v39  ;;  %v1951_v12 = vmul.f32 -1.702, %v5608_v1  ;;  %v1941_v13 = vadd.f32 %v1940_v4, %v1845_v46 }
 0xb22   : > { %v1942_v14 = vpop.f32.mrf.mxu1 }
 0xb23   : > { %4879 = vpow2.f32 %v1961_v6  ;;  %v1963_v27 = vmul.f32 1.442695, %v1951_v12  ;;  %v1952_v10 = vmul.f32 -1.702, %v1941_v13  ;;  %v1943_v18 = vadd.f32 %v1942_v14, %v1841_v41 }
 0xb24   : > { %v1944_v20 = vpop.f32.mrf.mxu1 }
 0xb25   : > { %v1965_v21 = vmul.f32 1.442695, %v1952_v10  ;;  %v1953_v23 = vmul.f32 -1.702, %v1943_v18  ;;  %v1945_v24 = vadd.f32 %v1944_v20, %v1845_v46  ;;  %4881 = vpow2.f32 %v1963_v27 }
 0xb27   : > { %4883 = vpow2.f32 %v1965_v21  ;;  %v1967_v5 = vmul.f32 1.442695, %v1953_v23  ;;  %v1954_v26 = vmul.f32 -1.702, %v1945_v24 }
 0xb29   : > { %4885 = vpow2.f32 %v1967_v5  ;;  %v1969_v25 = vmul.f32 1.442695, %v1954_v26 }
 0xb2a   : > { %v4874_v28 = vpop.eup %4873 }
 0xb2b   : > { %4887 = vpow2.f32 %v1969_v25  ;;  %v1971_v34 = vadd.f32 1.0, %v4874_v28 }
 0xb2c   : > { %v4876_v17 = vpop.eup %4875 }
 0xb2d   : > { %v1972_v29 = vadd.f32 1.0, %v4876_v17 }
 0xb2e   : > { %v4878_v31 = vpop.eup %4877 }
 0xb2f   : > { %v1973_v35 = vadd.f32 1.0, %v4878_v31  ;;  %4889 = vrcp.f32 %v1972_v29 }
 0xb30   : > { %v4880_v37 = vpop.eup %4879 }
 0xb31   : > { %4891 = vrcp.f32 %v1973_v35  ;;  %v1974_v38 = vadd.f32 1.0, %v4880_v37 }
 0xb32   : > { %4893 = vrcp.f32 %v1971_v34  ;;  %v4882_v40 = vpop.eup %4881 }
 0xb33   : > { %4895 = vrcp.f32 %v1974_v38  ;;  %v1975_v48 = vadd.f32 1.0, %v4882_v40 }
 0xb34   : > { %v4884_v42 = vpop.eup %4883 }
 0xb35   : > { %v1976_v43 = vadd.f32 1.0, %v4884_v42 }
 0xb36   : > { %v4886_v45 = vpop.eup %4885 }
 0xb37   : > { %v1977_v49 = vadd.f32 1.0, %v4886_v45  ;;  %4897 = vrcp.f32 %v1976_v43 }
 0xb38   : > { %v4888_v51 = vpop.eup %4887 }
 0xb39   : > { %4899 = vrcp.f32 %v1977_v49  ;;  %v1978_v52 = vadd.f32 1.0, %v4888_v51 }
 0xb3a   : > { %4901 = vrcp.f32 %v1975_v48 }
 0xb3b   : > { %4903 = vrcp.f32 %v1978_v52 }
 0xb3c   : > { %v4890_v53 = vpop.eup %4889 }
 0xb3d   : > { %v1988_v33 = vmul.f32 %v4890_v53, %v5605_v57 }
 0xb3e   : > { %v4892_v54 = vpop.eup %4891 }
 0xb3f   : > { %v4894_v36 = vpop.eup %4893  ;;  %v1989_v46 = vmul.f32 %v4892_v54, %v1933_v58 }
 0xb40   : > { %v4896_v41 = vpop.eup %4895  ;;  %v1987_v56 = vmul.f32 %v4894_v36, %v5602_v60  ;;  %v4122_v60 = vld [vmem:[%s6148_s13] ss:$0 sm:$0xff] }
 0xb41   : > { %v1990_v55 = vmul.f32 %v4896_v41, %v1935_v62 }
 0xb42   : > { %v1995_v30 = vpack.c.bf16 %v1989_v46, %v1987_v56 }
 0xb43   : > { %v1996_v61 = vpack.c.bf16 %v1990_v55, %v1988_v33 }
 0xb44   : > { %v4898_v59 = vpop.eup %4897 }
 0xb45   : > { %2166 = vmatprep.mubr.bf16.mxu0 %v1996_v61  ;;  %v1992_v22 = vmul.f32 %v4898_v59, %v1941_v13  ;;  %v4751_v61 = vld [vmem:[%s6139_s4 + $0x74] ss:$8 sps:$4 sm:$0xff]   ;;  %v4754_v59 = vld [vmem:[%s6139_s4 + $0x64] ss:$8 sps:$4 sm:$0xff]  }
 0xb46   : > { %v4900_v50 = vpop.eup %4899  ;;  %2167 = vmatmul.mubr.bf16.vlgmr.msra.gmra.mxu0 %v1995_v30  ;;  %v4749_v30 = vld [vmem:[%s6139_s4 + $0x70] ss:$8 sps:$4 sm:$0xff]   ;;  %2341 = vmatprep.subr.bf16.mxu1 %v4751_v61 }
 0xb47   : > { %v4902_v44 = vpop.eup %4901  ;;  %v1993_v63 = vmul.f32 %v4900_v50, %v1943_v18  ;;  %2342 = vmatpush1.bf16.msra.mxu1 %v4749_v30  ;;  %v4752_v50 = vld [vmem:[%s6139_s4 + $0x60] ss:$8 sps:$4 sm:$0xff]  }
 0xb48   : > { %v4904_v47 = vpop.eup %4903  ;;  %v1991_v4 = vmul.f32 %v4902_v44, %v5608_v1  ;;  %2343 = vmatprep.subr.bf16.mxu1 %v4754_v59  ;;  %v4757_v44 = vld [vmem:[%s6139_s4 + $0x54] ss:$8 sps:$4 sm:$0xff]  }
 0xb49   : > { %v1994_v39 = vmul.f32 %v4904_v47, %v1945_v24  ;;  %v4755_v47 = vld [vmem:[%s6139_s4 + $0x50] ss:$8 sps:$4 sm:$0xff]  }
 0xb4a   : > { %v1997_v58 = vpack.c.bf16 %v1993_v63, %v1991_v4  ;;  %v4758_v63 = vld [vmem:[%s6139_s4 + $0x40] ss:$8 sps:$4 sm:$0xff]  }
 0xb4b   : > { %v1998_v6 = vpack.c.bf16 %v1994_v39, %v1992_v22  ;;  %2344 = vmatpush1.bf16.msra.mxu1 %v4752_v50  ;;  %v4760_v22 = vld [vmem:[%s6139_s4 + $0x44] ss:$8 sps:$4 sm:$0xff]  }
 0xb4c   : > { %2345 = vmatprep.subr.bf16.mxu1 %v4757_v44 }
 0xb4d   : > { %2174 = vmatprep.mubr.bf16.mxu0 %v1998_v6 }
 0xb4e   : > { %2175 = vmatmul.mubr.bf16.gmra.mxu0 %v1997_v58 }
 0xb4f   : > { %2346 = vmatpush1.bf16.msra.mxu1 %v4755_v47 }
 0xb50   : > { %2347 = vmatprep.subr.bf16.mxu1 %v4760_v22 }
 0xb53   : > { %2348 = vmatpush1.bf16.msra.mxu1 %v4758_v63 }
 0xc06   : > { %v4329_v57 = vpop.f32.mrf.mxu0 }
 0xc08   : > { %v4330_v62 = vpop.f32.mrf.mxu0 }
 0xc09   : > { %v4331_v12 = vadd.f32 %v4330_v62, %v4329_v57 }
 0xc0a   : > { %v4332_v14 = vpop.f32.mrf.mxu0 }
 0xc0b   : > { %v2169_v27 = vadd.f32 %v4331_v12, %v4122_v60 }
 0xc0c   : > { %v4333_v10 = vpop.f32.mrf.mxu0 }
 0xc0d   : > { %v5618_v18 = vadd.f32 %v2169_v27, %v5489_v3  ;;  %v4334_v13 = vadd.f32 %v4333_v10, %v4332_v14 }
 0xc0e   : > { %v4335_v20 = vpop.f32.mrf.mxu0 }
 0xc0f   : > { %v2172_v1 = vadd.f32 %v4334_v13, %v4122_v60  ;;  %v2191_v21 = vsel %vm656_vm0, %v5618_v18, 0.0 }
 0xc10   : > { %2192 = vadd.xlane.f32.xlu0 %v2191_v21  ;;  %v4336_v23 = vpop.f32.mrf.mxu0  ;;  %v4141_v21 = vld [vmem:[%s6172_s29 + $0x1] ss:$0 sm:$0xff] }
 0xc11   : > { %v5623_v24 = vadd.f32 %v2172_v1, %v5497_v19  ;;  %v4337_v5 = vadd.f32 %v4336_v23, %v4335_v20 }
 0xc12   : > { %v4338_v26 = vpop.f32.mrf.mxu0 }
 0xc13   : > { %v2177_v25 = vadd.f32 %v4337_v5, %v4122_v60  ;;  %v2194_v28 = vsel %vm656_vm0, %v5623_v24, 0.0 }
 0xc14   : > { %2195 = vadd.xlane.f32.xlu1 %v2194_v28  ;;  %v4339_v3 = vpop.f32.mrf.mxu0 }
 0xc15   : > { %v5628_v17 = vadd.f32 %v2177_v25, %v5491_v8  ;;  %v4340_v29 = vadd.f32 %v4339_v3, %v4338_v26  ;;  %v4142_v25 = vld [vmem:[%s6173_s1 + $0x1] ss:$0 sm:$0xff] }
 0xc17   : > { %v2180_v31 = vadd.f32 %v4340_v29, %v4122_v60  ;;  %v2197_v34 = vsel %vm656_vm0, %v5628_v17, 0.0 }
 0xc18   : > { %2198 = vadd.xlane.f32.xlu0 %v2197_v34 }
 0xc19   : > { %v5633_v19 = vadd.f32 %v2180_v31, %v5499_v15 }
 0xc1b   : > { %v2200_v35 = vsel %vm656_vm0, %v5633_v19, 0.0 }
 0xc1c   : > { %2201 = vadd.xlane.f32.xlu1 %v2200_v35 }
 0xc99   : > { %v2193_v37 = vpop.xlane.xlu0 %2192 }
 0xc9a   : > { %v2203_v38 = vmul.f32 0.015625, %v2193_v37 }
 0xc9c   : > { %v2207_v40 = vsub.f32 %v5618_v18, %v2203_v38 }
 0xc9d   : > { %v2196_v42 = vpop.xlane.xlu1 %2195 }
 0xc9e   : > { %v2204_v8 = vmul.f32 0.015625, %v2196_v42  ;;  %v2211_v43 = vmul.f32 %v2207_v40, %v2207_v40 }
 0xca0   : > { %v2208_v45 = vsub.f32 %v5623_v24, %v2204_v8  ;;  %v2215_v48 = vsel %vm656_vm0, %v2211_v43, 0.0 }
 0xca1   : > { %2216 = vadd.xlane.f32.xlu0 %v2215_v48  ;;  %v2199_v49 = vpop.xlane.xlu0 %2198  ;;  %v4151_v48 = vld [vmem:[%s6140_s5 + $0x2] sm:$0x3] }
 0xca2   : > { %v2205_v51 = vmul.f32 0.015625, %v2199_v49  ;;  %v2212_v15 = vmul.f32 %v2208_v45, %v2208_v45 }
 0xca4   : > { %v2209_v52 = vsub.f32 %v5628_v17, %v2205_v51  ;;  %v2218_v53 = vsel %vm656_vm0, %v2212_v15, 0.0  ;;  %v2280_v51 = vrot.slane %v4151_v48, %v5218_v7 }
 0xca5   : > { %2219 = vadd.xlane.f32.xlu1 %v2218_v53  ;;  %v2202_v54 = vpop.xlane.xlu1 %2201 }
 0xca6   : > { %v2206_v36 = vmul.f32 0.015625, %v2202_v54  ;;  %v2213_v41 = vmul.f32 %v2209_v52, %v2209_v52 }
 0xca8   : > { %v2210_v46 = vsub.f32 %v5633_v19, %v2206_v36  ;;  %v2221_v33 = vsel %vm656_vm0, %v2213_v41, 0.0 }
 0xca9   : > { %2222 = vadd.xlane.f32.xlu0 %v2221_v33 }
 0xcaa   : > { %v2214_v55 = vmul.f32 %v2210_v46, %v2210_v46 }
 0xcac   : > { %v2224_v56 = vsel %vm656_vm0, %v2214_v55, 0.0 }
 0xcad   : > { %2225 = vadd.xlane.f32.xlu1 %v2224_v56 }
 0xd2a   : > { %v2217_v39 = vpop.xlane.xlu0 %2216 }
 0xd2b   : > { %v2227_v4 = vmul.f32 0.015625, %v2217_v39 }
 0xd2d   : > { %v2231_v6 = vadd.f32 1e-05, %v2227_v4 }
 0xd2e   : > { %v2220_v58 = vpop.xlane.xlu1 %2219 }
 0xd2f   : > { %4905 = vrsqrt.f32 %v2231_v6  ;;  %v2228_v57 = vmul.f32 0.015625, %v2220_v58 }
 0xd31   : > { %v2232_v60 = vadd.f32 1e-05, %v2228_v57 }
 0xd32   : > { %v2223_v62 = vpop.xlane.xlu0 %2222 }
 0xd33   : > { %4907 = vrsqrt.f32 %v2232_v60  ;;  %v2229_v12 = vmul.f32 0.015625, %v2223_v62 }
 0xd35   : > { %v2233_v14 = vadd.f32 1e-05, %v2229_v12 }
 0xd36   : > { %v2226_v27 = vpop.xlane.xlu1 %2225 }
 0xd37   : > { %4909 = vrsqrt.f32 %v2233_v14  ;;  %v2230_v10 = vmul.f32 0.015625, %v2226_v27 }
 0xd39   : > { %v2234_v13 = vadd.f32 1e-05, %v2230_v10 }
 0xd3b   : > { %4911 = vrsqrt.f32 %v2234_v13 }
 0xd3c   : > { %v4906_v20 = vpop.eup %4905 }
 0xd3d   : > { %v2239_v1 = vmul.f32 %v4906_v20, %v2207_v40 }
 0xd3f   : > { %v2249_v5 = vmul.f32 %v4141_v21, %v2239_v1 }
 0xd40   : > { %v4908_v23 = vpop.eup %4907 }
 0xd41   : > { %v2240_v26 = vmul.f32 %v4908_v23, %v2208_v45  ;;  %v2259_v29 = vadd.f32 %v4142_v25, %v2249_v5 }
 0xd43   : > { %v2250_v28 = vmul.f32 %v4141_v21, %v2240_v26 }
 0xd44   : > { %v4910_v3 = vpop.eup %4909 }
 0xd45   : > { %v2260_v31 = vadd.f32 %v4142_v25, %v2250_v28  ;;  %v2241_v34 = vmul.f32 %v4910_v3, %v2209_v52  ;;  %v2284_v52 = vrot.slane %v4151_v48, %v5224_v9 }
 0xd47   : > { %v2263_v35 = vpack.c.bf16 %v2260_v31, %v2259_v29  ;;  %v2251_v40 = vmul.f32 %v4141_v21, %v2241_v34 }
 0xd48   : > { %v4912_v37 = vpop.eup %4911 }
 0xd49   : > { %4160 = vmatmul.mubr.msk.bf16.vlgmr.msra.gmra.mxu1 %vm656_vm0, %v2263_v35  ;;  %v2242_v38 = vmul.f32 %v4912_v37, %v2210_v46  ;;  %v2261_v8 = vadd.f32 %v4142_v25, %v2251_v40 }
 0xd4a   : > { %2375 = vmatprep.mubr.bf16.mxu1 %v5033_v32 }
 0xd4b   : > { %v2252_v42 = vmul.f32 %v4141_v21, %v2242_v38 }
 0xd4d   : > { %v2262_v43 = vadd.f32 %v4142_v25, %v2252_v42 }
 0xd4f   : > { %v2264_v45 = vpack.c.bf16 %v2262_v43, %v2261_v8 }
 0xd51   : > { %4161 = vmatmul.mubr.msk.bf16.gmra.mxu1 %vm656_vm0, %v2264_v45 }
 0xe09   : > { %v2367_v49 = vpop.f32.mrf.mxu1 }
 0xe0a   : > { %v2368_v54 = vadd.f32 %v2367_v49, %v2280_v51 }
 0xe0b   : > { %v2369_v15 = vpop.f32.mrf.mxu1 }
 0xe0c   : > { %v2370_v46 = vadd.f32 %v2369_v15, %v2284_v52 }
 0xe0d   : > { %v2371_v53 = vpop.f32.mrf.mxu1 }
 0xe0e   : > { %v2372_v36 = vadd.f32 %v2371_v53, %v2280_v51 }
 0xe0f   : > { %v2373_v41 = vpop.f32.mrf.mxu1 }
 0xe10   : > { %v5683_v33 = vpack.c.bf16 %v2372_v36, %v2368_v54  ;;  %v2374_v55 = vadd.f32 %v2373_v41, %v2284_v52 }
 0xe11   : > { %v2377_v56 = vpop.f32.mrf.mxu1 }
 0xe12   : > { %v5685_v61 = vpack.c.bf16 %v2374_v55, %v2370_v46  ;;  %4503 = vmatprep.mubr.msk.bf16.mxu1 %vm859_vm1, %v5683_v33  ;;  %v2378_v50 = vadd.f32 %v2377_v56, %v2280_v51 }
 0xe13   : > { %v2379_v30 = vpop.f32.mrf.mxu1 }
 0xe14   : > { %v2380_v62 = vadd.f32 %v2379_v30, %v2284_v52 }
 0xe15   : > { %v2381_v59 = vpop.f32.mrf.mxu1 }
 0xe16   : > { %v2382_v44 = vadd.f32 %v2381_v59, %v2280_v51 }
 0xe17   : > { %v2383_v6 = vpop.f32.mrf.mxu1 }
 0xe18   : > { %v5689_v47 = vpack.c.bf16 %v2382_v44, %v2378_v50  ;;  %v2384_v60 = vadd.f32 %v2383_v6, %v2284_v52 }
 0xe1a   : > { %2572 = vrot.lane.b32.xlu1 %v5689_v47, %s5034_s2  ;;  %2392 = vrot.lane.b32.xlu0 %v5689_v47, %s5035_s23  ;;  %v5717_v14 = vpack.c.bf16 %v2384_v60, %v2380_v62 }
 0xe1e   : > { %2390 = vrot.lane.b32.xlu1 %v5683_v33, %s5035_s23  ;;  %2566 = vrot.lane.b32.xlu0 %v5683_v33, %s6174_s3  ;;  %s6177_s23 = smov 16  }
 0xe22   : > { %2570 = vrot.lane.b32.xlu1 %v5683_v33, %s5034_s2  ;;  %2568 = vrot.lane.b32.xlu0 %v5689_v47, %s6174_s3 }
 0xe26   : > { %2758 = vrot.lane.b32.xlu1 %v5689_v47, %s6175_s26  ;;  %2752 = vrot.lane.b32.xlu0 %v5683_v33, %s6176_s24 }
 0xe2a   : > { %2756 = vrot.lane.b32.xlu1 %v5683_v33, %s6175_s26 }
 0xe2e   : > { %2754 = vrot.lane.b32.xlu1 %v5689_v47, %s6176_s24 }
 0xe8c   : > { %v2573_v63 = vpop.permute.xlu1 %2572  ;;  %v2393_v22 = vpop.permute.xlu0 %2392 }
 0xe8d   : > { %v2584_v39 = vsel %vm859_vm1, %v2573_v63, 0  ;;  %v2404_v4 = vsel %vm859_vm1, %v2393_v22, 0  ;;  %4618 = vmatprep.subr.msk.bf16.mxu1 %vm859_vm1, %v2393_v22  ;;  %4620 = vmatprep.subr.msk.bf16.mxu0 %vm859_vm1, %v2573_v63 }
 0xe8e   : > { %4500 = vmatpush3.bf16.xpose.msra.mxu1 %v2404_v4  ;;  %4516 = vmatpush3.bf16.xpose.msra.mxu0 %v2584_v39 }
 0xe90   : > { %v2391_v58 = vpop.permute.xlu1 %2390  ;;  %v2567_v57 = vpop.permute.xlu0 %2566 }
 0xe91   : > { %4619 = vmatprep.subr.msk.bf16.mxu1 %vm859_vm1, %v2391_v58  ;;  %4519 = vmatprep.mubr.msk.bf16.mxu0 %vm859_vm1, %v2567_v57  ;;  %v2401_v27 = vsel %vm859_vm1, %v2391_v58, 0 }
 0xe94   : > { %v2571_v12 = vpop.permute.xlu1 %2570  ;;  %v2569_v13 = vpop.permute.xlu0 %2568 }
 0xe95   : > { %v2581_v10 = vsel %vm859_vm1, %v2571_v12, 0  ;;  %4621 = vmatprep.subr.msk.bf16.mxu0 %vm859_vm1, %v2571_v12 }
 0xe96   : > { %4502 = vmatpush3.bf16.xpose.msra.mxu1 %v2401_v27  ;;  %4518 = vmatpush3.bf16.xpose.msra.mxu0 %v2581_v10 }
 0xe97   : > { %4507 = vmatprep.subr.bf16.mxu1 %v5717_v14 }
 0xe98   : > { %v2759_v20 = vpop.permute.xlu1 %2758  ;;  %v2753_v21 = vpop.permute.xlu0 %2752 }
 0xe99   : > { %4622 = vmatprep.subr.msk.bf16.mxu0 %vm859_vm1, %v2759_v20  ;;  %v2770_v1 = vsel %vm859_vm1, %v2759_v20, 0 }
 0xe9c   : > { %v2757_v23 = vpop.permute.xlu1 %2756 }
 0xe9d   : > { %4504 = vmatmul.mubr.msk.bf16.vlgmr.msra.gmra.mxu1 %vm859_vm1, %v5689_v47  ;;  %4520 = vmatmul.mubr.msk.bf16.vlgmr.msra.gmra.mxu0 %vm859_vm1, %v2569_v13  ;;  %v2767_v5 = vsel %vm859_vm1, %v2757_v23, 0 }
 0xe9e   : > { %4508 = vmatpush3.bf16.msra.mxu1 %v5717_v14  ;;  %4532 = vmatpush3.bf16.xpose.msra.mxu0 %v2770_v1 }
 0xe9f   : > { %4535 = vmatprep.mubr.msk.bf16.mxu0 %vm859_vm1, %v2753_v21  ;;  %4509 = vmatprep.subr.bf16.mxu1 %v5685_v61 }
 0xea0   : > { %4623 = vmatprep.subr.msk.bf16.mxu0 %vm859_vm1, %v2757_v23  ;;  %v2755_v26 = vpop.permute.xlu1 %2754 }
 0xea2   : > { %4510 = vmatpush3.bf16.msra.mxu1 %v5685_v61 }
 0xea6   : > { %4534 = vmatpush3.bf16.xpose.msra.mxu0 %v2767_v5 }
 0xead   : > { %4536 = vmatmul.mubr.msk.bf16.vlgmr.msra.gmra.mxu0 %vm859_vm1, %v2755_v26 }
 0xf5d   : > { %v4505_v25 = vpop.f32.mrf.mxu1  ;;  %v4521_v28 = vpop.f32.mrf.mxu0 }
 0xf5e   : > { %v2457_v3 = vmul.f32 0.25, %v4505_v25  ;;  %v2637_v46 = vmul.f32 0.25, %v4521_v28 }
 0xf5f   : > { %v2440_v29 = vpop.f32.mrf.mxu1  ;;  %v2620_v31 = vpop.f32.mrf.mxu0 }
 0xf60   : > { %v2455_v34 = vmul.f32 0.25, %v2440_v29  ;;  %v2461_v8 = vadd.f32 %v2457_v3, %v5288_v2  ;;  %v2635_v15 = vmul.f32 0.25, %v2620_v31  ;;  %v2641_v44 = vadd.f32 %v2637_v46, %v5288_v2 }
 0xf61   : > { %v4506_v35 = vpop.f32.mrf.mxu1  ;;  %v4522_v37 = vpop.f32.mrf.mxu0 }
 0xf62   : > { %v5736_v38 = vadd.f32 %v2455_v34, %v5286_v0  ;;  %v2458_v43 = vmul.f32 0.25, %v4506_v35  ;;  %v2638_v52 = vmul.f32 0.25, %v4522_v37  ;;  %v2469_v53 = vsel %vm929_vm14, %v2461_v8, -inf }
 0xf63   : > { %v2443_v40 = vpop.f32.mrf.mxu1  ;;  %v2623_v42 = vpop.f32.mrf.mxu0  ;;  %v5753_v59 = vadd.f32 %v2635_v15, %v5286_v0  ;;  %v2649_v57 = vsel %vm929_vm14, %v2641_v44, -inf }
 0xf64   : > { %v2456_v45 = vmul.f32 0.25, %v2443_v40  ;;  %v2636_v48 = vmul.f32 0.25, %v2623_v42  ;;  %v2463_v49 = vsel %vm929_vm14, %v5736_v38, -inf  ;;  %v2462_v36 = vadd.f32 %v2458_v43, %v5298_v16 }
 0xf65   : > { %2464 = vmax.xlane.f32.xlu0 %v2463_v49  ;;  %v2642_v55 = vadd.f32 %v2638_v52, %v5298_v16  ;;  %v2643_v39 = vsel %vm929_vm14, %v5753_v59, -inf }
 0xf66   : > { %v2460_v51 = vadd.f32 %v2456_v45, %v5294_v11  ;;  %v5746_v41 = vadd.f32 %v2636_v48, %v5294_v11  ;;  %v2472_v56 = vsel %vm929_vm14, %v2462_v36, -inf }
 0xf67   : > { %v2652_v4 = vsel %vm929_vm14, %v2642_v55, -inf }
 0xf68   : > { %v2466_v54 = vsel %vm929_vm14, %v2460_v51, -inf  ;;  %v2646_v30 = vsel %vm929_vm14, %v5746_v41, -inf }
 0xf69   : > { %2470 = vmax.xlane.f32.xlu0 %v2469_v53  ;;  %2467 = vmax.xlane.f32.xlu1 %v2466_v54 }
 0xf6d   : > { %2473 = vmax.xlane.f32.xlu0 %v2472_v56  ;;  %2647 = vmax.xlane.f32.xlu1 %v2646_v30  ;;  %v4537_v50 = vpop.f32.mrf.mxu0 }
 0xf6e   : > { %v2823_v60 = vmul.f32 0.25, %v4537_v50 }
 0xf6f   : > { %v2806_v63 = vpop.f32.mrf.mxu0 }
 0xf70   : > { %v2821_v22 = vmul.f32 0.25, %v2806_v63  ;;  %v5765_v13 = vadd.f32 %v2823_v60, %v5288_v2 }
 0xf71   : > { %2644 = vmax.xlane.f32.xlu0 %v2643_v39  ;;  %2653 = vmax.xlane.f32.xlu1 %v2652_v4  ;;  %v4538_v6 = vpop.f32.mrf.mxu0 }
 0xf72   : > { %v5761_v62 = vadd.f32 %v2821_v22, %v5286_v0  ;;  %v2824_v12 = vmul.f32 0.25, %v4538_v6  ;;  %v2835_v23 = vsel %vm929_vm14, %v5765_v13, -inf }
 0xf73   : > { %v2809_v58 = vpop.f32.mrf.mxu0 }
 0xf74   : > { %v2822_v27 = vmul.f32 0.25, %v2809_v58  ;;  %v2828_v20 = vadd.f32 %v2824_v12, %v5298_v16  ;;  %v2829_v1 = vsel %vm929_vm14, %v5761_v62, -inf }
 0xf75   : > { %2650 = vmax.xlane.f32.xlu0 %v2649_v57 }
 0xf76   : > { %v2826_v10 = vadd.f32 %v2822_v27, %v5294_v11  ;;  %v2838_v5 = vsel %vm929_vm14, %v2828_v20, -inf }
 0xf78   : > { %v2832_v21 = vsel %vm929_vm14, %v2826_v10, -inf }
 0xf79   : > { %2830 = vmax.xlane.f32.xlu0 %v2829_v1  ;;  %2833 = vmax.xlane.f32.xlu1 %v2832_v21 }
 0xf7d   : > { %2836 = vmax.xlane.f32.xlu0 %v2835_v23  ;;  %2839 = vmax.xlane.f32.xlu1 %v2838_v5 }
 0xf8e   : > { %2691 = vrot.lane.b32.xlu1 %v5685_v61, %s6174_s3 }
 0xf92   : > { %2877 = vrot.lane.b32.xlu1 %v5717_v14, %s6176_s24 }
 0xfee   : > { %v2465_v26 = vpop.xlane.xlu0 %2464 }
 0xfef   : > { %v2475_v48 = vsub.f32 %v5736_v38, %v2465_v26 }
 0xff1   : > { %v2479_v54 = vmul.f32 1.442695, %v2475_v48 }
 0xff2   : > { %v2468_v25 = vpop.xlane.xlu1 %2467  ;;  %v2471_v28 = vpop.xlane.xlu0 %2470 }
 0xff3   : > { %v2477_v3 = vsub.f32 %v2461_v8, %v2471_v28  ;;  %v2476_v40 = vsub.f32 %v2460_v51, %v2468_v25 }
 0xff5   : > { %v2483_v29 = vmul.f32 1.442695, %v2477_v3  ;;  %v2481_v15 = vmul.f32 1.442695, %v2476_v40 }
 0xff6   : > { %v2648_v31 = vpop.xlane.xlu1 %2647  ;;  %v2474_v34 = vpop.xlane.xlu0 %2473 }
 0xff7   : > { %v2478_v35 = vsub.f32 %v2462_v36, %v2474_v34  ;;  %4913 = vpow2.f32 %v2483_v29  ;;  %v2656_v52 = vsub.f32 %v5746_v41, %v2648_v31 }
 0xff9   : > { %v2485_v37 = vmul.f32 1.442695, %v2478_v35  ;;  %v2661_v36 = vmul.f32 1.442695, %v2656_v52 }
 0xffa   : > { %v2654_v42 = vpop.xlane.xlu1 %2653  ;;  %v2645_v43 = vpop.xlane.xlu0 %2644 }
 0xffb   : > { %v2658_v45 = vsub.f32 %v2642_v55, %v2654_v42  ;;  %4915 = vpow2.f32 %v2485_v37  ;;  %v2655_v25 = vsub.f32 %v5753_v59, %v2645_v43 }
 0xffd   : > { %v2665_v49 = vmul.f32 1.442695, %v2658_v45  ;;  %v2659_v3 = vmul.f32 1.442695, %v2655_v25 }
 0xffe   : > { %v2651_v53 = vpop.xlane.xlu0 %2650 }
 0xfff   : > { %4917 = vpow2.f32 %v2665_v49  ;;  %v2657_v8 = vsub.f32 %v2641_v44, %v2651_v53 }
0x1000   : > { %4919 = vpow2.f32 %v2481_v15 }
0x1001   : > { %v2663_v46 = vmul.f32 1.442695, %v2657_v8 }
0x1002   : > { %v2834_v56 = vpop.xlane.xlu1 %2833  ;;  %v2831_v26 = vpop.xlane.xlu0 %2830 }
0x1003   : > { %4921 = vpow2.f32 %v2663_v46  ;;  %v2842_v55 = vsub.f32 %v2826_v10, %v2834_v56  ;;  %v2841_v31 = vsub.f32 %v5761_v62, %v2831_v26 }
0x1004   : > { %v5780_v51 = vpop.eup %4913  ;;  %4923 = vpow2.f32 %v2479_v54 }
0x1005   : > { %4925 = vpow2.f32 %v2661_v36  ;;  %v2493_v38 = vsel %vm929_vm14, %v5780_v51, 0.0  ;;  %v2847_v63 = vmul.f32 1.442695, %v2842_v55  ;;  %v2845_v35 = vmul.f32 1.442695, %v2841_v31 }
0x1006   : > { %v2840_v30 = vpop.xlane.xlu1 %2839  ;;  %2494 = vadd.xlane.f32.xlu0 %v2493_v38  ;;  %v2837_v28 = vpop.xlane.xlu0 %2836 }
0x1007   : > { %v2844_v50 = vsub.f32 %v2828_v20, %v2840_v30  ;;  %v2843_v29 = vsub.f32 %v5765_v13, %v2837_v28 }
0x1008   : > { %v5784_v41 = vpop.eup %4915 }
0x1009   : > { %v2851_v44 = vmul.f32 1.442695, %v2844_v50  ;;  %v2496_v22 = vsel %vm929_vm14, %v5784_v41, 0.0  ;;  %v2849_v34 = vmul.f32 1.442695, %v2843_v29 }
0x100a   : > { %2497 = vadd.xlane.f32.xlu1 %v2496_v22  ;;  %v2692_v62 = vpop.permute.xlu1 %2691 }
0x100b   : > { %4927 = vpow2.f32 %v2851_v44 }
0x100c   : > { %v5788_v39 = vpop.eup %4917  ;;  %4929 = vpow2.f32 %v2847_v63 }
0x100d   : > { %v2676_v4 = vsel %vm929_vm14, %v5788_v39, 0.0  ;;  %v5792_v6 = vpop.eup %4919  ;;  %4931 = vpow2.f32 %v2659_v3 }
0x100e   : > { %2677 = vadd.xlane.f32.xlu1 %v2676_v4  ;;  %v2490_v12 = vsel %vm929_vm14, %v5792_v6, 0.0  ;;  %4933 = vpow2.f32 %v2849_v34  ;;  %v2878_v45 = vpop.permute.xlu1 %2877 }
0x100f   : > { %4935 = vpow2.f32 %v2845_v35 }
0x1010   : > { %v5794_v58 = vpop.eup %4921 }
0x1011   : > { %v2673_v57 = vsel %vm929_vm14, %v5794_v58, 0.0  ;;  %v4924_v60 = vpop.eup %4923 }
0x1012   : > { %2674 = vadd.xlane.f32.xlu0 %v2673_v57  ;;  %v5800_v27 = vpop.eup %4925  ;;  %2491 = vadd.xlane.f32.xlu1 %v2490_v12  ;;  %v2487_v10 = vsel %vm929_vm14, %v4924_v60, 0.0 }
0x1013   : > { %v2670_v20 = vsel %vm929_vm14, %v5800_v27, 0.0 }
0x1016   : > { %2488 = vadd.xlane.f32.xlu0 %v2487_v10  ;;  %2671 = vadd.xlane.f32.xlu1 %v2670_v20 }
0x1018   : > { %v5805_v1 = vpop.eup %4927 }
0x1019   : > { %v2862_v21 = vsel %vm929_vm14, %v5805_v1, 0.0  ;;  %v5809_v23 = vpop.eup %4929 }
0x101a   : > { %2863 = vadd.xlane.f32.xlu1 %v2862_v21  ;;  %v2856_v5 = vsel %vm929_vm14, %v5809_v23, 0.0  ;;  %v4932_v37 = vpop.eup %4931 }
0x101b   : > { %v2667_v59 = vsel %vm929_vm14, %v4932_v37, 0.0  ;;  %v5825_v40 = vpop.eup %4933 }
0x101c   : > { %v2859_v42 = vsel %vm929_vm14, %v5825_v40, 0.0  ;;  %v5829_v13 = vpop.eup %4935 }
0x101d   : > { %v2853_v43 = vsel %vm929_vm14, %v5829_v13, 0.0 }
0x101e   : > { %2857 = vadd.xlane.f32.xlu1 %v2856_v5 }
0x102c   : > { %2693 = vrot.lane.b32.xlu0 %v5717_v14, %s6174_s3  ;;  %s4073_s3 = sshll.u32 %s6183_s21, 1 }
0x102d   : > { %s620_s30 = scalar_lea.vmem %s6154_s19, %s4073_s3 }
0x102f   : > { %2875 = vrot.lane.b32.xlu1 %v5685_v61, %s6176_s24  ;;  %s6179_s24 = sld [smem:[#allocation4_spill]] }
0x1033   : > { %2940 = vrot.lane.b32.xlu1 %v5683_v33, %s6177_s23 }
0x1037   : > { %2938 = vrot.lane.b32.xlu1 %v5689_v47, %s6178_s27 }
0x104b   : > { %2668 = vadd.xlane.f32.xlu0 %v2667_v59 }
0x104f   : > { %2860 = vadd.xlane.f32.xlu0 %v2859_v42 }
0x1053   : > { %2854 = vadd.xlane.f32.xlu0 %v2853_v43 }
0x1069   : > { %2942 = vrot.lane.b32.xlu0 %v5689_v47, %s6177_s23 }
0x106d   : > { %2936 = vrot.lane.b32.xlu0 %v5683_v33, %s6178_s27 }
0x108f   : > { %v2495_v49 = vpop.xlane.xlu0 %2494 }
0x1093   : > { %v2498_v48 = vpop.xlane.xlu1 %2497 }
0x1094   : > { %4937 = vrcp.f32 %v2498_v48 }
0x1097   : > { %v2678_v15 = vpop.xlane.xlu1 %2677 }
0x109b   : > { %v2675_v52 = vpop.xlane.xlu0 %2674  ;;  %v2492_v53 = vpop.xlane.xlu1 %2491 }
0x109c   : > { %4939 = vrcp.f32 %v2492_v53 }
0x109d   : > { %4941 = vrcp.f32 %v2495_v49 }
0x109f   : > { %v2489_v8 = vpop.xlane.xlu0 %2488  ;;  %v2672_v63 = vpop.xlane.xlu1 %2671 }
0x10a0   : > { %4943 = vrcp.f32 %v2489_v8 }
0x10a1   : > { %v4938_v46 = vpop.eup %4937  ;;  %4945 = vrcp.f32 %v2675_v52 }
0x10a2   : > { %v2506_v33 = vmul.f32 %v4938_v46, %v5784_v41  ;;  %4947 = vrcp.f32 %v2672_v63 }
0x10a3   : > { %v2694_v54 = vpop.permute.xlu0 %2693  ;;  %v2864_v22 = vpop.xlane.xlu1 %2863  ;;  %4949 = vrcp.f32 %v2678_v15 }
0x10a4   : > { %4523 = vmatprep.subr.bf16.mxu1 %v2694_v54 }
0x10a7   : > { %v2858_v4 = vpop.xlane.xlu1 %2857 }
0x10a9   : > { %v4940_v36 = vpop.eup %4939 }
0x10aa   : > { %v4942_v47 = vpop.eup %4941  ;;  %v2504_v30 = vmul.f32 %v4940_v36, %v5792_v6 }
0x10ab   : > { %v2505_v38 = vmul.f32 %v4942_v47, %v5780_v51  ;;  %v2876_v34 = vpop.permute.xlu1 %2875 }
0x10ad   : > { %v4944_v56 = vpop.eup %4943  ;;  %v2508_v44 = vpack.c.bf16 %v2506_v33, %v2505_v38 }
0x10ae   : > { %v2503_v55 = vmul.f32 %v4944_v56, %v4924_v60  ;;  %v4946_v57 = vpop.eup %4945 }
0x10af   : > { %v4948_v60 = vpop.eup %4947  ;;  %v2685_v20 = vmul.f32 %v4946_v57, %v5794_v58  ;;  %v2941_v48 = vpop.permute.xlu1 %2940 }
0x10b0   : > { %v2507_v50 = vpack.c.bf16 %v2504_v30, %v2503_v55  ;;  %v4950_v12 = vpop.eup %4949  ;;  %v2684_v5 = vmul.f32 %v4948_v60, %v5800_v27 }
0x10b1   : > { %v2686_v26 = vmul.f32 %v4950_v12, %v5788_v39 }
0x10b2   : > { %4511 = vmatprep.mubr.msk.bf16.mxu1 %vm929_vm14, %v2507_v50 }
0x10b3   : > { %4512 = vmatmul.mubr.msk.bf16.vlgmr.msra.gmra.mxu1 %vm929_vm14, %v2508_v44  ;;  %v2688_v28 = vpack.c.bf16 %v2686_v26, %v2685_v20 }
0x10b4   : > { %4524 = vmatpush3.bf16.msra.mxu1 %v2694_v54 }
0x10b5   : > { %4525 = vmatprep.subr.bf16.mxu1 %v2692_v62 }
0x10b8   : > { %4526 = vmatpush3.bf16.msra.mxu1 %v2692_v62 }
0x10b9   : > { %4539 = vmatprep.subr.bf16.mxu1 %v2878_v45 }
0x10d4   : > { %v2669_v41 = vpop.xlane.xlu0 %2668 }
0x10d5   : > { %4951 = vrcp.f32 %v2669_v41 }
0x10d8   : > { %v2861_v6 = vpop.xlane.xlu0 %2860 }
0x10d9   : > { %4953 = vrcp.f32 %v2861_v6 }
0x10da   : > { %4955 = vrcp.f32 %v2858_v4 }
0x10db   : > { %4957 = vrcp.f32 %v2864_v22 }
0x10dc   : > { %v2855_v51 = vpop.xlane.xlu0 %2854 }
0x10dd   : > { %4959 = vrcp.f32 %v2855_v51 }
0x10e0   : > { %v2943_v59 = vpop.permute.xlu0 %2942 }
0x10e1   : > { %v2954_v62 = vsel %vm859_vm1, %v2943_v59, 0 }
0x10e2   : > { %v4952_v10 = vpop.eup %4951 }
0x10e3   : > { %v2683_v21 = vmul.f32 %v4952_v10, %v4932_v37 }
0x10e5   : > { %v2687_v25 = vpack.c.bf16 %v2684_v5, %v2683_v21 }
0x10e6   : > { %v4954_v3 = vpop.eup %4953 }
0x10e7   : > { %4527 = vmatprep.mubr.msk.bf16.mxu1 %vm929_vm14, %v2687_v25  ;;  %v4956_v29 = vpop.eup %4955  ;;  %v2871_v58 = vmul.f32 %v4954_v3, %v5825_v40 }
0x10e8   : > { %4528 = vmatmul.mubr.msk.bf16.vlgmr.msra.gmra.mxu1 %vm929_vm14, %v2688_v28  ;;  %v4958_v31 = vpop.eup %4957  ;;  %v2870_v39 = vmul.f32 %v4956_v29, %v5809_v23  ;;  %v2939_v23 = vpop.permute.xlu1 %2938 }
0x10e9   : > { %4540 = vmatpush3.bf16.msra.mxu1 %v2878_v45  ;;  %v2872_v37 = vmul.f32 %v4958_v31, %v5805_v1  ;;  %v2937_v45 = vpop.permute.xlu0 %2936  ;;  %v2951_v1 = vsel %vm859_vm1, %v2941_v48, 0 }
0x10ea   : > { %v4960_v35 = vpop.eup %4959  ;;  %4541 = vmatprep.subr.bf16.mxu1 %v2876_v34 }
0x10eb   : > { %v2869_v27 = vmul.f32 %v4960_v35, %v5829_v13  ;;  %v2874_v43 = vpack.c.bf16 %v2872_v37, %v2871_v58 }
0x10ed   : > { %4542 = vmatpush3.bf16.msra.mxu1 %v2876_v34  ;;  %v2873_v42 = vpack.c.bf16 %v2870_v39, %v2869_v27 }
0x10ee   : > { %4624 = vmatprep.subr.msk.bf16.mxu1 %vm859_vm1, %v2943_v59 }
0x10ef   : > { %4543 = vmatprep.mubr.msk.bf16.mxu1 %vm929_vm14, %v2873_v42 }
0x10f0   : > { %4544 = vmatmul.mubr.msk.bf16.vlgmr.msra.gmra.mxu1 %vm929_vm14, %v2874_v43 }
0x10f1   : > { %4548 = vmatpush3.bf16.xpose.msra.mxu1 %v2954_v62  ;;  %4551 = vmatprep.mubr.msk.bf16.mxu1 %vm859_vm1, %v2937_v45 }
0x10f2   : > { %4625 = vmatprep.subr.msk.bf16.mxu1 %vm859_vm1, %v2941_v48 }
0x10f9   : > { %4550 = vmatpush3.bf16.xpose.msra.mxu1 %v2951_v1 }
0x1100   : > { %4552 = vmatmul.mubr.msk.bf16.vlgmr.msra.gmra.mxu1 %vm859_vm1, %v2939_v23 }
0x1101   : > { %3464 = vmatprep.mubr.bf16.mxu1 %v5033_v32 }
0x1173   : > { %v5860_v40 = vpop.f32.mrf.mxu1 }
0x1175   : > { %v5862_v13 = vpop.f32.mrf.mxu1 }
0x1177   : > { %v5864_v49 = vpop.f32.mrf.mxu1 }
0x1179   : > { %v5866_v15 = vpop.f32.mrf.mxu1 }
0x11a8   : > { %v5868_v52 = vpop.f32.mrf.mxu1 }
0x11aa   : > { %v2737_v53 = vpop.f32.mrf.mxu1 }
0x11ac   : > { %v4530_v8 = vpop.f32.mrf.mxu1 }
0x11ad   : > { %v4680_v54 = vpack.i.bf16 %v4530_v8, %v5868_v52 }
0x11ae   : > { %v2740_v46 = vpop.f32.mrf.mxu1 }
0x11af   : > { %v4675_v36 = vpack.i.bf16 %v2740_v46, %v2737_v53 }
0x11b0   : > { %v4545_v47 = vpop.f32.mrf.mxu1 }
0x11b2   : > { %v2921_v56 = vpop.f32.mrf.mxu1 }
0x11b4   : > { %v4546_v33 = vpop.f32.mrf.mxu1 }
0x11b5   : > { %v4690_v55 = vpack.i.bf16 %v4546_v33, %v4545_v47 }
0x11b6   : > { %v2924_v30 = vpop.f32.mrf.mxu1 }
0x11b7   : > { %v4685_v38 = vpack.i.bf16 %v2924_v30, %v2921_v56 }
0x11c0   : > { %v4553_v50 = vpop.f32.mrf.mxu1 }
0x11c1   : > { %v3007_v63 = vmul.f32 0.25, %v4553_v50  ;;  %v4762_v50 = vld [vmem:[%s6141_s6 + $0x30] sm:$0xff]  }
0x11c2   : > { %v2990_v44 = vpop.f32.mrf.mxu1 }
0x11c3   : > { %v3005_v22 = vmul.f32 0.25, %v2990_v44  ;;  %v3011_v51 = vadd.f32 %v3007_v63, %v5288_v2  ;;  %v4763_v44 = vld [vmem:[%s6141_s6 + $0x28] sm:$0xff]   ;;  %v4764_v63 = vld [vmem:[%s6141_s6 + $0x20] sm:$0xff]  }
0x11c4   : > { %v4554_v41 = vpop.f32.mrf.mxu1 }
0x11c5   : > { %v3009_v4 = vadd.f32 %v3005_v22, %v5286_v0  ;;  %v3008_v57 = vmul.f32 0.25, %v4554_v41  ;;  %v3019_v21 = vsel %vm929_vm14, %v3011_v51, -inf }
0x11c6   : > { %v2993_v6 = vpop.f32.mrf.mxu1 }
0x11c7   : > { %v3006_v60 = vmul.f32 0.25, %v2993_v6  ;;  %v3013_v12 = vsel %vm929_vm14, %v3009_v4, -inf  ;;  %v3012_v20 = vadd.f32 %v3008_v57, %v5298_v16 }
0x11c8   : > { %3014 = vmax.xlane.f32.xlu0 %v3013_v12 }
0x11c9   : > { %v3010_v10 = vadd.f32 %v3006_v60, %v5294_v11  ;;  %v3022_v0 = vsel %vm929_vm14, %v3012_v20, -inf }
0x11cb   : > { %v3016_v5 = vsel %vm929_vm14, %v3010_v10, -inf }
0x11cc   : > { %3020 = vmax.xlane.f32.xlu0 %v3019_v21  ;;  %3017 = vmax.xlane.f32.xlu1 %v3016_v5 }
0x11d0   : > { %3023 = vmax.xlane.f32.xlu0 %v3022_v0 }
0x1251   : > { %v3015_v26 = vpop.xlane.xlu0 %3014 }
0x1252   : > { %v3025_v2 = vsub.f32 %v3009_v4, %v3015_v26 }
0x1254   : > { %v3029_v29 = vmul.f32 1.442695, %v3025_v2 }
0x1255   : > { %v3021_v25 = vpop.xlane.xlu0 %3020  ;;  %v3018_v28 = vpop.xlane.xlu1 %3017 }
0x1256   : > { %v3027_v3 = vsub.f32 %v3011_v51, %v3021_v25  ;;  %v3026_v34 = vsub.f32 %v3010_v10, %v3018_v28 }
0x1258   : > { %v3033_v31 = vmul.f32 1.442695, %v3027_v3  ;;  %v3031_v35 = vmul.f32 1.442695, %v3026_v34 }
0x1259   : > { %v3024_v11 = vpop.xlane.xlu0 %3023 }
0x125a   : > { %4961 = vpow2.f32 %v3033_v31  ;;  %v3028_v16 = vsub.f32 %v3012_v20, %v3024_v11 }
0x125b   : > { %4963 = vpow2.f32 %v3029_v29 }
0x125c   : > { %v3035_v59 = vmul.f32 1.442695, %v3028_v16 }
0x125e   : > { %4965 = vpow2.f32 %v3035_v59 }
0x125f   : > { %4967 = vpow2.f32 %v3031_v35 }
0x1267   : > { %v4962_v58 = vpop.eup %4961 }
0x1268   : > { %v3043_v27 = vsel %vm929_vm14, %v4962_v58, 0.0  ;;  %v4964_v39 = vpop.eup %4963 }
0x1269   : > { %3044 = vadd.xlane.f32.xlu0 %v3043_v27  ;;  %v3037_v42 = vsel %vm929_vm14, %v4964_v39, 0.0 }
0x126b   : > { %v4966_v37 = vpop.eup %4965 }
0x126c   : > { %v3046_v43 = vsel %vm929_vm14, %v4966_v37, 0.0  ;;  %v4968_v62 = vpop.eup %4967 }
0x126d   : > { %3038 = vadd.xlane.f32.xlu0 %v3037_v42  ;;  %3047 = vadd.xlane.f32.xlu1 %v3046_v43  ;;  %v3040_v45 = vsel %vm929_vm14, %v4968_v62, 0.0 }
0x1271   : > { %3041 = vadd.xlane.f32.xlu1 %v3040_v45 }
0x1282   : > { %3059 = vrot.lane.b32.xlu1 %v5685_v61, %s6178_s27 }
0x1283   : > { %3061 = vrot.lane.b32.xlu0 %v5717_v14, %s6178_s27  ;;  %s3996_s27 = sld [smem:[#allocation2]] }
0x1286   : > { %4676 = vrot.lane.b32.xlu1 %v4675_v36, %s6177_s23 }
0x1287   : > { %4686 = vrot.lane.b32.xlu0 %v4685_v38, %s6175_s26  ;;  %v4761_v38 = vld [vmem:[%s6141_s6 + $0x38] sm:$0xff]  }
0x128a   : > { %4681 = vrot.lane.b32.xlu1 %v4680_v54, %s6177_s23  ;;  %s616_s23 = scalar_lea.vmem %s6179_s24, %s4073_s3 }
0x128e   : > { %4691 = vrot.lane.b32.xlu1 %v4690_v55, %s6175_s26 }
0x12f2   : > { %v3045_v48 = vpop.xlane.xlu0 %3044 }
0x12f6   : > { %v3039_v1 = vpop.xlane.xlu0 %3038  ;;  %v3048_v23 = vpop.xlane.xlu1 %3047 }
0x12f7   : > { %4969 = vrcp.f32 %v3048_v23 }
0x12f8   : > { %4971 = vrcp.f32 %v3039_v1 }
0x12f9   : > { %4973 = vrcp.f32 %v3045_v48 }
0x12fa   : > { %v3062_v52 = vpop.permute.xlu0 %3061  ;;  %v3042_v53 = vpop.xlane.xlu1 %3041 }
0x12fb   : > { %4975 = vrcp.f32 %v3042_v53  ;;  %4555 = vmatprep.subr.bf16.mxu0 %v3062_v52 }
0x12fc   : > { %4556 = vmatpush3.bf16.msra.mxu0 %v3062_v52 }
0x12fe   : > { %v3060_v61 = vpop.permute.xlu1 %3059  ;;  %v4687_v5 = vpop.permute.xlu0 %4686 }
0x12ff   : > { %4557 = vmatprep.subr.bf16.mxu0 %v3060_v61  ;;  %v4689_v11 = vunpack.i.h.bf16 %v4687_v5  ;;  %v4688_v16 = vunpack.i.l.bf16 %v4687_v5 }
0x1300   : > { %4558 = vmatpush3.bf16.msra.mxu0 %v3060_v61  ;;  %v4193_v61 = vld [vmem:[%s6142_s7 + $0x1] ss:$0 sm:$0xff] }
0x1301   : > { %4563 = vmatprep.subr.bf16.mxu0 %v4761_v38 }
0x1302   : > { %v4677_v60 = vpop.permute.xlu1 %4676 }
0x1303   : > { %v4679_v20 = vunpack.i.h.bf16 %v4677_v60  ;;  %v4678_v21 = vunpack.i.l.bf16 %v4677_v60 }
0x1304   : > { %v4970_v14 = vpop.eup %4969 }
0x1305   : > { %v4972_v8 = vpop.eup %4971  ;;  %v3056_v36 = vmul.f32 %v4970_v14, %v4966_v37  ;;  %v3169_v3 = vsel %vm859_vm1, %v5866_v15, %v4679_v20  ;;  %v3168_v29 = vsel %vm859_vm1, %v5862_v13, %v4678_v21 }
0x1306   : > { %v4974_v46 = vpop.eup %4973  ;;  %v3053_v47 = vmul.f32 %v4972_v8, %v4964_v39  ;;  %v4682_v12 = vpop.permute.xlu1 %4681  ;;  %v3172_v43 = vsel %vm929_vm14, %v3168_v29, %v4688_v16  ;;  %v4773_v29 = vld [vmem:[%s6145_s10 + $0x54] ss:$8 sps:$4 sm:$0xff]  }
0x1307   : > { %v3055_v33 = vmul.f32 %v4974_v46, %v4962_v58  ;;  %v4684_v0 = vunpack.i.h.bf16 %v4682_v12  ;;  %v4683_v26 = vunpack.i.l.bf16 %v4682_v12 }
0x1308   : > { %v4976_v54 = vpop.eup %4975 }
0x1309   : > { %v3054_v56 = vmul.f32 %v4976_v54, %v4968_v62  ;;  %v3058_v30 = vpack.c.bf16 %v3056_v36, %v3055_v33  ;;  %v3171_v35 = vsel %vm859_vm1, %v5864_v49, %v4684_v0  ;;  %v3170_v59 = vsel %vm859_vm1, %v5860_v40, %v4683_v26 }
0x130a   : > { %v4692_v10 = vpop.permute.xlu1 %4691  ;;  %v3173_v62 = vsel %vm929_vm14, %v3169_v3, %v4689_v11  ;;  %v4768_v3 = vld [vmem:[%s6145_s10 + $0x60] ss:$8 sps:$4 sm:$0xff]   ;;  %vm5043_vm1 = vmmov 0  }
0x130b   : > { %v3057_v55 = vpack.c.bf16 %v3054_v56, %v3053_v47  ;;  %v4694_v2 = vunpack.i.h.bf16 %v4692_v10  ;;  %v4693_v25 = vunpack.i.l.bf16 %v4692_v10  ;;  %v4774_v11 = vld [vmem:[%s6145_s10 + $0x40] ss:$8 sps:$4 sm:$0xff]  }
0x130d   : > { %4559 = vmatprep.mubr.msk.bf16.mxu0 %vm929_vm14, %v3057_v55  ;;  %v3174_v27 = vsel %vm929_vm14, %v3170_v59, %v4693_v25  ;;  %v3175_v39 = vsel %vm929_vm14, %v3171_v35, %v4694_v2  ;;  %v4767_v2 = vld [vmem:[%s6145_s10 + $0x74] ss:$8 sps:$4 sm:$0xff]   ;;  %v4765_v25 = vld [vmem:[%s6145_s10 + $0x70] ss:$8 sps:$4 sm:$0xff]  }
0x130e   : > { %4560 = vmatmul.mubr.msk.bf16.vlgmr.msra.gmra.mxu0 %vm929_vm14, %v3058_v30  ;;  %3440 = vmatprep.subr.bf16.mxu1 %v4767_v2 }
0x130f   : > { %4564 = vmatpush3.bf16.msra.mxu0 %v4761_v38  ;;  %3441 = vmatpush1.bf16.msra.mxu1 %v4765_v25 }
0x1310   : > { %4565 = vmatprep.subr.bf16.mxu0 %v4762_v50 }
0x1313   : > { %4566 = vmatpush3.bf16.msra.mxu0 %v4762_v50 }
0x1314   : > { %4567 = vmatprep.subr.bf16.mxu0 %v4763_v44 }
0x1317   : > { %4568 = vmatpush3.bf16.msra.mxu0 %v4763_v44 }
0x1318   : > { %4569 = vmatprep.subr.bf16.mxu0 %v4764_v63 }
0x131b   : > { %4570 = vmatpush3.bf16.msra.mxu0 %v4764_v63 }
0x13ce   : > { %v4561_v22 = vpop.f32.mrf.mxu0 }
0x13d0   : > { %v3105_v41 = vpop.f32.mrf.mxu0 }
0x13d2   : > { %v4562_v4 = vpop.f32.mrf.mxu0 }
0x13d3   : > { %v4700_v6 = vpack.i.bf16 %v4562_v4, %v4561_v22 }
0x13d4   : > { %v3108_v51 = vpop.f32.mrf.mxu0 }
0x13d5   : > { %v4695_v57 = vpack.i.bf16 %v3108_v51, %v3105_v41  ;;  %4701 = vrot.lane.b32.xlu1 %v4700_v6, %s5034_s2 }
0x13d7   : > { %4696 = vrot.lane.b32.xlu0 %v4695_v57, %s5034_s2 }
0x1447   : > { %v4702_v28 = vpop.permute.xlu1 %4701 }
0x1448   : > { %v4704_v31 = vunpack.i.h.bf16 %v4702_v28  ;;  %v4703_v34 = vunpack.i.l.bf16 %v4702_v28  ;;  %v4770_v28 = vld [vmem:[%s6145_s10 + $0x64] ss:$8 sps:$4 sm:$0xff]  }
0x1449   : > { %v4697_v58 = vpop.permute.xlu0 %4696  ;;  %3442 = vmatprep.subr.bf16.mxu1 %v4770_v28 }
0x144a   : > { %v4699_v37 = vunpack.i.h.bf16 %v4697_v58  ;;  %v4698_v15 = vunpack.i.l.bf16 %v4697_v58  ;;  %v3178_v42 = vsel %vm1643_vm15, %v3174_v27, %v4703_v34  ;;  %v3179_v13 = vsel %vm1643_vm15, %v3175_v39, %v4704_v31  ;;  %3443 = vmatpush1.bf16.msra.mxu1 %v4768_v3  ;;  %v4771_v31 = vld [vmem:[%s6145_s10 + $0x50] ss:$8 sps:$4 sm:$0xff]   ;;  %v4776_v34 = vld [vmem:[%s6145_s10 + $0x44] ss:$8 sps:$4 sm:$0xff]  }
0x144b   : > { %v3181_v48 = vpack.c.bf16 %v3179_v13, %v3178_v42  ;;  %3444 = vmatprep.subr.bf16.mxu1 %v4773_v29 }
0x144c   : > { %v3176_v49 = vsel %vm1643_vm15, %v3172_v43, %v4698_v15  ;;  %v3177_v45 = vsel %vm1643_vm15, %v3173_v62, %v4699_v37 }
0x144d   : > { %v3180_v40 = vpack.c.bf16 %v3177_v45, %v3176_v49 }
0x144e   : > { %3445 = vmatpush1.bf16.msra.mxu1 %v4771_v31 }
0x144f   : > { %4571 = vmatprep.mubr.msk.bf16.mxu0 %vm656_vm0, %v3180_v40  ;;  %3446 = vmatprep.subr.bf16.mxu1 %v4776_v34  ;;  %v4196_v40 = vld [vmem:[%s6143_s8 + $0x1] ss:$0 sm:$0xff] }
0x1450   : > { %4572 = vmatmul.mubr.msk.bf16.vlgmr.msra.gmra.mxu0 %vm656_vm0, %v3181_v48 }
0x1452   : > { %3447 = vmatpush1.bf16.msra.mxu1 %v4774_v11 }
0x1510   : > { %v4573_v1 = vpop.f32.mrf.mxu0 }
0x1511   : > { %v3272_v52 = vadd.f32 %v4573_v1, %v5628_v17 }
0x1512   : > { %v3255_v23 = vpop.f32.mrf.mxu0 }
0x1513   : > { %v3270_v53 = vadd.f32 %v3255_v23, %v5618_v18  ;;  %v5932_v54 = vadd.f32 %v4193_v61, %v3272_v52 }
0x1514   : > { %v4574_v14 = vpop.f32.mrf.mxu0 }
0x1515   : > { %v5930_v8 = vadd.f32 %v4193_v61, %v3270_v53  ;;  %v3273_v36 = vadd.f32 %v4574_v14, %v5633_v19  ;;  %v3296_v33 = vsel %vm656_vm0, %v5932_v54, 0.0  ;;  %v4197_v53 = vld [vmem:[%s6144_s9 + $0x1] ss:$0 sm:$0xff] }
0x1516   : > { %v3258_v46 = vpop.f32.mrf.mxu0 }
0x1517   : > { %v3271_v47 = vadd.f32 %v3258_v46, %v5623_v24  ;;  %v3290_v56 = vsel %vm656_vm0, %v5930_v8, 0.0  ;;  %v5940_v18 = vadd.f32 %v4193_v61, %v3273_v36 }
0x1518   : > { %3291 = vadd.xlane.f32.xlu0 %v3290_v56 }
0x1519   : > { %v5938_v17 = vadd.f32 %v4193_v61, %v3271_v47  ;;  %v3299_v19 = vsel %vm656_vm0, %v5940_v18, 0.0 }
0x151b   : > { %v3293_v55 = vsel %vm656_vm0, %v5938_v17, 0.0 }
0x151c   : > { %3297 = vadd.xlane.f32.xlu0 %v3296_v33  ;;  %3294 = vadd.xlane.f32.xlu1 %v3293_v55 }
0x1520   : > { %3300 = vadd.xlane.f32.xlu0 %v3299_v19 }
0x15a1   : > { %v3292_v24 = vpop.xlane.xlu0 %3291 }
0x15a2   : > { %v3302_v30 = vmul.f32 0.015625, %v3292_v24 }
0x15a4   : > { %v3306_v38 = vsub.f32 %v5930_v8, %v3302_v30 }
0x15a5   : > { %v3298_v50 = vpop.xlane.xlu0 %3297  ;;  %v3295_v44 = vpop.xlane.xlu1 %3294 }
0x15a6   : > { %v3304_v63 = vmul.f32 0.015625, %v3298_v50  ;;  %v3303_v22 = vmul.f32 0.015625, %v3295_v44  ;;  %v3310_v41 = vmul.f32 %v3306_v38, %v3306_v38  ;;  %v4777_v50 = vld [vmem:[%s6147_s12 + $0xf8] sm:$0xff]  }
0x15a7   : > { %v4778_v44 = vld [vmem:[%s6147_s12 + $0xb8] sm:$0xff]   ;;  %4379 = vmatprep.subr.bf16.mxu0 %v4777_v50 }
0x15a8   : > { %v3308_v4 = vsub.f32 %v5932_v54, %v3304_v63  ;;  %v3307_v6 = vsub.f32 %v5938_v17, %v3303_v22  ;;  %v3314_v51 = vsel %vm656_vm0, %v3310_v41, 0.0  ;;  %4380 = vmatpush3.bf16.msra.mxu0 %v4778_v44  ;;  %v4779_v63 = vld [vmem:[%s6147_s12 + $0xf0] sm:$0xff]   ;;  %v4781_v22 = vld [vmem:[%s6147_s12 + $0xe8] sm:$0xff]  }
0x15a9   : > { %3315 = vadd.xlane.f32.xlu0 %v3314_v51  ;;  %v3301_v57 = vpop.xlane.xlu0 %3300  ;;  %4381 = vmatprep.subr.bf16.mxu0 %v4779_v63  ;;  %v4782_v41 = vld [vmem:[%s6147_s12 + $0xa8] sm:$0xff]   ;;  %v4785_v51 = vld [vmem:[%s6147_s12 + $0xd8] sm:$0xff]  }
0x15aa   : > { %v3305_v60 = vmul.f32 0.015625, %v3301_v57  ;;  %v3312_v12 = vmul.f32 %v3308_v4, %v3308_v4  ;;  %v3311_v10 = vmul.f32 %v3307_v6, %v3307_v6  ;;  %v4786_v57 = vld [vmem:[%s6147_s12 + $0x98] sm:$0xff]  }
0x15ac   : > { %v3309_v20 = vsub.f32 %v5940_v18, %v3305_v60  ;;  %v3320_v21 = vsel %vm656_vm0, %v3312_v12, 0.0  ;;  %v3317_v5 = vsel %vm656_vm0, %v3311_v10, 0.0  ;;  %v4787_v60 = vld [vmem:[%s6147_s12 + $0xd0] sm:$0xff]   ;;  %v4789_v10 = vld [vmem:[%s6147_s12 + $0xc8] sm:$0xff]  }
0x15ad   : > { %3321 = vadd.xlane.f32.xlu0 %v3320_v21  ;;  %3318 = vadd.xlane.f32.xlu1 %v3317_v5  ;;  %v4788_v12 = vld [vmem:[%s6147_s12 + $0x90] sm:$0xff]   ;;  %v4791_v21 = vld [vmem:[%s6147_s12 + $0xc0] sm:$0xff]  }
0x15ae   : > { %v3313_v0 = vmul.f32 %v3309_v20, %v3309_v20  ;;  %v4792_v5 = vld [vmem:[%s6147_s12 + $0x80] sm:$0xff]  }
0x15b0   : > { %v3323_v26 = vsel %vm656_vm0, %v3313_v0, 0.0  ;;  %v4206_v0 = vld [vmem:[%s6146_s11 + $0x2] sm:$0x3] }
0x15b1   : > { %3324 = vadd.xlane.f32.xlu1 %v3323_v26  ;;  %v3379_v26 = vrot.slane %v4206_v0, %v5218_v7  ;;  %v3383_v2 = vrot.slane %v4206_v0, %v5224_v9 }
0x1632   : > { %v3316_v16 = vpop.xlane.xlu0 %3315 }
0x1633   : > { %v3326_v35 = vmul.f32 0.015625, %v3316_v16 }
0x1635   : > { %v3330_v59 = vadd.f32 1e-05, %v3326_v35 }
0x1636   : > { %v3322_v58 = vpop.xlane.xlu0 %3321  ;;  %v3319_v27 = vpop.xlane.xlu1 %3318 }
0x1637   : > { %4977 = vrsqrt.f32 %v3330_v59  ;;  %v3328_v39 = vmul.f32 0.015625, %v3322_v58  ;;  %v3327_v37 = vmul.f32 0.015625, %v3319_v27 }
0x1639   : > { %v3331_v15 = vadd.f32 1e-05, %v3327_v37  ;;  %v3332_v42 = vadd.f32 1e-05, %v3328_v39 }
0x163a   : > { %v3325_v13 = vpop.xlane.xlu1 %3324 }
0x163b   : > { %v3329_v43 = vmul.f32 0.015625, %v3325_v13  ;;  %4979 = vrsqrt.f32 %v3331_v15 }
0x163c   : > { %4981 = vrsqrt.f32 %v3332_v42 }
0x163d   : > { %v3333_v62 = vadd.f32 1e-05, %v3329_v43 }
0x163f   : > { %4983 = vrsqrt.f32 %v3333_v62 }
0x1644   : > { %v4978_v49 = vpop.eup %4977 }
0x1645   : > { %v3338_v45 = vmul.f32 %v4978_v49, %v3306_v38 }
0x1647   : > { %v3348_v23 = vmul.f32 %v4196_v40, %v3338_v45 }
0x1648   : > { %v4980_v48 = vpop.eup %4979 }
0x1649   : > { %v3339_v1 = vmul.f32 %v4980_v48, %v3307_v6  ;;  %v4982_v52 = vpop.eup %4981  ;;  %v3358_v36 = vadd.f32 %v4197_v53, %v3348_v23  ;;  %v4784_v6 = vld [vmem:[%s6147_s12 + $0xa0] sm:$0xff]  }
0x164a   : > { %v3340_v56 = vmul.f32 %v4982_v52, %v3308_v4  ;;  %v4783_v4 = vld [vmem:[%s6147_s12 + $0xe0] sm:$0xff]  }
0x164b   : > { %v3349_v14 = vmul.f32 %v4196_v40, %v3339_v1 }
0x164c   : > { %v4984_v61 = vpop.eup %4983  ;;  %v3350_v19 = vmul.f32 %v4196_v40, %v3340_v56 }
0x164d   : > { %v3341_v46 = vmul.f32 %v4984_v61, %v3309_v20  ;;  %v3359_v47 = vadd.f32 %v4197_v53, %v3349_v14  ;;  %v4790_v20 = vld [vmem:[%s6147_s12 + $0x88] sm:$0xff]  }
0x164e   : > { %v3360_v30 = vadd.f32 %v4197_v53, %v3350_v19 }
0x164f   : > { %v3362_v33 = vpack.c.bf16 %v3359_v47, %v3358_v36  ;;  %v3351_v55 = vmul.f32 %v4196_v40, %v3341_v46 }
0x1651   : > { %4215 = vmatmul.mubr.msk.bf16.vlgmr.msra.gmra.mxu1 %vm656_vm0, %v3362_v33  ;;  %v3361_v24 = vadd.f32 %v4197_v53, %v3351_v55 }
0x1652   : > { %3474 = vmatprep.mubr.bf16.mxu1 %v5033_v32  ;;  %v4780_v32 = vld [vmem:[%s6147_s12 + $0xb0] sm:$0xff]  }
0x1653   : > { %v3363_v38 = vpack.c.bf16 %v3361_v24, %v3360_v30  ;;  %4382 = vmatpush3.bf16.msra.mxu0 %v4780_v32 }
0x1654   : > { %4383 = vmatprep.subr.bf16.mxu0 %v4781_v22 }
0x1657   : > { %4384 = vmatpush3.bf16.msra.mxu0 %v4782_v41 }
0x1658   : > { %4385 = vmatprep.subr.bf16.mxu0 %v4783_v4 }
0x1659   : > { %4216 = vmatmul.mubr.msk.bf16.gmra.mxu1 %vm656_vm0, %v3363_v38 }
0x165b   : > { %4386 = vmatpush3.bf16.msra.mxu0 %v4784_v6 }
0x165c   : > { %4387 = vmatprep.subr.bf16.mxu0 %v4785_v51 }
0x165f   : > { %4388 = vmatpush3.bf16.msra.mxu0 %v4786_v57 }
0x1660   : > { %4389 = vmatprep.subr.bf16.mxu0 %v4787_v60 }
0x1663   : > { %4390 = vmatpush3.bf16.msra.mxu0 %v4788_v12 }
0x1664   : > { %4391 = vmatprep.subr.bf16.mxu0 %v4789_v10 }
0x1667   : > { %4392 = vmatpush3.bf16.msra.mxu0 %v4790_v20 }
0x1668   : > { %4393 = vmatprep.subr.bf16.mxu0 %v4791_v21 }
0x166b   : > { %4394 = vmatpush3.bf16.msra.mxu0 %v4792_v5 }
0x1711   : > { %v3466_v25 = vpop.f32.mrf.mxu1 }
0x1712   : > { %v6042_v28 = vadd.f32 %v3466_v25, %v3379_v26 }
0x1713   : > { %v3468_v3 = vpop.f32.mrf.mxu1 }
0x1714   : > { %v3485_v29 = vmul.f32 -1.702, %v6042_v28  ;;  %v6045_v31 = vadd.f32 %v3468_v3, %v3383_v2 }
0x1715   : > { %v3470_v34 = vpop.f32.mrf.mxu1 }
0x1716   : > { %v3493_v11 = vmul.f32 1.442695, %v3485_v29  ;;  %v3486_v16 = vmul.f32 -1.702, %v6045_v31  ;;  %v3471_v35 = vadd.f32 %v3470_v34, %v3379_v26 }
0x1717   : > { %v3472_v59 = vpop.f32.mrf.mxu1 }
0x1718   : > { %v3495_v58 = vmul.f32 1.442695, %v3486_v16  ;;  %v3487_v27 = vmul.f32 -1.702, %v3471_v35  ;;  %v3473_v39 = vadd.f32 %v3472_v59, %v3383_v2  ;;  %4985 = vpow2.f32 %v3493_v11 }
0x1719   : > { %v3476_v7 = vpop.f32.mrf.mxu1 }
0x171a   : > { %4987 = vpow2.f32 %v3495_v58  ;;  %v3497_v9 = vmul.f32 1.442695, %v3487_v27  ;;  %v3488_v37 = vmul.f32 -1.702, %v3473_v39  ;;  %v6048_v15 = vadd.f32 %v3476_v7, %v3379_v26 }
0x171b   : > { %v3478_v42 = vpop.f32.mrf.mxu1 }
0x171c   : > { %4989 = vpow2.f32 %v3497_v9  ;;  %v3499_v13 = vmul.f32 1.442695, %v3488_v37  ;;  %v3489_v43 = vmul.f32 -1.702, %v6048_v15  ;;  %v3479_v62 = vadd.f32 %v3478_v42, %v3383_v2 }
0x171d   : > { %v3480_v49 = vpop.f32.mrf.mxu1 }
0x171e   : > { %4991 = vpow2.f32 %v3499_v13  ;;  %v3501_v45 = vmul.f32 1.442695, %v3489_v43  ;;  %v3490_v40 = vmul.f32 -1.702, %v3479_v62  ;;  %v3481_v48 = vadd.f32 %v3480_v49, %v3379_v26 }
0x171f   : > { %v3482_v1 = vpop.f32.mrf.mxu1 }
0x1720   : > { %v3503_v23 = vmul.f32 1.442695, %v3490_v40  ;;  %v3491_v52 = vmul.f32 -1.702, %v3481_v48  ;;  %v3483_v53 = vadd.f32 %v3482_v1, %v3383_v2  ;;  %4993 = vpow2.f32 %v3501_v45 }
0x1722   : > { %4995 = vpow2.f32 %v3503_v23  ;;  %v3505_v61 = vmul.f32 1.442695, %v3491_v52  ;;  %v3492_v14 = vmul.f32 -1.702, %v3483_v53 }
0x1724   : > { %4997 = vpow2.f32 %v3505_v61  ;;  %v3507_v46 = vmul.f32 1.442695, %v3492_v14 }
0x1725   : > { %v4986_v36 = vpop.eup %4985 }
0x1726   : > { %4999 = vpow2.f32 %v3507_v46  ;;  %v3509_v55 = vadd.f32 1.0, %v4986_v36 }
0x1727   : > { %v4988_v47 = vpop.eup %4987 }
0x1728   : > { %v3510_v56 = vadd.f32 1.0, %v4988_v47 }
0x1729   : > { %v4990_v33 = vpop.eup %4989 }
0x172a   : > { %v3511_v19 = vadd.f32 1.0, %v4990_v33  ;;  %5001 = vrcp.f32 %v3510_v56  ;;  %v3838_v33 = vld [vmem:[%s6151_s16 + $0x38] sm:$0xff] }
0x172b   : > { %v4992_v24 = vpop.eup %4991 }
0x172c   : > { %5003 = vrcp.f32 %v3511_v19  ;;  %v3512_v30 = vadd.f32 1.0, %v4992_v24  ;;  %v3836_v19 = vld [vmem:[%s6151_s16 + $0x28] sm:$0xff]  ;;  %v3835_v24 = vld [vmem:[%s6151_s16 + $0x20] sm:$0xff] }
0x172d   : > { %5005 = vrcp.f32 %v3509_v55  ;;  %v4994_v38 = vpop.eup %4993  ;;  %v3837_v55 = vld [vmem:[%s6151_s16 + $0x30] sm:$0xff] }
0x172e   : > { %5007 = vrcp.f32 %v3512_v30  ;;  %v3513_v32 = vadd.f32 1.0, %v4994_v38  ;;  %v3834_v30 = vld [vmem:[%s6151_s16 + $0x18] sm:$0xff]  ;;  %v3833_v38 = vld [vmem:[%s6151_s16 + $0x10] sm:$0xff] }
0x172f   : > { %v4996_v50 = vpop.eup %4995 }
0x1730   : > { %v3514_v44 = vadd.f32 1.0, %v4996_v50  ;;  %v3832_v50 = vld [vmem:[%s6151_s16 + $0x8] sm:$0xff] }
0x1731   : > { %v4998_v63 = vpop.eup %4997 }
0x1732   : > { %v3515_v22 = vadd.f32 1.0, %v4998_v63  ;;  %5009 = vrcp.f32 %v3514_v44  ;;  %v3831_v44 = vld [vmem:[%s6151_s16] sm:$0xff] }
0x1733   : > { %v5000_v41 = vpop.eup %4999 }
0x1734   : > { %5011 = vrcp.f32 %v3515_v22  ;;  %v3516_v4 = vadd.f32 1.0, %v5000_v41 }
0x1735   : > { %5013 = vrcp.f32 %v3513_v32 }
0x1736   : > { %5015 = vrcp.f32 %v3516_v4  ;;  %v4268_v4 = vld [vmem:[%s6149_s14] ss:$0 sm:$0xff] }
0x1737   : > { %v5002_v6 = vpop.eup %5001 }
0x1738   : > { %v3526_v10 = vmul.f32 %v5002_v6, %v6045_v31  ;;  %v5042_v31 = vmov 0.0  }
0x1739   : > { %v5004_v51 = vpop.eup %5003  ;;  %4575 = vmatprep.subr.mxu1 %v5042_v31  ;;  %4583 = vmatprep.mubr.msk.f32.mxu1 %vm5043_vm1, %v5042_v31 }
0x173a   : > { %v5006_v57 = vpop.eup %5005  ;;  %v3527_v12 = vmul.f32 %v5004_v51, %v3471_v35  ;;  %v4269_v51 = vld [vmem:[%s6150_s15] ss:$0 sm:$0xff] }
0x173b   : > { %v5008_v60 = vpop.eup %5007  ;;  %v3525_v21 = vmul.f32 %v5006_v57, %v6042_v28 }
0x173c   : > { %v3528_v20 = vmul.f32 %v5008_v60, %v3473_v39 }
0x173d   : > { %v3533_v0 = vpack.c.bf16 %v3527_v12, %v3525_v21 }
0x173e   : > { %v3534_v5 = vpack.c.bf16 %v3528_v20, %v3526_v10 }
0x173f   : > { %v5010_v26 = vpop.eup %5009 }
0x1740   : > { %3706 = vmatprep.mubr.bf16.mxu0 %v3534_v5  ;;  %v3530_v34 = vmul.f32 %v5010_v26, %v3479_v62  ;;  %v4250_v62 = vld [vmem:[%s6148_s13 + $0x1] ss:$0 sm:$0xff] }
0x1741   : > { %v5012_v2 = vpop.eup %5011  ;;  %3707 = vmatmul.mubr.bf16.vlgmr.msra.gmra.mxu0 %v3533_v0 }
0x1742   : > { %v5014_v25 = vpop.eup %5013  ;;  %v3531_v29 = vmul.f32 %v5012_v2, %v3481_v48  ;;  %v3919_v2 = vld [vmem:[%s6152_s17] sm:$0x3] }
0x1743   : > { %v5016_v3 = vpop.eup %5015  ;;  %v3529_v16 = vmul.f32 %v5014_v25, %v6048_v15  ;;  %v3997_v25 = vstv %s3996_s27 }
0x1744   : > { %v3532_v11 = vmul.f32 %v5016_v3, %v3483_v53 }
0x1745   : > { %v3535_v59 = vpack.c.bf16 %v3531_v29, %v3529_v16 }
0x1746   : > { %v3536_v35 = vpack.c.bf16 %v3532_v11, %v3530_v34 }
0x1748   : > { %3714 = vmatprep.mubr.bf16.mxu0 %v3536_v35 }
0x1749   : > { %3715 = vmatmul.mubr.bf16.gmra.mxu0 %v3535_v59 }
0x1801   : > { %v4395_v28 = vpop.f32.mrf.mxu0 }
0x1803   : > { %v4396_v58 = vpop.f32.mrf.mxu0 }
0x1804   : > { %v4397_v49 = vadd.f32 %v4396_v58, %v4395_v28 }
0x1805   : > { %v4398_v27 = vpop.f32.mrf.mxu0 }
0x1806   : > { %v3709_v23 = vadd.f32 %v4397_v49, %v4250_v62 }
0x1807   : > { %v4399_v39 = vpop.f32.mrf.mxu0 }
0x1808   : > { %v4400_v13 = vadd.f32 %v4399_v39, %v4398_v27  ;;  %v3723_v61 = vadd.f32 %v3709_v23, %v5930_v8 }
0x1809   : > { %v4401_v7 = vpop.f32.mrf.mxu0 }
0x180a   : > { %v3712_v48 = vadd.f32 %v4400_v13, %v4250_v62 }
0x180b   : > { %v4402_v9 = vpop.f32.mrf.mxu0 }
0x180c   : > { %v4403_v15 = vadd.f32 %v4402_v9, %v4401_v7  ;;  %v3724_v53 = vadd.f32 %v3712_v48, %v5938_v17 }
0x180d   : > { %v4404_v37 = vpop.f32.mrf.mxu0 }
0x180e   : > { %v3717_v45 = vadd.f32 %v4403_v15, %v4250_v62 }
0x180f   : > { %v4405_v42 = vpop.f32.mrf.mxu0 }
0x1810   : > { %v4406_v43 = vadd.f32 %v4405_v42, %v4404_v37  ;;  %v3725_v52 = vadd.f32 %v3717_v45, %v5932_v54 }
0x1812   : > { %v3720_v40 = vadd.f32 %v4406_v43, %v4250_v62 }
0x1814   : > { %v3726_v1 = vadd.f32 %v3720_v40, %v5940_v18  ;;  %v3727_v18 = vld [vmem:[%s616_s23] sm:$0x3] }
0x1816   : > { %4576 = vmatpush3.msra.mxu1 %v3726_v1 }
0x1817   : > { %4577 = vmatprep.subr.mxu1 %v5042_v31 }
0x1818   : > { %4578 = vmatpush3.msra.mxu1 %v3725_v52 }
0x1819   : > { %4579 = vmatprep.subr.mxu1 %v5042_v31 }
0x181a   : > { %4580 = vmatpush3.msra.mxu1 %v3724_v53 }
0x181b   : > { %4581 = vmatprep.subr.mxu1 %v5042_v31 }
0x181c   : > { %4582 = vmatpush3.msra.mxu1 %v3723_v61 }
0x181d   : > { %4584 = vmatmul.mubr.msk.f32.vlgmr.msra.gmra.mxu1 %vm929_vm14, %v3727_v18  ;;  %4586 = vmatprep.subr.mxu1 %v5042_v31 }
0x181e   : > { %4602 = vmatprep.mubr.msk.f32.mxu1 %vm5043_vm1, %v5042_v31  ;;  %4587 = vmatpush3.msra.mxu1 %v3838_v33 }
0x181f   : > { %4588 = vmatprep.subr.mxu1 %v5042_v31 }
0x1820   : > { %4589 = vmatpush3.msra.mxu1 %v3837_v55 }
0x1821   : > { %4590 = vmatprep.subr.mxu1 %v5042_v31 }
0x1822   : > { %4591 = vmatpush3.msra.mxu1 %v3836_v19 }
0x1823   : > { %4592 = vmatprep.subr.mxu1 %v5042_v31 }
0x1824   : > { %4593 = vmatpush3.msra.mxu1 %v3835_v24 }
0x1825   : > { %4594 = vmatprep.subr.mxu1 %v5042_v31 }
0x1826   : > { %4595 = vmatpush3.msra.mxu1 %v3834_v30 }
0x1827   : > { %4596 = vmatprep.subr.mxu1 %v5042_v31 }
0x1828   : > { %4597 = vmatpush3.msra.mxu1 %v3833_v38 }
0x1829   : > { %4598 = vmatprep.subr.mxu1 %v5042_v31 }
0x182a   : > { %4599 = vmatpush3.msra.mxu1 %v3832_v50 }
0x182b   : > { %4600 = vmatprep.subr.mxu1 %v5042_v31 }
0x182c   : > { %4601 = vmatpush3.msra.mxu1 %v3831_v44 }
0x182d   : > { %4605 = vmatprep.subr.mxu1 %v5042_v31 }
0x18dd   : > { %v3797_v54 = vpop.f32.mrf.mxu1 }
0x18de   : > { %v3804_v17 = vsel %vm3803_vm2, %v3797_v54, 0.0 }
0x18df   : > { %3805 = vadd.xlane.f32.xlu0 %v3804_v17  ;;  %v4585_v14 = vpop.f32.mrf.mxu1 }
0x1968   : > { %v3806_v46 = vpop.xlane.xlu0 %3805 }
0x1969   : > { %v3807_v36 = vmul.f32 0.015625, %v3806_v46 }
0x196b   : > { %v3808_v8 = vsub.f32 %v3797_v54, %v3807_v36 }
0x196d   : > { %v3809_v47 = vmul.f32 %v3808_v8, %v3808_v8 }
0x196f   : > { %v3810_v56 = vsel %vm3803_vm2, %v3809_v47, 0.0 }
0x1970   : > { %3811 = vadd.xlane.f32.xlu1 %v3810_v56 }
0x19f9   : > { %v3812_v63 = vpop.xlane.xlu1 %3811 }
0x19fa   : > { %v3813_v32 = vmul.f32 0.015625, %v3812_v63 }
0x19fc   : > { %v3814_v22 = vadd.f32 1e-05, %v3813_v32 }
0x19fe   : > { %5017 = vrsqrt.f32 %v3814_v22 }
0x1a0b   : > { %v5018_v41 = vpop.eup %5017 }
0x1a0c   : > { %v3816_v6 = vmul.f32 %v5018_v41, %v3808_v8 }
0x1a0e   : > { %v3823_v57 = vmul.f32 %v4268_v4, %v3816_v6 }
0x1a10   : > { %v3830_v60 = vadd.f32 %v4269_v51, %v3823_v57 }
0x1a12   : > { %4603 = vmatmul.mubr.msk.f32.vlgmr.msra.gmra.mxu1 %vm656_vm0, %v3830_v60  ;;  %vm3999_vm0 = vcmask 9216  }
0x1a13   : > { %4607 = vmatprep.mubr.msk.f32.mxu1 %vm5043_vm1, %v5042_v31 }
0x1ad2   : > { %v3908_v12 = vpop.f32.mrf.mxu1 }
0x1ad3   : > { %v3912_v10 = vmul.f32 %v3908_v12, %v3908_v12 }
0x1ad4   : > { %v4604_v20 = vpop.f32.mrf.mxu1 }
0x1ad5   : > { %v3914_v21 = vsel %vm3913_vm3, %v3912_v10, 0.0 }
0x1ad6   : > { %3915 = vadd.xlane.f32.xlu0 %v3914_v21 }
0x1b5f   : > { %v3916_v5 = vpop.xlane.xlu0 %3915 }
0x1b60   : > { %5019 = vrsqrt.f32 %v3916_v5 }
0x1b6d   : > { %v5020_v0 = vpop.eup %5019 }
0x1b6e   : > { %v3918_v26 = vmul.f32 %v5020_v0, %v3908_v12 }
0x1b70   : > { %4606 = vmatpush3.xpose.msk.msra.mxu1 %vm929_vm14, %v3918_v26 }
0x1b73   : > { %4608 = vmatmul.mubr.msk.f32.vlgmr.msra.gmra.mxu1 %vm929_vm14, %v3919_v2 }
0x1c33   : > { %v3992_v3 = vpop.f32.mrf.mxu1 }
0x1c34   : > { %v3998_v29 = vmul.f32 %v3997_v25, %v3992_v3 }
0x1c35   : > { %v4609_v34 = vpop.f32.mrf.mxu1 }
0x1c36   : > { %4000 = vst.msk [vmem:[%s620_s30] sm:$0x3] %vm3999_vm0, %v3998_v29 }
0x1c37 PF: > { %s30_s20 = sadd.s32 1, %s5031_s20  }
0x1c38   : > { %p27_p5 = scmp.ge.s32.totalorder %s30_s20, 4  }
0x1c3a   :  { %29 = sbr.rel (!%p27_p5) target bundleno = 6 (0x6), region = 141 }

</bundles_post_ra>
